<compile_context>
chip_gen: v7x
topology: tpu7x:2x2x1
jax: 0.10.0
libtpu: 0.0.40
codegen_flags: <defaults>
</compile_context>

<pallas_src>
import functools
import math

import jax
import jax.numpy as jnp
import numpy as np
from jax.experimental import pallas as pl
from jax.experimental.pallas import tpu as pltpu


# ----------------------------------------------------------------------------
# Activation helpers
# ----------------------------------------------------------------------------
def _gelu_exact(x):
    # PyTorch F.gelu default = exact erf GELU.
    return 0.5 * x * (1.0 + jax.lax.erf(x * (1.0 / math.sqrt(2.0))))


def _gelu_tanh(x):
    # tanh approximation (routes through the EUP, leaving VALU slots free).
    c = math.sqrt(2.0 / math.pi)
    return 0.5 * x * (1.0 + jnp.tanh(c * (x + 0.044715 * x * x * x)))


# ----------------------------------------------------------------------------
# Fused GCN layer kernel:  (A_hat[tile] @ X) @ W + b [-> GELU] -> LayerNorm
# ----------------------------------------------------------------------------
def gcn_layer_kernel(cols_ref, cnt_ref, a_ref, f_ref, w_ref, p_ref, o_ref,
                     acc_ref, *, apply_gelu, gelu_approx, eps):
    # cols_ref/cnt_ref: SMEM scalar-prefetch (occupied column blocks per row
    #                   tile; cols_ref unused here, consumed by the index_maps)
    # a_ref : (block_n, block_k) occupied A_hat block (compute dtype)
    # f_ref : (block_k, d_in)    matching feature block
    # w_ref : (d_in, d_out)      GCN weight (resident, Buffered(1))
    # p_ref : (8, d_out)         rows 0/1/2 = bias / LN gamma / LN beta (f32)
    # acc_ref: (block_n, d_in)   f32 aggregation accumulator
    del cols_ref
    i = pl.program_id(0)
    k = pl.program_id(1)

    @pl.when(k == 0)
    def _():
        acc_ref[...] = jnp.zeros_like(acc_ref)

    # Accumulate only over the occupied column blocks of this row tile.
    @pl.when(k < cnt_ref[i])
    def _():
        acc_ref[...] += jnp.dot(a_ref[...], f_ref[...],
                                preferred_element_type=jnp.float32)

    # Epilogue: dense projection + bias + (GELU) + LayerNorm, all in f32.
    @pl.when(k == pl.num_programs(1) - 1)
    def _():
        h = jnp.dot(acc_ref[...].astype(w_ref.dtype), w_ref[...],
                    preferred_element_type=jnp.float32)
        p = p_ref[...].astype(jnp.float32)
        h = h + p[0:1, :]                              # bias
        if apply_gelu:
            h = _gelu_tanh(h) if gelu_approx else _gelu_exact(h)
        mu = jnp.mean(h, axis=-1, keepdims=True)       # two-pass LN stats
        c = h - mu
        var = jnp.mean(c * c, axis=-1, keepdims=True)
        h = c * jax.lax.rsqrt(var + eps)
        h = h * p[1:2, :] + p[2:3, :]                  # gamma / beta
        o_ref[...] = h.astype(o_ref.dtype)


# ----------------------------------------------------------------------------
# VMEM budget (accurate resident footprint, clamped to chip capacity - slack)
# ----------------------------------------------------------------------------
def _vmem_budget(block_n, block_k, d_in, d_out, compute_dtype, out_dtype,
                 a_buffers):
    itm = jnp.dtype(compute_dtype).itemsize
    oitm = jnp.dtype(out_dtype).itemsize
    need = (a_buffers * block_n * block_k * itm       # A block stream
            + 2 * block_k * d_in * itm                # feature block stream
            + d_in * d_out * itm                      # weight (Buffered(1))
            + 8 * max(d_out, 128) * 4                 # packed bias/gamma/beta
            + 2 * block_n * d_out * oitm              # output tile
            + block_n * d_in * 4                      # f32 accumulator scratch
            + 4 * block_n * max(d_in, d_out) * 4)     # epilogue temporaries
    try:
        cap = int(getattr(pltpu.get_tpu_info(), "vmem_capacity_bytes",
                          64 * 1024 * 1024))
    except Exception:
        cap = 64 * 1024 * 1024
    # Leave headroom for compiler-internal scratch (never the physical cap).
    cap = max(32 * 1024 * 1024, cap - 16 * 1024 * 1024)
    return int(min(max(need + need // 4 + (4 << 20), 32 * 1024 * 1024), cap))


# ----------------------------------------------------------------------------
# One fused GCN + (GELU) + LayerNorm layer
# ----------------------------------------------------------------------------
def _gcn_layer(a_hat, feats, w, packed, cols, cnt, max_b, *, apply_gelu,
               gelu_approx, block_n, block_k, out_dtype, a_buffers=2,
               eps=1e-5):
    n_pad, d_in = feats.shape
    d_out = w.shape[1]
    n_rt = n_pad // block_n

    def a_map(i, k, cols_ref, cnt_ref):
        kc = jnp.minimum(k, cnt_ref[i] - 1)            # clamp past the count
        return i, cols_ref[i * max_b + kc]

    def f_map(i, k, cols_ref, cnt_ref):
        kc = jnp.minimum(k, cnt_ref[i] - 1)
        return cols_ref[i * max_b + kc], 0

    const_map = lambda i, k, cols_ref, cnt_ref: (0, 0)
    out_map = lambda i, k, cols_ref, cnt_ref: (i, 0)

    kernel = functools.partial(gcn_layer_kernel, apply_gelu=apply_gelu,
                               gelu_approx=gelu_approx, eps=eps)
    budget = _vmem_budget(block_n, block_k, d_in, d_out, feats.dtype,
                          out_dtype, a_buffers)

    def build(buffered):
        def spec(shape, imap, bufs):
            if buffered and bufs is not None:
                return pl.BlockSpec(shape, imap,
                                    pipeline_mode=pl.Buffered(bufs))
            return pl.BlockSpec(shape, imap)

        return pl.pallas_call(
            kernel,
            out_shape=jax.ShapeDtypeStruct((n_pad, d_out), out_dtype),
            grid_spec=pltpu.PrefetchScalarGridSpec(
                num_scalar_prefetch=2,
                grid=(n_rt, max_b),
                in_specs=[
                    spec((block_n, block_k), a_map, a_buffers),  # A block
                    spec((block_k, d_in), f_map, None),          # features
                    spec((d_in, d_out), const_map, 1),           # weight
                    spec((8, d_out), const_map, 1),              # b/gamma/beta
                ],
                out_specs=pl.BlockSpec((block_n, d_out), out_map),
                scratch_shapes=[pltpu.VMEM((block_n, d_in), jnp.float32)],
            ),
            compiler_params=pltpu.CompilerParams(
                dimension_semantics=("parallel", "arbitrary"),
                vmem_limit_bytes=budget,
            ),
        )(cols, cnt, a_hat, feats, w, packed)

    try:
        return build(buffered=True)
    except Exception:   # graceful fallback if pipeline_mode is unsupported
        return build(buffered=False)


# ----------------------------------------------------------------------------
# Wrapper-side prep: dense normalised adjacency, block occupancy, param pack
# ----------------------------------------------------------------------------
def _gcn_norm_dense(edge_index, num_nodes, n_pad, dtype=jnp.float32):
    """Dense D^-1/2 (A + I) D^-1/2, matching torch_geometric gcn_norm
    (add_self_loops=True, improved=False, flow='source_to_target')."""
    src = edge_index[0].astype(jnp.int32)
    dst = edge_index[1].astype(jnp.int32)
    loop = jnp.arange(num_nodes, dtype=jnp.int32)
    src = jnp.concatenate([src, loop])
    dst = jnp.concatenate([dst, loop])
    ew = jnp.ones(src.shape[0], jnp.float32)
    deg = jnp.zeros((num_nodes,), jnp.float32).at[dst].add(ew)
    dis = jnp.where(deg > 0, jax.lax.rsqrt(deg), 0.0)
    vals = dis[src] * ew * dis[dst]
    a = jnp.zeros((n_pad, n_pad), jnp.float32).at[dst, src].add(vals)
    return a.astype(dtype)


def _block_occupancy(edge_index, num_nodes, n_pad, block_n, block_k):
    """Host-side (numpy) list of occupied A_hat column blocks per row tile."""
    n_rt, n_kb = n_pad // block_n, n_pad // block_k
    try:
        ei = np.asarray(edge_index)
    except Exception:
        ei = None                      # traced under jit -> dense fallback
    if ei is None:
        cols = np.tile(np.arange(n_kb, dtype=np.int32), n_rt)
        cnt = np.full((n_rt,), n_kb, dtype=np.int32)
        return jnp.asarray(cols), jnp.asarray(cnt), n_kb
    loop = np.arange(num_nodes, dtype=np.int64)
    rows = np.concatenate([ei[1].astype(np.int64), loop]) // block_n   # dst
    colb = np.concatenate([ei[0].astype(np.int64), loop]) // block_k   # src
    occ = np.zeros((n_rt, n_kb), dtype=bool)
    occ[rows, colb] = True
    cnt = np.maximum(occ.sum(axis=1), 1).astype(np.int32)
    max_b = int(cnt.max())
    cols = np.zeros((n_rt, max_b), dtype=np.int32)
    for i in range(n_rt):
        idx = np.nonzero(occ[i])[0].astype(np.int32)
        if idx.size == 0:
            idx = np.zeros((1,), np.int32)
        cols[i, :idx.size] = idx
        cols[i, idx.size:] = idx[-1]   # pad by repeating -> no extra DMA
    return jnp.asarray(cols.reshape(-1)), jnp.asarray(cnt), max_b


def _pack_params(bias, gamma, beta):
    d = bias.reshape(-1).shape[0]
    p = jnp.zeros((8, d), jnp.float32)
    p = p.at[0].set(bias.reshape(-1).astype(jnp.float32))
    p = p.at[1].set(gamma.reshape(-1).astype(jnp.float32))
    p = p.at[2].set(beta.reshape(-1).astype(jnp.float32))
    return p


def _pick_block_n(n, cap=512):
    """Largest power-of-two tile in [128, cap] that keeps >=2 row tiles."""
    bn = 128
    while bn < cap and pl.cdiv(n, bn * 2) >= 2:
        bn *= 2
    return bn


# ----------------------------------------------------------------------------
# Full forward pass
# ----------------------------------------------------------------------------
def graph_conv_network(x, edge_index, params, *, block_n=None, block_k=None,
                       compute_dtype=jnp.bfloat16, gelu_approx=True,
                       a_buffers=2):
    """Forward pass of GraphConvNetwork (dropout in eval mode = identity)."""
    n, in_dim = x.shape
    block_n = _pick_block_n(n) if block_n is None else block_n
    block_k = block_n if block_k is None else block_k
    tile = (block_n * block_k) // math.gcd(block_n, block_k)
    n_pad = tile * pl.cdiv(n, tile)   # ragged N -> pad (padded A rows/cols = 0)

    a_hat = _gcn_norm_dense(edge_index, n, n_pad, dtype=compute_dtype)
    x_pad = jnp.zeros((n_pad, in_dim), compute_dtype).at[:n].set(
        x.astype(compute_dtype))
    cols, cnt, max_b = _block_occupancy(edge_index, n, n_pad, block_n, block_k)

    p1 = _pack_params(params["b1"], params["g1"], params["be1"])
    p2 = _pack_params(params["b2"], params["g2"], params["be2"])

    h = _gcn_layer(a_hat, x_pad, params["w1"].astype(compute_dtype), p1,
                   cols, cnt, max_b, apply_gelu=True, gelu_approx=gelu_approx,
                   block_n=block_n, block_k=block_k, out_dtype=compute_dtype,
                   a_buffers=a_buffers)
    # dropout1: eval mode => identity.
    out = _gcn_layer(a_hat, h, params["w2"].astype(compute_dtype), p2,
                     cols, cnt, max_b, apply_gelu=False,
                     gelu_approx=gelu_approx, block_n=block_n,
                     block_k=block_k, out_dtype=jnp.float32,
                     a_buffers=a_buffers)
    return out[:n]


# ----------------------------------------------------------------------------
# Parameters / pure-JAX reference
# ----------------------------------------------------------------------------
def init_params(key, input_dim, hidden_dim, output_dim, *,
                exercise_all_paths=True):
    """GCNConv weights: glorot. Bias/LN-beta default 0, LN-gamma 1; perturbed
    so the self-test actually exercises those code paths."""
    ks = jax.random.split(key, 8)

    def glorot(k, fi, fo):
        bound = math.sqrt(6.0 / (fi + fo))
        return jax.random.uniform(k, (fi, fo), jnp.float32, -bound, bound)

    def maybe(k, shape, default):
        if exercise_all_paths:
            return default + 0.1 * jax.random.normal(k, shape, jnp.float32)
        return jnp.full(shape, default, jnp.float32)

    return {
        "w1": glorot(ks[0], input_dim, hidden_dim),
        "b1": maybe(ks[1], (1, hidden_dim), 0.0),
        "g1": maybe(ks[2], (1, hidden_dim), 1.0),
        "be1": maybe(ks[3], (1, hidden_dim), 0.0),
        "w2": glorot(ks[4], hidden_dim, output_dim),
        "b2": maybe(ks[5], (1, output_dim), 0.0),
        "g2": maybe(ks[6], (1, output_dim), 1.0),
        "be2": maybe(ks[7], (1, output_dim), 0.0),
    }


def _layernorm_ref(h, gamma, beta, eps=1e-5):
    mu = jnp.mean(h, axis=-1, keepdims=True)
    var = jnp.mean((h - mu) ** 2, axis=-1, keepdims=True)
    return (h - mu) * jax.lax.rsqrt(var + eps) * gamma + beta


def graph_conv_network_ref(x, edge_index, params):
    """Pure-JAX reference matching the PyTorch module (eval mode)."""
    n = x.shape[0]
    a = _gcn_norm_dense(edge_index, n, n, jnp.float32)
    h = a @ (x @ params["w1"]) + params["b1"]
    h = _gelu_exact(h)
    h = _layernorm_ref(h, params["g1"], params["be1"])
    h = a @ (h @ params["w2"]) + params["b2"]
    h = _layernorm_ref(h, params["g2"], params["be2"])
    return h


# ----------------------------------------------------------------------------
# Self-test
# ----------------------------------------------------------------------------
if __name__ == "__main__":
    # Small shapes consistent with the module (ctor dims shrunk; N is
    # deliberately NOT a multiple of the 128-row tile to exercise padding).
    N, E = 200, 800
    INPUT_DIM, HIDDEN_DIM, OUTPUT_DIM = 128, 256, 128

    key = jax.random.PRNGKey(0)
    kx, ke, kp = jax.random.split(key, 3)
    x = jax.random.normal(kx, (N, INPUT_DIM), jnp.float32)
    edge_index = jax.random.randint(ke, (2, E), 0, N, dtype=jnp.int32)
    params = init_params(kp, INPUT_DIM, HIDDEN_DIM, OUTPUT_DIM)

    ref = graph_conv_network_ref(x, edge_index, params)

    # 1) Strict f32 path (erf GELU, f32 A/X/W) vs the pure-JAX reference.
    out = graph_conv_network(x, edge_index, params,
                             compute_dtype=jnp.float32, gelu_approx=False)
    out = jax.block_until_ready(out)
    assert out.shape == (N, OUTPUT_DIM)
    err = float(jnp.max(jnp.abs(out - ref)))
    assert err < 2e-3, f"f32 mismatch, max abs err = {err}"

    # 2) Default perf path: bf16 matmul operands + tanh GELU (f32 accum/LN).
    out_fast = jax.block_until_ready(graph_conv_network(x, edge_index, params))
    assert out_fast.shape == (N, OUTPUT_DIM)
    assert float(jnp.max(jnp.abs(out_fast - ref))) < 0.25, "bf16 path diverged"

    # 3) Structured-sparse chain graph: exercises the block-skip path
    #    (row tiles with fewer occupied column blocks than the grid extent).
    chain = jnp.stack([jnp.arange(N - 1, dtype=jnp.int32),
                       jnp.arange(1, N, dtype=jnp.int32)])
    ref_c = graph_conv_network_ref(x, chain, params)
    out_c = graph_conv_network(x, chain, params,
                               compute_dtype=jnp.float32, gelu_approx=False)
    out_c = jax.block_until_ready(out_c)
    errc = float(jnp.max(jnp.abs(out_c - ref_c)))
    assert errc < 2e-3, f"block-sparse mismatch, max abs err = {errc}"

    print("KERNEL_OK")
</pallas_src>

<mosaic_0001>
module attributes {stable_mosaic.version = 11 : i64} {
  func.func @gcn_layer_kernel(%arg0: i32, %arg1: i32, %arg2: memref<4xi32, #tpu.memory_space<smem>>, %arg3: memref<2xi32, #tpu.memory_space<smem>>, %arg4: memref<128x128xf32, #tpu.memory_space<vmem>>, %arg5: memref<128x128xf32, #tpu.memory_space<vmem>>, %arg6: memref<128x256xf32, #tpu.memory_space<vmem>>, %arg7: memref<8x256xf32, #tpu.memory_space<vmem>>, %arg8: memref<128x256xf32, #tpu.memory_space<vmem>>, %arg9: memref<128x128xf32, #tpu.memory_space<vmem>>) attributes {dimension_semantics = [#tpu.dimension_semantics<parallel>, #tpu.dimension_semantics<arbitrary>], iteration_bounds = array<i64: 2, 2>, scalar_prefetch = 2 : i64, scratch_operands = 1 : i64, tpu.core_type = #tpu.core_type<tc>, window_params = [{pipeline_mode = #tpu.pipeline_mode<double_buffered>, transform_indices = @transform_0, window_bounds = array<i64: 128, 128>}, {transform_indices = @transform_1, window_bounds = array<i64: 128, 128>}, {pipeline_mode = #tpu.pipeline_mode<synchronous>, transform_indices = @transform_2, window_bounds = array<i64: 128, 256>}, {pipeline_mode = #tpu.pipeline_mode<synchronous>, transform_indices = @transform_3, window_bounds = array<i64: 8, 256>}, {transform_indices = @transform_4, window_bounds = array<i64: 128, 256>}]} {
    %c0_i32 = arith.constant 0 : i32
    %0 = arith.cmpi eq, %arg1, %c0_i32 : i32
    %1 = arith.extui %0 : i1 to i32
    %c0_i32_0 = arith.constant 0 : i32
    %2 = arith.cmpi ne, %1, %c0_i32_0 : i32
    scf.if %2 {
      %cst = arith.constant 0.000000e+00 : f32
      %11 = vector.broadcast %cst : f32 to vector<128x128xf32>
      %c0 = arith.constant 0 : index
      %c0_3 = arith.constant 0 : index
      %12 = vector.load %arg9[%c0, %c0_3] : memref<128x128xf32, #tpu.memory_space<vmem>>, vector<128x128xf32>
      tpu.vector_store %arg9[%c0, %c0_3], %11 {strides = array<i32>} : memref<128x128xf32, #tpu.memory_space<vmem>>, vector<128x128xf32>,
    } else {
    }
    %3 = arith.index_cast %arg0 : i32 to index
    %4 = memref.load %arg3[%3] : memref<2xi32, #tpu.memory_space<smem>>
    %5 = arith.cmpi slt, %arg1, %4 : i32
    %6 = arith.extui %5 : i1 to i32
    %c0_i32_1 = arith.constant 0 : i32
    %7 = arith.cmpi ne, %6, %c0_i32_1 : i32
    scf.if %7 {
      %c0 = arith.constant 0 : index
      %c0_3 = arith.constant 0 : index
      %11 = vector.load %arg9[%c0, %c0_3] : memref<128x128xf32, #tpu.memory_space<vmem>>, vector<128x128xf32>
      %c0_4 = arith.constant 0 : index
      %c0_5 = arith.constant 0 : index
      %12 = vector.load %arg4[%c0_4, %c0_5] : memref<128x128xf32, #tpu.memory_space<vmem>>, vector<128x128xf32>
      %c0_6 = arith.constant 0 : index
      %c0_7 = arith.constant 0 : index
      %13 = vector.load %arg5[%c0_6, %c0_7] : memref<128x128xf32, #tpu.memory_space<vmem>>, vector<128x128xf32>
      %cst = arith.constant dense<0.000000e+00> : vector<128x128xf32>
      %14 = tpu.matmul %12, %13, %cst {dimension_numbers = #tpu.dot_dimension_numbers<[1], [0], [0], [1], [0, 0, 1, 1], [], []>} : vector<128x128xf32>, vector<128x128xf32>, vector<128x128xf32> -> vector<128x128xf32>
      %15 = arith.addf %11, %14 : vector<128x128xf32>
      %c0_8 = arith.constant 0 : index
      %c0_9 = arith.constant 0 : index
      %16 = vector.load %arg9[%c0_8, %c0_9] : memref<128x128xf32, #tpu.memory_space<vmem>>, vector<128x128xf32>
      tpu.vector_store %arg9[%c0_8, %c0_9], %15 {strides = array<i32>} : memref<128x128xf32, #tpu.memory_space<vmem>>, vector<128x128xf32>,
    } else {
    }
    %c1_i32 = arith.constant 1 : i32
    %8 = arith.cmpi eq, %arg1, %c1_i32 : i32
    %9 = arith.extui %8 : i1 to i32
    %c0_i32_2 = arith.constant 0 : i32
    %10 = arith.cmpi ne, %9, %c0_i32_2 : i32
    scf.if %10 {
      %c0 = arith.constant 0 : index
      %c0_3 = arith.constant 0 : index
      %11 = vector.load %arg9[%c0, %c0_3] : memref<128x128xf32, #tpu.memory_space<vmem>>, vector<128x128xf32>
      %c0_4 = arith.constant 0 : index
      %c0_5 = arith.constant 0 : index
      %12 = vector.load %arg6[%c0_4, %c0_5] : memref<128x256xf32, #tpu.memory_space<vmem>>, vector<128x256xf32>
      %cst = arith.constant dense<0.000000e+00> : vector<128x256xf32>
      %13 = tpu.matmul %11, %12, %cst {dimension_numbers = #tpu.dot_dimension_numbers<[1], [0], [0], [1], [0, 0, 1, 1], [], []>} : vector<128x128xf32>, vector<128x256xf32>, vector<128x256xf32> -> vector<128x256xf32>
      %c0_6 = arith.constant 0 : index
      %c0_7 = arith.constant 0 : index
      %14 = vector.load %arg7[%c0_6, %c0_7] : memref<8x256xf32, #tpu.memory_space<vmem>>, vector<8x256xf32>
      %15 = vector.extract_strided_slice %14 {offsets = [0, 0], sizes = [1, 256], strides = [1, 1]} : vector<8x256xf32> to vector<1x256xf32>
      %16 = vector.broadcast %15 : vector<1x256xf32> to vector<128x256xf32>
      %17 = arith.addf %13, %16 : vector<128x256xf32>
      %cst_8 = arith.constant 5.000000e-01 : f32
      %18 = vector.broadcast %cst_8 : f32 to vector<128x256xf32>
      %19 = arith.mulf %18, %17 : vector<128x256xf32>
      %cst_9 = arith.constant 0.707106769 : f32
      %20 = vector.broadcast %cst_9 : f32 to vector<128x256xf32>
      %21 = arith.mulf %17, %20 : vector<128x256xf32>
      %22 = math.erf %21 : vector<128x256xf32>
      %cst_10 = arith.constant 1.000000e+00 : f32
      %23 = vector.broadcast %cst_10 : f32 to vector<128x256xf32>
      %24 = arith.addf %23, %22 : vector<128x256xf32>
      %25 = arith.mulf %19, %24 : vector<128x256xf32>
      %cst_11 = arith.constant dense<0.000000e+00> : vector<128xf32>
      %26 = vector.multi_reduction <add>, %25, %cst_11 [1] : vector<128x256xf32> to vector<128xf32>
      %27 = vector.shape_cast %26 : vector<128xf32> to vector<128x1xf32>
      %cst_12 = arith.constant 2.560000e+02 : f32
      %28 = vector.broadcast %cst_12 : f32 to vector<128x1xf32>
      %29 = arith.divf %27, %28 : vector<128x1xf32>
      %30 = vector.broadcast %29 : vector<128x1xf32> to vector<128x256xf32>
      %31 = arith.subf %25, %30 : vector<128x256xf32>
      %32 = arith.mulf %31, %31 : vector<128x256xf32>
      %cst_13 = arith.constant dense<0.000000e+00> : vector<128xf32>
      %33 = vector.multi_reduction <add>, %32, %cst_13 [1] : vector<128x256xf32> to vector<128xf32>
      %34 = vector.shape_cast %33 : vector<128xf32> to vector<128x1xf32>
      %cst_14 = arith.constant 2.560000e+02 : f32
      %35 = vector.broadcast %cst_14 : f32 to vector<128x1xf32>
      %36 = arith.divf %34, %35 : vector<128x1xf32>
      %cst_15 = arith.constant 9.99999974E-6 : f32
      %37 = vector.broadcast %cst_15 : f32 to vector<128x1xf32>
      %38 = arith.addf %36, %37 : vector<128x1xf32>
      %39 = math.rsqrt %38 : vector<128x1xf32>
      %40 = vector.broadcast %39 : vector<128x1xf32> to vector<128x256xf32>
      %41 = arith.mulf %31, %40 : vector<128x256xf32>
      %42 = vector.extract_strided_slice %14 {offsets = [1, 0], sizes = [1, 256], strides = [1, 1]} : vector<8x256xf32> to vector<1x256xf32>
      %43 = vector.broadcast %42 : vector<1x256xf32> to vector<128x256xf32>
      %44 = arith.mulf %41, %43 : vector<128x256xf32>
      %45 = vector.extract_strided_slice %14 {offsets = [2, 0], sizes = [1, 256], strides = [1, 1]} : vector<8x256xf32> to vector<1x256xf32>
      %46 = vector.broadcast %45 : vector<1x256xf32> to vector<128x256xf32>
      %47 = arith.addf %44, %46 : vector<128x256xf32>
      %c0_16 = arith.constant 0 : index
      %c0_17 = arith.constant 0 : index
      %48 = vector.load %arg8[%c0_16, %c0_17] : memref<128x256xf32, #tpu.memory_space<vmem>>, vector<128x256xf32>
      tpu.vector_store %arg8[%c0_16, %c0_17], %47 {strides = array<i32>} : memref<128x256xf32, #tpu.memory_space<vmem>>, vector<128x256xf32>,
    } else {
    }
    return
  }
  func.func @transform_0(%arg0: i32, %arg1: i32, %arg2: memref<4xi32, #tpu.memory_space<smem>>, %arg3: memref<2xi32, #tpu.memory_space<smem>>) -> (i32, i32) {
    %0 = arith.index_cast %arg0 : i32 to index
    %1 = memref.load %arg3[%0] : memref<2xi32, #tpu.memory_space<smem>>
    %c1_i32 = arith.constant 1 : i32
    %2 = arith.subi %1, %c1_i32 : i32
    %3 = arith.minsi %arg1, %2 : i32
    %c2_i32 = arith.constant 2 : i32
    %4 = arith.muli %arg0, %c2_i32 : i32
    %5 = arith.addi %4, %3 : i32
    %6 = arith.index_cast %5 : i32 to index
    %7 = memref.load %arg2[%6] : memref<4xi32, #tpu.memory_space<smem>>
    %c0_i32 = arith.constant 0 : i32
    return %arg0, %7 : i32, i32
  }
  func.func @transform_1(%arg0: i32, %arg1: i32, %arg2: memref<4xi32, #tpu.memory_space<smem>>, %arg3: memref<2xi32, #tpu.memory_space<smem>>) -> (i32, i32) {
    %0 = arith.index_cast %arg0 : i32 to index
    %1 = memref.load %arg3[%0] : memref<2xi32, #tpu.memory_space<smem>>
    %c1_i32 = arith.constant 1 : i32
    %2 = arith.subi %1, %c1_i32 : i32
    %3 = arith.minsi %arg1, %2 : i32
    %c2_i32 = arith.constant 2 : i32
    %4 = arith.muli %arg0, %c2_i32 : i32
    %5 = arith.addi %4, %3 : i32
    %6 = arith.index_cast %5 : i32 to index
    %7 = memref.load %arg2[%6] : memref<4xi32, #tpu.memory_space<smem>>
    %c0_i32 = arith.constant 0 : i32
    %c0_i32_0 = arith.constant 0 : i32
    return %7, %c0_i32 : i32, i32
  }
  func.func @transform_2(%arg0: i32, %arg1: i32, %arg2: memref<4xi32, #tpu.memory_space<smem>>, %arg3: memref<2xi32, #tpu.memory_space<smem>>) -> (i32, i32) {
    %c0_i32 = arith.constant 0 : i32
    %c0_i32_0 = arith.constant 0 : i32
    %c0_i32_1 = arith.constant 0 : i32
    return %c0_i32, %c0_i32_0 : i32, i32
  }
  func.func @transform_3(%arg0: i32, %arg1: i32, %arg2: memref<4xi32, #tpu.memory_space<smem>>, %arg3: memref<2xi32, #tpu.memory_space<smem>>) -> (i32, i32) {
    %c0_i32 = arith.constant 0 : i32
    %c0_i32_0 = arith.constant 0 : i32
    %c0_i32_1 = arith.constant 0 : i32
    return %c0_i32, %c0_i32_0 : i32, i32
  }
  func.func @transform_4(%arg0: i32, %arg1: i32, %arg2: memref<4xi32, #tpu.memory_space<smem>>, %arg3: memref<2xi32, #tpu.memory_space<smem>>) -> (i32, i32) {
    %c0_i32 = arith.constant 0 : i32
    %c0_i32_0 = arith.constant 0 : i32
    return %arg0, %c0_i32 : i32, i32
  }
}

module attributes {stable_mosaic.version = 11 : i64} {
  func.func @gcn_layer_kernel(%arg0: i32, %arg1: i32, %arg2: memref<4xi32, #tpu.memory_space<smem>>, %arg3: memref<2xi32, #tpu.memory_space<smem>>, %arg4: memref<128x128xf32, #tpu.memory_space<vmem>>, %arg5: memref<128x128xf32, #tpu.memory_space<vmem>>, %arg6: memref<128x256xf32, #tpu.memory_space<vmem>>, %arg7: memref<8x256xf32, #tpu.memory_space<vmem>>, %arg8: memref<128x256xf32, #tpu.memory_space<vmem>>, %arg9: memref<128x128xf32, #tpu.memory_space<vmem>>) attributes {dimension_semantics = [#tpu.dimension_semantics<parallel>, #tpu.dimension_semantics<arbitrary>], iteration_bounds = array<i64: 2, 2>, scalar_prefetch = 2 : i64, scratch_operands = 1 : i64, tpu.core_type = #tpu.core_type<tc>, window_params = [{transform_indices = @transform_0, window_bounds = array<i64: 128, 128>}, {transform_indices = @transform_1, window_bounds = array<i64: 128, 128>}, {pipeline_mode = #tpu.pipeline_mode<synchronous>, transform_indices = @transform_2, window_bounds = array<i64: 128, 256>}, {pipeline_mode = #tpu.pipeline_mode<synchronous>, transform_indices = @transform_3, window_bounds = array<i64: 8, 256>}, {transform_indices = @transform_4, window_bounds = array<i64: 128, 256>}]} {
    %c0_i32 = arith.constant 0 : i32
    %0 = arith.cmpi eq, %arg1, %c0_i32 : i32
    %1 = arith.extui %0 : i1 to i32
    %c0_i32_0 = arith.constant 0 : i32
    %2 = arith.cmpi ne, %1, %c0_i32_0 : i32
    scf.if %2 {
      %cst = arith.constant 0.000000e+00 : f32
      %11 = vector.broadcast %cst : f32 to vector<128x128xf32>
      %c0 = arith.constant 0 : index
      %c0_3 = arith.constant 0 : index
      %12 = vector.load %arg9[%c0, %c0_3] : memref<128x128xf32, #tpu.memory_space<vmem>>, vector<128x128xf32>
      tpu.vector_store %arg9[%c0, %c0_3], %11 {strides = array<i32>} : memref<128x128xf32, #tpu.memory_space<vmem>>, vector<128x128xf32>,
    } else {
    }
    %3 = arith.index_cast %arg0 : i32 to index
    %4 = memref.load %arg3[%3] : memref<2xi32, #tpu.memory_space<smem>>
    %5 = arith.cmpi slt, %arg1, %4 : i32
    %6 = arith.extui %5 : i1 to i32
    %c0_i32_1 = arith.constant 0 : i32
    %7 = arith.cmpi ne, %6, %c0_i32_1 : i32
    scf.if %7 {
      %c0 = arith.constant 0 : index
      %c0_3 = arith.constant 0 : index
      %11 = vector.load %arg9[%c0, %c0_3] : memref<128x128xf32, #tpu.memory_space<vmem>>, vector<128x128xf32>
      %c0_4 = arith.constant 0 : index
      %c0_5 = arith.constant 0 : index
      %12 = vector.load %arg4[%c0_4, %c0_5] : memref<128x128xf32, #tpu.memory_space<vmem>>, vector<128x128xf32>
      %c0_6 = arith.constant 0 : index
      %c0_7 = arith.constant 0 : index
      %13 = vector.load %arg5[%c0_6, %c0_7] : memref<128x128xf32, #tpu.memory_space<vmem>>, vector<128x128xf32>
      %cst = arith.constant dense<0.000000e+00> : vector<128x128xf32>
      %14 = tpu.matmul %12, %13, %cst {dimension_numbers = #tpu.dot_dimension_numbers<[1], [0], [0], [1], [0, 0, 1, 1], [], []>} : vector<128x128xf32>, vector<128x128xf32>, vector<128x128xf32> -> vector<128x128xf32>
      %15 = arith.addf %11, %14 : vector<128x128xf32>
      %c0_8 = arith.constant 0 : index
      %c0_9 = arith.constant 0 : index
      %16 = vector.load %arg9[%c0_8, %c0_9] : memref<128x128xf32, #tpu.memory_space<vmem>>, vector<128x128xf32>
      tpu.vector_store %arg9[%c0_8, %c0_9], %15 {strides = array<i32>} : memref<128x128xf32, #tpu.memory_space<vmem>>, vector<128x128xf32>,
    } else {
    }
    %c1_i32 = arith.constant 1 : i32
    %8 = arith.cmpi eq, %arg1, %c1_i32 : i32
    %9 = arith.extui %8 : i1 to i32
    %c0_i32_2 = arith.constant 0 : i32
    %10 = arith.cmpi ne, %9, %c0_i32_2 : i32
    scf.if %10 {
      %c0 = arith.constant 0 : index
      %c0_3 = arith.constant 0 : index
      %11 = vector.load %arg9[%c0, %c0_3] : memref<128x128xf32, #tpu.memory_space<vmem>>, vector<128x128xf32>
      %c0_4 = arith.constant 0 : index
      %c0_5 = arith.constant 0 : index
      %12 = vector.load %arg6[%c0_4, %c0_5] : memref<128x256xf32, #tpu.memory_space<vmem>>, vector<128x256xf32>
      %cst = arith.constant dense<0.000000e+00> : vector<128x256xf32>
      %13 = tpu.matmul %11, %12, %cst {dimension_numbers = #tpu.dot_dimension_numbers<[1], [0], [0], [1], [0, 0, 1, 1], [], []>} : vector<128x128xf32>, vector<128x256xf32>, vector<128x256xf32> -> vector<128x256xf32>
      %c0_6 = arith.constant 0 : index
      %c0_7 = arith.constant 0 : index
      %14 = vector.load %arg7[%c0_6, %c0_7] : memref<8x256xf32, #tpu.memory_space<vmem>>, vector<8x256xf32>
      %15 = vector.extract_strided_slice %14 {offsets = [0, 0], sizes = [1, 256], strides = [1, 1]} : vector<8x256xf32> to vector<1x256xf32>
      %16 = vector.broadcast %15 : vector<1x256xf32> to vector<128x256xf32>
      %17 = arith.addf %13, %16 : vector<128x256xf32>
      %cst_8 = arith.constant 5.000000e-01 : f32
      %18 = vector.broadcast %cst_8 : f32 to vector<128x256xf32>
      %19 = arith.mulf %18, %17 : vector<128x256xf32>
      %cst_9 = arith.constant 0.707106769 : f32
      %20 = vector.broadcast %cst_9 : f32 to vector<128x256xf32>
      %21 = arith.mulf %17, %20 : vector<128x256xf32>
      %22 = math.erf %21 : vector<128x256xf32>
      %cst_10 = arith.constant 1.000000e+00 : f32
      %23 = vector.broadcast %cst_10 : f32 to vector<128x256xf32>
      %24 = arith.addf %23, %22 : vector<128x256xf32>
      %25 = arith.mulf %19, %24 : vector<128x256xf32>
      %cst_11 = arith.constant dense<0.000000e+00> : vector<128xf32>
      %26 = vector.multi_reduction <add>, %25, %cst_11 [1] : vector<128x256xf32> to vector<128xf32>
      %27 = vector.shape_cast %26 : vector<128xf32> to vector<128x1xf32>
      %cst_12 = arith.constant 2.560000e+02 : f32
      %28 = vector.broadcast %cst_12 : f32 to vector<128x1xf32>
      %29 = arith.divf %27, %28 : vector<128x1xf32>
      %30 = vector.broadcast %29 : vector<128x1xf32> to vector<128x256xf32>
      %31 = arith.subf %25, %30 : vector<128x256xf32>
      %32 = arith.mulf %31, %31 : vector<128x256xf32>
      %cst_13 = arith.constant dense<0.000000e+00> : vector<128xf32>
      %33 = vector.multi_reduction <add>, %32, %cst_13 [1] : vector<128x256xf32> to vector<128xf32>
      %34 = vector.shape_cast %33 : vector<128xf32> to vector<128x1xf32>
      %cst_14 = arith.constant 2.560000e+02 : f32
      %35 = vector.broadcast %cst_14 : f32 to vector<128x1xf32>
      %36 = arith.divf %34, %35 : vector<128x1xf32>
      %cst_15 = arith.constant 9.99999974E-6 : f32
      %37 = vector.broadcast %cst_15 : f32 to vector<128x1xf32>
      %38 = arith.addf %36, %37 : vector<128x1xf32>
      %39 = math.rsqrt %38 : vector<128x1xf32>
      %40 = vector.broadcast %39 : vector<128x1xf32> to vector<128x256xf32>
      %41 = arith.mulf %31, %40 : vector<128x256xf32>
      %42 = vector.extract_strided_slice %14 {offsets = [1, 0], sizes = [1, 256], strides = [1, 1]} : vector<8x256xf32> to vector<1x256xf32>
      %43 = vector.broadcast %42 : vector<1x256xf32> to vector<128x256xf32>
      %44 = arith.mulf %41, %43 : vector<128x256xf32>
      %45 = vector.extract_strided_slice %14 {offsets = [2, 0], sizes = [1, 256], strides = [1, 1]} : vector<8x256xf32> to vector<1x256xf32>
      %46 = vector.broadcast %45 : vector<1x256xf32> to vector<128x256xf32>
      %47 = arith.addf %44, %46 : vector<128x256xf32>
      %c0_16 = arith.constant 0 : index
      %c0_17 = arith.constant 0 : index
      %48 = vector.load %arg8[%c0_16, %c0_17] : memref<128x256xf32, #tpu.memory_space<vmem>>, vector<128x256xf32>
      tpu.vector_store %arg8[%c0_16, %c0_17], %47 {strides = array<i32>} : memref<128x256xf32, #tpu.memory_space<vmem>>, vector<128x256xf32>,
    } else {
    }
    return
  }
  func.func @transform_0(%arg0: i32, %arg1: i32, %arg2: memref<4xi32, #tpu.memory_space<smem>>, %arg3: memref<2xi32, #tpu.memory_space<smem>>) -> (i32, i32) {
    %0 = arith.index_cast %arg0 : i32 to index
    %1 = memref.load %arg3[%0] : memref<2xi32, #tpu.memory_space<smem>>
    %c1_i32 = arith.constant 1 : i32
    %2 = arith.subi %1, %c1_i32 : i32
    %3 = arith.minsi %arg1, %2 : i32
    %c2_i32 = arith.constant 2 : i32
    %4 = arith.muli %arg0, %c2_i32 : i32
    %5 = arith.addi %4, %3 : i32
    %6 = arith.index_cast %5 : i32 to index
    %7 = memref.load %arg2[%6] : memref<4xi32, #tpu.memory_space<smem>>
    %c0_i32 = arith.constant 0 : i32
    return %arg0, %7 : i32, i32
  }
  func.func @transform_1(%arg0: i32, %arg1: i32, %arg2: memref<4xi32, #tpu.memory_space<smem>>, %arg3: memref<2xi32, #tpu.memory_space<smem>>) -> (i32, i32) {
    %0 = arith.index_cast %arg0 : i32 to index
    %1 = memref.load %arg3[%0] : memref<2xi32, #tpu.memory_space<smem>>
    %c1_i32 = arith.constant 1 : i32
    %2 = arith.subi %1, %c1_i32 : i32
    %3 = arith.minsi %arg1, %2 : i32
    %c2_i32 = arith.constant 2 : i32
    %4 = arith.muli %arg0, %c2_i32 : i32
    %5 = arith.addi %4, %3 : i32
    %6 = arith.index_cast %5 : i32 to index
    %7 = memref.load %arg2[%6] : memref<4xi32, #tpu.memory_space<smem>>
    %c0_i32 = arith.constant 0 : i32
    %c0_i32_0 = arith.constant 0 : i32
    return %7, %c0_i32 : i32, i32
  }
  func.func @transform_2(%arg0: i32, %arg1: i32, %arg2: memref<4xi32, #tpu.memory_space<smem>>, %arg3: memref<2xi32, #tpu.memory_space<smem>>) -> (i32, i32) {
    %c0_i32 = arith.constant 0 : i32
    %c0_i32_0 = arith.constant 0 : i32
    %c0_i32_1 = arith.constant 0 : i32
    return %c0_i32, %c0_i32_0 : i32, i32
  }
  func.func @transform_3(%arg0: i32, %arg1: i32, %arg2: memref<4xi32, #tpu.memory_space<smem>>, %arg3: memref<2xi32, #tpu.memory_space<smem>>) -> (i32, i32) {
    %c0_i32 = arith.constant 0 : i32
    %c0_i32_0 = arith.constant 0 : i32
    %c0_i32_1 = arith.constant 0 : i32
    return %c0_i32, %c0_i32_0 : i32, i32
  }
  func.func @transform_4(%arg0: i32, %arg1: i32, %arg2: memref<4xi32, #tpu.memory_space<smem>>, %arg3: memref<2xi32, #tpu.memory_space<smem>>) -> (i32, i32) {
    %c0_i32 = arith.constant 0 : i32
    %c0_i32_0 = arith.constant 0 : i32
    return %arg0, %c0_i32 : i32, i32
  }
}

</mosaic_0001>

<bundles_post_ra>
// kernel: tpu_custom_call.1
= control target key start
LH: loop header
LB: loop body
LE: loop exit
PB: predicated region body
PF: predicated region fallthrough
CT: control target
= control target key end

     0   :  { %s3453_s0 = inlined_call_operand.hbm [shape: s32[4], index: 0, kind: input, shape index: {}]   ;;  %s3454_s2 = inlined_call_operand.hbm [shape: f32[256,256], index: 2, kind: input, shape index: {}]   ;;  %s3455_s3 = inlined_call_operand.hbm [shape: f32[256,128], index: 3, kind: input, shape index: {}]   ;;  %s3456_s4 = inlined_call_operand.hbm [shape: f32[128,256], index: 4, kind: input, shape index: {}]   ;;  %s3457_s5 = inlined_call_operand.vmem [shape: f32[8,256], index: 5, kind: input, shape index: {}]   ;;  %s3458_s6 = inlined_call_operand.hbm [shape: f32[256,256], index: 6, kind: output, shape index: {}]   ;;  %s3459_s1 = inlined_call_operand.vmem [shape: s32[2], index: 1, kind: input, shape index: {}]  }
   0x1   :  { %3486 = sst [smem:[#allocation39_spill]] %s3454_s2  ;;  %s1980_s23 = scalar_lea.hbm %s3453_s0, 16 }
   0x2   :  { %3487 = sst [smem:[#allocation40_spill]] %s3456_s4  ;;  %p1981_p0 = scmp.ne.s32.totalorder %s3453_s0, %s1980_s23 }
   0x3   :  { %3488 = sst [smem:[#allocation41_spill]] %s3457_s5  ;;  %p1984_p1 = scmp.lt.u32.totalorder %s1980_s23, %s3453_s0 }
   0x4   :  { %3489 = sst [smem:[#allocation42_spill]] %s3458_s6 }
   0x5   :  { %p1986_p2 = pnand %p1984_p1, %p1981_p0 }
   0x7   :  { %1989 = shalt.err (!%p1986_p2)  }
   0x8   :  { %s2248_s28 = smov [#allocation4]   ;;  %s13_s9 = sshll.u32 %s3459_s1, 4  ;;  %s14_s9 = int_to_ptr.vmem [resolvable:$true] %s13_s9 }
   0x9   :  { %12 = dma.hbm_to_smem %s3453_s0, 16, %s2248_s28, [#allocation3] }
   0xa   :  { %s1990_s10 = scalar_lea.vmem %s14_s9, 16  ;;  %p1995_p4 = scmp.lt.s32.totalorder %s14_s9, %s14_s9 }
   0xb   :  { %p1991_p3 = scmp.ne.s32.totalorder %s14_s9, %s1990_s10  ;;  %p1996_p5 = scmp.lt.s32.totalorder %s1990_s10, %s1990_s10 }
   0xd   :  { %p1997_p6 = por %p1996_p5, %p1995_p4 }
   0xf   :  { %p1998_p7 = pnand %p1997_p6, %p1991_p3 }
  0x11   :  { %2001 = shalt.err (!%p1998_p7)  }
  0x12   :  { %s2249_s11 = smov [#allocation5]  }
  0x13   :  { %16 = dma.vmem_to_smem %s14_s9, 16, %s2249_s11, [#allocation3] }
  0x14   :  { %2174 = dma.done.wait [#allocation3], 32 }
  0x15   :  { %2175 = vsyncadd [#allocation3], 4294967264 }
  0x16   :  { %18 = sfence }
  0x17   :  { %19 = vsyncpa [#allocation7], 0 }
  0x18   :  { %21 = vsyncpa [#allocation7 + $0x1], 0 }
  0x19   :  { %22 = vsyncpa [#allocation10], 0 }
  0x1a   :  { %24 = vsyncpa [#allocation10 + $0x1], 0 }
  0x1b   :  { %25 = vsyncpa [#allocation8], 0 }
  0x1c   :  { %27 = vsyncpa [#allocation8 + $0x1], 0  ;;  %s2312_s0 = smov 0   ;;  %s2314_s1 = smov 0  }
  0x1d   :  { %s2316_s12 = smov 0   ;;  %s2318_s13 = smov 0  }
  0x1e   :  { %s2320_s14 = smov 0   ;;  %s2322_s15 = smov 0  }
  0x1f   :  { %s2324_s16 = smov 0   ;;  %s2326_s17 = smov 0  }
  0x20   :  { %s2328_s18 = smov 0   ;;  %s2330_s19 = smov 0  }
  0x21   :  { %s2332_s20 = smov 0   ;;  %s2334_s21 = smov 0  }
  0x22   :  { %s2336_s22 = smov 0   ;;  %s2338_s23 = smov 0  }
  0x23 LB: > { %3490 = sst [smem:[#allocation26_spill]] %s2194_s0  ;;  %s2379_s24 = sadd.s32 4294967295, %s2246_s23   ;;  %s2246_s23 = sphi %s2338_s23, %s33_s23   ;;  %s2242_s22 = sphi %s2336_s22, %s3565_s22   ;;  %s2238_s21 = sphi %s2334_s21, %s3564_s21   ;;  %s2234_s20 = sphi %s2332_s20, %s3563_s20   ;;  %s2230_s19 = sphi %s2330_s19, %s3562_s19   ;;  %s2226_s18 = sphi %s2328_s18, %s3561_s18   ;;  %s2222_s17 = sphi %s2326_s17, %s3560_s17   ;;  %s2218_s16 = sphi %s2324_s16, %s3559_s16   ;;  %s2214_s15 = sphi %s2322_s15, %s3558_s15   ;;  %s2210_s14 = sphi %s2320_s14, %s3557_s14   ;;  %s2206_s13 = sphi %s2318_s13, %s3556_s13   ;;  %s2202_s12 = sphi %s2316_s12, %s3552_s12   ;;  %s2198_s1 = sphi %s2314_s1, %s3551_s1   ;;  %s2194_s0 = sphi %s2312_s0, %s3550_s0  }
  0x24   : > { %3491 = sst [smem:[#allocation27_spill]] %s2198_s1  ;;  %s1491_s25 = sadd.s32 4294967294, %s2246_s23  }
  0x25   : > { %3492 = sst [smem:[#allocation28_spill]] %s2202_s12  ;;  %s3460_s26 = sadd.s32 1, %s2238_s21 }
  0x26   : > { %3493 = sst [smem:[#allocation29_spill]] %s2230_s19  ;;  %s45_s27 = sadd.s32 1, %s2242_s22 }
  0x27   : > { %3494 = sst [smem:[#allocation30_spill]] %s2234_s20  ;;  %p2386_p8 = scmp.ge.s32.totalorder %s3460_s26, 2 }
  0x28   : > { %3495 = sst [smem:[#allocation31_spill]] %s2379_s24  ;;  %p81_p9 = scmp.ne.s32.totalorder %s2222_s17, %s2218_s16 }
  0x29   : > { %s3496_s28 = scalar_select %p2386_p8, 1, 0 }
  0x2a   : > { %p3467_p10 = scmp.eq.s32.totalorder %s2379_s24, 0  ;;  %p121_p11 = scmp.ne.s32.totalorder %s2210_s14, %s2206_s13 }
  0x2b   : > { %s3567_s27 = smov (!%p2386_p8, %s45_s27), %s2242_s22  ;;  %s176_s7 = sadd.s32 1, %s2202_s12 }
  0x2c   : > { %p2398_p12 = por %p3467_p10, %p81_p9  ;;  %p2404_p13 = por %p121_p11, %p3467_p10 }
  0x2d   : > { %p47_p0 = scmp.ge.s32.totalorder %s3567_s27, 2  ;;  %p186_p1 = scmp.ne.s32.totalorder %s2202_s12, %s2198_s1 }
  0x2e   : > { %s3497_s29 = scalar_select %p2398_p12, 1, 0 }
  0x2f   : > { %s3498_s30 = scalar_select %p2404_p13, 1, 0 }
  0x30   : > { %p187_p2 = scmp.eq.s32.totalorder %s2379_s24, 3  ;;  %s3569_s27 = smov (%p47_p0, %s3567_s27), 0 }
  0x31   : > { %3499 = sst [smem:[#allocation32_spill]] %s3498_s30  ;;  %p192_p4 = scmp.ne.s32.totalorder %s2198_s1, %s2194_s0 }
  0x32   : > { %3500 = sst [smem:[#allocation33_spill]] %s3569_s27  ;;  %p2414_p3 = por %p187_p2, %p186_p1 }
  0x33   : > { %s2422_s9 = ssub.s32 %s2242_s22, %s3569_s27  ;;  %p193_p5 = scmp.eq.s32.totalorder %s1491_s25, 3 }
  0x34   : > { %s3501_s8 = scalar_select %p2414_p3, 1, 0 }
  0x35   : > { %p174_p6 = scmp.eq.s32.totalorder %s2422_s9, 0  ;;  %p1500_p7 = scmp.ge.s32.totalorder %s2246_s23, 1 }
  0x36   : > { %3502 = sst [smem:[#allocation34_spill]] %s3501_s8  ;;  %p2426_p9 = por %p193_p5, %p192_p4 }
  0x37   : > { %p200_p11 = scmp.lt.s32.totalorder %s2246_s23, 5  ;;  %s2250_s16 = smov [#allocation11]  }
  0x38   : > { %s3503_s10 = scalar_select %p2426_p9, 1, 0 }
  0x39   : > { %s2432_s11 = scalar_select %p174_p6, %s2202_s12, %s176_s7  }
  0x3a   : > { %3504 = sst [smem:[#allocation35_spill]] %s3503_s10  ;;  %p2434_p0 = pnand %p1500_p7, %p200_p11 }
  0x3b   : > { %3505 = sst [smem:[#allocation36_spill]] %s2432_s11  ;;  %s212_s26 = sshll.u32 %s2250_s16, 4  ;;  %s213_s26 = int_to_ptr.vmem [resolvable:$true] %s212_s26 }
  0x3c   : > { %s3506_s13 = scalar_select %p2434_p0, 1, 0 }
  0x3d   : > { %p1734_p1 = pneg %p2434_p0  ;;  %s3508_s4 = sld [smem:[#allocation40_spill]] }
  0x3f   : > { %p2442_p2 = pnand %p1734_p1, %p3467_p10 }
  0x41   : > { %p2004_p5 = pneg %p2442_p2 }
  0x43   : > { %s2002_s7 = scalar_lea.hbm %s3508_s4, 4096 }
  0x44   : > { %p2003_p4 = scmp.ne.s32.totalorder %s3508_s4, %s2002_s7  ;;  %p2009_p11 = scmp.lt.u32.totalorder %s2002_s7, %s3508_s4 }
  0x46   : > { %p2005_p6 = pnand %p2004_p5, %p2003_p4 }
  0x48   : > { %p2006_p7 = pneg %p2005_p6 }
  0x4a   : > { %p2011_p1 = pnand %p2009_p11, %p2006_p7 }
  0x4c   : > { %2014 = shalt.err (!%p2011_p1)
}
  0x4d   : > { %s2015_s8 = scalar_lea.vmem %s213_s26, 4096  ;;  %p2023_p13 = scmp.lt.s32.totalorder %s213_s26, %s213_s26 }
  0x4e   : > { %p2016_p10 = scmp.ne.s32.totalorder %s213_s26, %s2015_s8  ;;  %p2024_p12 = scmp.lt.s32.totalorder %s2015_s8, %s2015_s8 }
  0x50   : > { %p2018_p9 = pnand %p2016_p10, %p2004_p5  ;;  %p2025_p0 = por %p2024_p12, %p2023_p13 }
  0x52   : > { %p2019_p3 = pneg %p2018_p9 }
  0x54   : > { %p2026_p8 = pnand %p2025_p0, %p2019_p3 }
  0x56   : > { %2029 = shalt.err (!%p2026_p8)
}
  0x57   : > { %s3473_s0 = smov 256   ;;  %s2252_s6 = smov 16  }
  0x58   : > { %1737 = dma.hbm_to_vmem [thread:$0]  (!%p2442_p2), %s3508_s4, 4096, %s213_s26, [#allocation10], %s3473_s0, %s3473_s0, %s2252_s6  }
  0x59   : > { %s49_s10 = sld [smem:[#allocation5 + %s2242_s22]]  ;;  %s3509_s7 = sadd.s32 1, %s2238_s21 }
  0x5a   : > { %s56_s11 = sld [smem:[#allocation5 + %s3569_s27]]  ;;  %p3510_p8 = scmp.ne.s32.totalorder %s3496_s28, 0 }
  0x5b   : > { %p75_p10 = scmp.ne.s32.totalorder %s2226_s18, %s2222_s17  ;;  %p76_p12 = scmp.eq.s32.totalorder %s2246_s23, 0 }
  0x5c   : > { %s3571_s7 = smov (%p3510_p8, %s3509_s7), 0  ;;  %s2476_s25 = sshll.u32 %s2242_s22, 1 }
  0x5d   : > { %3511 = sst [smem:[#allocation37_spill]] %s3571_s7  ;;  %p2484_p9 = por %p76_p12, %p75_p10 }
  0x5e   : > { %s91_s26 = sld [smem:[#allocation5 + %s2242_s22]]  ;;  %p3484_p0 = scmp.lt.s32.totalorder %s2246_s23, 4 }
  0x5f   : > { %s1492_s12 = sadd.s32 4294967295, %s49_s10  ;;  %s3479_s20 = sand.u32 1, %s2226_s18  }
  0x60   : > { %p51_p13 = scmp.lt.s32.totalorder %s2238_s21, %s1492_s12  ;;  %s1494_s6 = sadd.s32 4294967295, %s56_s11 }
  0x61   : > { %p58_p3 = scmp.lt.s32.totalorder %s3571_s7, %s1494_s6  ;;  %s3513_s11 = sshll.u32 %s3569_s27, 1 }
  0x62   : > { %s52_s8 = scalar_select %p51_p13, %s2238_s21, %s1492_s12 }
  0x63   : > { %s59_s0 = scalar_select %p58_p3, %s3571_s7, %s1494_s6 }
  0x64   : > { %s54_s10 = sadd.s32 %s2476_s25, %s52_s8  ;;  %s68_s1 = sadd.s32 1, %s2226_s18 }
  0x65   : > { %s55_s16 = sld [smem:[#allocation4 + %s54_s10]]  ;;  %s61_s4 = sadd.s32 %s3513_s11, %s59_s0 }
  0x66   : > { %s62_s5 = sld [smem:[#allocation4 + %s61_s4]]  ;;  %s1496_s30 = sadd.s32 4294967295, %s91_s26 }
  0x67   : > { %s1718_s19 = scalar_select %p2484_p9, [#allocation5], [#allocation13] }
  0x68   : > { %s1503_s12 = sshll.u32 %s3479_s20, 7  ;;  %p2510_p2 = pnand %p3484_p0, %p2484_p9 }
  0x69   : > { %s1719_s6 = scalar_select %p2484_p9, %s2242_s22, 0 }
  0x6a   : > { %s3573_s19 = smov (!%p3484_p0, %s1718_s19), [#allocation17]  ;;  %p93_p5 = scmp.lt.s32.totalorder %s2238_s21, %s1496_s30 }
  0x6b   : > { %s3575_s6 = smov (!%p3484_p0, %s1719_s6), 0  ;;  %s233_s10 = scalar_lea.vmem [#allocation6], %s1503_s12 }
  0x6c   : > { %s64_s8 = ssub.s32 %s55_s16, %s62_s5  ;;  %s234_s5 = sld [smem:[%s3573_s19 + %s3575_s6]] }
  0x6d   : > { %s65_s0 = sor.u32 %s64_s8, %s2422_s9  ;;  %s1528_s16 = sshll.u32 %s2242_s22, 5 }
  0x6e   : > { %p66_p4 = scmp.eq.s32.totalorder %s65_s0, 0  ;;  %s249_s11 = sshll.u32 %s233_s10, 4  ;;  %s2527_s11 = int_to_ptr.vmem [resolvable:$true] %s249_s11 }
  0x6f   : > { %s94_s9 = scalar_select %p93_p5, %s2238_s21, %s1496_s30 }
  0x70   : > { %s2518_s26 = scalar_select %p66_p4, %s2226_s18, %s68_s1  }
  0x71   : > { %s1720_s8 = scalar_select %p2484_p9, [#allocation4], [#allocation14] }
  0x72   : > { %3515 = sst [smem:[#allocation38_spill]] %s2518_s26  ;;  %s96_s20 = sadd.s32 %s2476_s25, %s94_s9 }
  0x73   : > { %s98_s0 = sld [smem:[#allocation5 + %s3569_s27]]  ;;  %s1504_s24 = sadd.s32 4294967295, %s234_s5 }
  0x74   : > { %p236_p6 = scmp.lt.s32.totalorder %s2238_s21, %s1504_s24  ;;  %p115_p7 = scmp.ne.s32.totalorder %s2214_s15, %s2210_s14 }
  0x75   : > { %s3577_s8 = smov (!%p3484_p0, %s1720_s8), [#allocation18]  ;;  %s2547_s5 = sld [smem:[#allocation4 + %s96_s20]] }
  0x76   : > { %s237_s1 = scalar_select %p236_p6, %s2238_s21, %s1504_s24 }
  0x77   : > { %p2540_p1 = por %p115_p7, %p76_p12  ;;  %s3517_s28 = sshll.u32 %s3569_s27, 1 }
  0x78   : > { %s239_s19 = sadd.s32 %s2476_s25, %s237_s1  ;;  %s3519_s2 = sld [smem:[#allocation39_spill]] }
  0x79   : > { %s1498_s30 = sadd.s32 4294967295, %s98_s0  ;;  %s3579_s19 = smov (!%p2484_p9, %s239_s19), 0 }
  0x7a   : > { %p100_p11 = scmp.lt.s32.totalorder %s3571_s7, %s1498_s30  ;;  %s3581_s19 = smov (!%p3484_p0, %s3579_s19), 0 }
  0x7b   : > { %s240_s6 = sld [smem:[%s3577_s8 + %s3581_s19]]  ;;  %p2557_p8 = pnand %p3484_p0, %p2540_p1 }
  0x7c   : > { %s101_s24 = scalar_select %p100_p11, %s3571_s7, %s1498_s30 }
  0x7d   : > { %s3518_s0 = scalar_select %p2557_p8, 1, 0 }
  0x7e   : > { %s103_s9 = sadd.s32 %s3517_s28, %s101_s24  ;;  %s108_s30 = sadd.s32 1, %s2214_s15 }
  0x7f   : > { %s2551_s10 = sld [smem:[#allocation4 + %s103_s9]]  ;;  %s3520_s7 = sand.u32 1, %s2226_s18  }
  0x80   : > { %s1723_s1 = scalar_select %p2540_p1, [#allocation5], [#allocation15] }
  0x81   : > { %s246_s20 = sadd.s32 %s1528_s16, %s240_s6  ;;  %s2580_s26 = scalar_lea.sflag [#allocation7], %s3520_s7 }
  0x82   : > { %s3583_s1 = smov (!%p3484_p0, %s1723_s1), [#allocation19]  ;;  %s1508_s19 = sshll.u32 %s246_s20, 7 }
  0x83   : > { %s2574_s9 = scalar_lea.hbm %s3519_s2, %s1508_s19  ;;  %p2032_p12 = pneg %p2510_p2 }
  0x84   : > { %s2030_s8 = scalar_lea.hbm %s2574_s9, 2048  ;;  %s2035_s20 = scalar_lea.hbm %s3519_s2, 8192 }
  0x85   : > { %s105_s27 = ssub.s32 %s2547_s5, %s2551_s10  ;;  %p2031_p10 = scmp.ne.s32.totalorder %s2574_s9, %s2030_s8 }
  0x86   : > { %p2036_p9 = scmp.lt.u32.totalorder %s2574_s9, %s3519_s2  ;;  %p2037_p4 = scmp.lt.u32.totalorder %s2035_s20, %s2030_s8 }
  0x87   : > { %p2033_p13 = pnand %p2032_p12, %p2031_p10  ;;  %p2039_p6 = scmp.lt.u32.totalorder %s2030_s8, %s2574_s9 }
  0x88   : > { %p2038_p5 = por %p2037_p4, %p2036_p9 }
  0x89   : > { %p2034_p3 = pneg %p2033_p13 }
  0x8a   : > { %p2040_p7 = por %p2039_p6, %p2038_p5 }
  0x8c   : > { %p2041_p11 = pnand %p2040_p7, %p2034_p3 }
  0x8e   : > { %2044 = shalt.err (!%p2041_p11)
}
  0x8f   : > { %s2045_s7 = scalar_lea.vmem %s2527_s11, 2048  ;;  %s2253_s28 = smov [#allocation6]  }
  0x90   : > { %p2046_p10 = scmp.ne.s32.totalorder %s2527_s11, %s2045_s7  ;;  %s2050_s16 = sshll.u32 %s2253_s28, 4  ;;  %s2051_s16 = int_to_ptr.vmem [resolvable:$false] %s2050_s16 }
  0x91   : > { %s2052_s6 = scalar_lea.vmem %s2051_s16, 4096  ;;  %p2053_p8 = scmp.lt.s32.totalorder %s2527_s11, %s2051_s16 }
  0x92   : > { %p2048_p13 = pnand %p2046_p10, %p2032_p12  ;;  %p2054_p9 = scmp.lt.s32.totalorder %s2052_s6, %s2045_s7 }
  0x94   : > { %p2049_p0 = pneg %p2048_p13  ;;  %p2055_p4 = por %p2054_p9, %p2053_p8 }
  0x96   : > { %p2056_p5 = pnand %p2055_p4, %p2049_p0 }
  0x98   : > { %2059 = shalt.err (!%p2056_p5)
}
  0x99   : > { %s2254_s8 = smov 128   ;;  %s2255_s20 = smov 8  }
  0x9a   : > { %s3521_s19 = smov 256   ;;  %p106_p0 = scmp.eq.s32.totalorder %s105_s27, 0 }
  0x9b   : > { %1745 = dma.hbm_to_vmem [thread:$0]  (!%p2510_p2), %s2574_s9, 2048, %s2527_s11, %s2580_s26, %s3521_s19, %s2254_s8, %s2255_s20  }
  0x9c   : > { %s3522_s24 = scalar_select %p2540_p1, %s2242_s22, 0 }
  0x9d   : > { %p3523_p8 = scmp.lt.s32.totalorder %s2246_s23, 4  ;;  %s261_s4 = sand.u32 1, %s2214_s15  }
  0x9e   : > { %s2623_s7 = scalar_select %p106_p0, %s2214_s15, %s108_s30  }
  0x9f   : > { %s3585_s24 = smov (!%p3523_p8, %s3522_s24), 0  ;;  %p3524_p3 = pmov %p3523_p8 }
  0xa0   : > { %s264_s28 = sld [smem:[%s3583_s1 + %s3585_s24]]  ;;  %s1509_s26 = sshll.u32 %s261_s4, 7 }
  0xa1   : > { %s1725_s16 = scalar_select %p2540_p1, [#allocation4], [#allocation16] }
  0xa2   : > { %p3525_p2 = pmov %p3524_p3  ;;  %s259_s5 = sand.u32 1, %s2246_s23  }
  0xa3   : > { %s3587_s16 = smov (!%p3524_p3, %s1725_s16), [#allocation20]  ;;  %s263_s10 = scalar_lea.vmem [#allocation9], %s1509_s26 }
  0xa4   : > { %s277_s1 = sshll.u32 %s263_s10, 4  ;;  %p3526_p6 = scmp.ne.s32.totalorder %s3518_s0, 0  ;;  %s2639_s1 = int_to_ptr.vmem [resolvable:$true] %s277_s1 }
  0xa6   : > { %s1510_s6 = sadd.s32 4294967295, %s264_s28  ;;  %p2062_p7 = pneg %p3526_p6 }
  0xa7   : > { %p266_p12 = scmp.lt.s32.totalorder %s2238_s21, %s1510_s6 }
  0xa9   : > { %s267_s2 = scalar_select %p266_p12, %s2238_s21, %s1510_s6 }
  0xab   : > { %s269_s27 = sadd.s32 %s2476_s25, %s267_s2  ;;  %s2646_s2 = scalar_lea.sflag [#allocation10], %s259_s5 }
  0xac   : > { %s3589_s27 = smov (!%p2540_p1, %s269_s27), 0 }
  0xad   : > { %s3591_s27 = smov (!%p3525_p2, %s3589_s27), 0 }
  0xae   : > { %s270_s11 = sld [smem:[%s3587_s16 + %s3591_s27]]  ;;  %s2065_s16 = scalar_lea.hbm %s3455_s3, 4096 }
  0xb4   : > { %s1529_s30 = sshll.u32 %s270_s11, 11 }
  0xb5   : > { %s2644_s24 = scalar_lea.hbm %s3455_s3, %s1529_s30 }
  0xb6   : > { %s2060_s25 = scalar_lea.hbm %s2644_s24, 2048  ;;  %p2066_p13 = scmp.lt.u32.totalorder %s2644_s24, %s3455_s3 }
  0xb7   : > { %p2061_p1 = scmp.ne.s32.totalorder %s2644_s24, %s2060_s25  ;;  %p2067_p9 = scmp.lt.u32.totalorder %s2065_s16, %s2060_s25 }
  0xb8   : > { %p2069_p5 = scmp.lt.u32.totalorder %s2060_s25, %s2644_s24 }
  0xb9   : > { %p2063_p11 = pnand %p2062_p7, %p2061_p1  ;;  %p2068_p4 = por %p2067_p9, %p2066_p13 }
  0xbb   : > { %p2064_p10 = pneg %p2063_p11  ;;  %p2070_p0 = por %p2069_p5, %p2068_p4 }
  0xbd   : > { %p2071_p8 = pnand %p2070_p0, %p2064_p10 }
  0xbf   : > { %2074 = shalt.err (!%p2071_p8)
}
  0xc0   : > { %s2075_s26 = scalar_lea.vmem %s2639_s1, 2048  ;;  %s2256_s27 = smov [#allocation9]  }
  0xc1   : > { %p2076_p12 = scmp.ne.s32.totalorder %s2639_s1, %s2075_s26  ;;  %s2080_s11 = sshll.u32 %s2256_s27, 4  ;;  %s2081_s11 = int_to_ptr.vmem [resolvable:$false] %s2080_s11 }
  0xc2   : > { %s2082_s5 = scalar_lea.vmem %s2081_s11, 4096  ;;  %p2083_p1 = scmp.lt.s32.totalorder %s2639_s1, %s2081_s11 }
  0xc3   : > { %p2078_p3 = pnand %p2076_p12, %p2062_p7  ;;  %p2084_p11 = scmp.lt.s32.totalorder %s2082_s5, %s2075_s26 }
  0xc5   : > { %p2079_p2 = pneg %p2078_p3  ;;  %p2085_p13 = por %p2084_p11, %p2083_p1 }
  0xc7   : > { %p2086_p9 = pnand %p2085_p13, %p2079_p2 }
  0xc9   : > { %2089 = shalt.err (!%p2086_p9)
}
  0xca   : > { %1752 = dma.hbm_to_vmem [thread:$0]  (!%p3526_p6), %s2644_s24, 2048, %s2639_s1, %s2646_s2, %s2254_s8, %s2254_s8, %s2255_s20  }
  0xcb   : > { %p3527_p7 = scmp.ne.s32.totalorder %s3506_s13, 0 }
  0xcc   : > { %s291_s10 = sand.u32 (!%p3527_p7), 1, %s2222_s17   ;;  %p3528_p10 = scmp.ne.s32.totalorder (!%p3527_p7), %s3497_s29, 0 }
  0xcd   : > { %289 = sbr.rel (%p3527_p7) target bundleno = 1184 (0x4a0), region = 36  ;;  %s1515_s30 = sshll.u32 (!%p3527_p7), %s291_s10, 7 }
  0xce   : > { %s292_s9 = scalar_lea.sflag (!%p3527_p7), [#allocation7], %s291_s10  ;;  %s2680_s19 = scalar_lea.vmem (!%p3527_p7), [#allocation6], %s1515_s30 }
  0xd4   : > { %2177 = dma.done.wait (%p3528_p10), %s292_s9, 2048  }
  0xd5   : > { %2179 = vsyncadd (%p3528_p10), %s292_s9, 4294965248  ;;  %s3529_s0 = sld [smem:[#allocation31_spill]]  ;;  %s3530_s25 = sld [smem:[#allocation32_spill]] }
  0xd6   : > { %s302_s8 = sand.u32 1, %s2210_s14  }
  0xd7   : > { %s1516_s20 = sshll.u32 %s302_s8, 7 }
  0xd8   : > { %s2688_s1 = scalar_lea.vmem [#allocation9], %s1516_s20 }
  0xdb   : > { %s300_s12 = sand.u32 1, %s3529_s0   ;;  %p3531_p6 = scmp.ne.s32.totalorder %s3530_s25, 0 }
  0xdc   : > { %s301_s13 = scalar_lea.sflag [#allocation10], %s300_s12 }
  0xdd   : > { %2181 = dma.done.wait (%p3531_p6), %s301_s13, 2048  }
  0xde   : > { %2183 = vsyncadd (%p3531_p6), %s301_s13, 4294965248  ;;  %p3532_p4 = scmp.eq.s32.totalorder %s3529_s0, 0 }
  0xe0   : > { %2185 = dma.done.wait (%p3532_p4), [#allocation10], 4096   ;;  %p3533_p5 = pmov %p3532_p4 }
  0xe1   : > { %s3534_s29 = sld [smem:[#allocation27_spill]]  ;;  %s3535_s16 = sld [smem:[#allocation29_spill]] }
  0xe2   : > { %2187 = vsyncadd (%p3533_p5), [#allocation10], 4294963200 }
  0xe7   : > { %s335_s24 = sand.u32 1, %s3534_s29   ;;  %p1519_p0 = scmp.ne.s32.totalorder %s3535_s16, 0 }
  0xe8   : > { %s1518_s2 = sshll.u32 %s335_s24, 8  ;;  %v2257_v0 = vmov (!%p1519_p0), 0.0  }
  0xe9   : > { %s2701_s28 = scalar_lea.vmem [#allocation12], %s1518_s2  ;;  %358 = sbr.rel (%p1519_p0) target bundleno = 241 (0xf1), region = 52  ;;  %359 = vst [vmem:[#allocation2] sm:$0xff] (!%p1519_p0), %v2257_v0  ;;  %360 = vst [vmem:[#allocation2 + $0x8] sm:$0xff] (!%p1519_p0), %v2257_v0 }
  0xea   : > { %361 = vst [vmem:[#allocation2 + $0x10] sm:$0xff] (!%p1519_p0), %v2257_v0  ;;  %362 = vst [vmem:[#allocation2 + $0x18] sm:$0xff] (!%p1519_p0), %v2257_v0 }
  0xeb   : > { %363 = vst [vmem:[#allocation2 + $0x20] sm:$0xff] (!%p1519_p0), %v2257_v0  ;;  %364 = vst [vmem:[#allocation2 + $0x28] sm:$0xff] (!%p1519_p0), %v2257_v0 }
  0xec   : > { %365 = vst [vmem:[#allocation2 + $0x30] sm:$0xff] (!%p1519_p0), %v2257_v0  ;;  %366 = vst [vmem:[#allocation2 + $0x38] sm:$0xff] (!%p1519_p0), %v2257_v0 }
  0xed   : > { %367 = vst [vmem:[#allocation2 + $0x40] sm:$0xff] (!%p1519_p0), %v2257_v0  ;;  %368 = vst [vmem:[#allocation2 + $0x48] sm:$0xff] (!%p1519_p0), %v2257_v0 }
  0xee   : > { %369 = vst [vmem:[#allocation2 + $0x50] sm:$0xff] (!%p1519_p0), %v2257_v0  ;;  %370 = vst [vmem:[#allocation2 + $0x58] sm:$0xff] (!%p1519_p0), %v2257_v0 }
  0xef   : > { %371 = vst [vmem:[#allocation2 + $0x60] sm:$0xff] (!%p1519_p0), %v2257_v0  ;;  %372 = vst [vmem:[#allocation2 + $0x68] sm:$0xff] (!%p1519_p0), %v2257_v0 }
  0xf0   : > { %373 = vst [vmem:[#allocation2 + $0x70] sm:$0xff] %v2257_v0  ;;  %374 = vst [vmem:[#allocation2 + $0x78] sm:$0xff] %v2257_v0 }
  0xf1 PF: > { %s3536_s6 = sld [smem:[#allocation30_spill]]  ;;  %s3537_s26 = sld [smem:[#allocation29_spill]] }
  0xf7   : > { %s375_s4 = sld [smem:[#allocation5 + %s3536_s6]] }
  0xfd   : > { %p1520_p8 = scmp.ge.s32.totalorder %s3537_s26, %s375_s4 }
  0xfe   : > { %v412_v1 = vld [vmem:[%s2688_s1] sm:$0xff] (!%p1520_p8)  ;;  %v413_v2 = vld [vmem:[%s2688_s1 + $0x8] sm:$0xff] (!%p1520_p8)  ;;  %v414_v3 = vld [vmem:[%s2688_s1 + $0x10] sm:$0xff] (!%p1520_p8) }
  0xff   : > { %379 = sbr.rel (%p1520_p8) target bundleno = 517 (0x205), region = 56  ;;  %v1620_v4 = vpack.c.bf16 (!%p1520_p8), %v413_v2, %v412_v1  ;;  %v415_v5 = vld [vmem:[%s2688_s1 + $0x18] sm:$0xff] (!%p1520_p8)  ;;  %v416_v7 = vld [vmem:[%s2688_s1 + $0x20] sm:$0xff] (!%p1520_p8)  ;;  %v417_v8 = vld [vmem:[%s2688_s1 + $0x28] sm:$0xff] (!%p1520_p8) }
 0x100   : > { %v1624_v6 = vpack.c.bf16 (!%p1520_p8), %v415_v5, %v414_v3  ;;  %v1628_v9 = vpack.c.bf16 (!%p1520_p8), %v417_v8, %v416_v7  ;;  %v396_v10 = vld [vmem:[%s2680_s19] sm:$0xff] (!%p1520_p8)  ;;  %v418_v12 = vld [vmem:[%s2688_s1 + $0x30] sm:$0xff] (!%p1520_p8)  ;;  %v419_v13 = vld [vmem:[%s2688_s1 + $0x38] sm:$0xff] (!%p1520_p8) }
 0x101   : > { %1621 = vmatprep.subr.bf16.mxu0 (!%p1520_p8), %v1620_v4  ;;  %1684 = vmatprep.subr.bf16.mxu1 (!%p1520_p8), %v1620_v4  ;;  %v404_v11 = vld [vmem:[%s2680_s19 + $0x40] sm:$0xff] (!%p1520_p8)  ;;  %v1632_v14 = vpack.c.bf16 (!%p1520_p8), %v419_v13, %v418_v12  ;;  %v421_v16 = vld [vmem:[%s2688_s1 + $0x48] sm:$0xff] (!%p1520_p8)  ;;  %v422_v18 = vld [vmem:[%s2688_s1 + $0x50] sm:$0xff] (!%p1520_p8) }
 0x102   : > { %1623 = vmatpush3.bf16.msra.mxu0 (!%p1520_p8), %v1620_v4  ;;  %1692 = vmatpush3.bf16.msra.mxu1 (!%p1520_p8), %v1620_v4  ;;  %v420_v15 = vld [vmem:[%s2688_s1 + $0x40] sm:$0xff] (!%p1520_p8)  ;;  %v423_v19 = vld [vmem:[%s2688_s1 + $0x58] sm:$0xff] (!%p1520_p8)  ;;  %v425_v22 = vld [vmem:[%s2688_s1 + $0x68] sm:$0xff] (!%p1520_p8) }
 0x103   : > { %1625 = vmatprep.subr.bf16.mxu0 (!%p1520_p8), %v1624_v6  ;;  %1685 = vmatprep.subr.bf16.mxu1 (!%p1520_p8), %v1624_v6  ;;  %v1636_v17 = vpack.c.bf16 (!%p1520_p8), %v421_v16, %v420_v15  ;;  %v1640_v20 = vpack.c.bf16 (!%p1520_p8), %v423_v19, %v422_v18  ;;  %v424_v21 = vld [vmem:[%s2688_s1 + $0x60] sm:$0xff] (!%p1520_p8)  ;;  %v426_v24 = vld [vmem:[%s2688_s1 + $0x70] sm:$0xff] (!%p1520_p8)  ;;  %v427_v25 = vld [vmem:[%s2688_s1 + $0x78] sm:$0xff] (!%p1520_p8) }
 0x104   : > { %1596 = vmatprep.mubr.f32.mxu0 (!%p1520_p8), %v396_v10  ;;  %1608 = vmatprep.mubr.f32.mxu1 (!%p1520_p8), %v404_v11  ;;  %v1644_v23 = vpack.c.bf16 (!%p1520_p8), %v425_v22, %v424_v21  ;;  %v1648_v26 = vpack.c.bf16 (!%p1520_p8), %v427_v25, %v426_v24  ;;  %v397_v27 = vld [vmem:[%s2680_s19 + $0x8] sm:$0xff] (!%p1520_p8)  ;;  %v398_v29 = vld [vmem:[%s2680_s19 + $0x10] sm:$0xff] (!%p1520_p8)  ;;  %v399_v31 = vld [vmem:[%s2680_s19 + $0x18] sm:$0xff] (!%p1520_p8) }
 0x105   : > { %v405_v28 = vld [vmem:[%s2680_s19 + $0x48] sm:$0xff] (!%p1520_p8)  ;;  %v406_v30 = vld [vmem:[%s2680_s19 + $0x50] sm:$0xff] (!%p1520_p8)  ;;  %v407_v32 = vld [vmem:[%s2680_s19 + $0x58] sm:$0xff] (!%p1520_p8) }
 0x106   : > { %1627 = vmatpush3.bf16.msra.mxu0 %v1624_v6  ;;  %1693 = vmatpush3.bf16.msra.mxu1 %v1624_v6  ;;  %v400_v33 = vld [vmem:[%s2680_s19 + $0x20] sm:$0xff]  ;;  %v401_v35 = vld [vmem:[%s2680_s19 + $0x28] sm:$0xff]  ;;  %v402_v37 = vld [vmem:[%s2680_s19 + $0x30] sm:$0xff] }
 0x107   : > { %1629 = vmatprep.subr.bf16.mxu0 %v1628_v9  ;;  %1686 = vmatprep.subr.bf16.mxu1 %v1628_v9  ;;  %v408_v34 = vld [vmem:[%s2680_s19 + $0x60] sm:$0xff]  ;;  %v409_v36 = vld [vmem:[%s2680_s19 + $0x68] sm:$0xff]  ;;  %v410_v38 = vld [vmem:[%s2680_s19 + $0x70] sm:$0xff] }
 0x108   : > { %v403_v39 = vld [vmem:[%s2680_s19 + $0x38] sm:$0xff]  ;;  %v381_v41 = vld [vmem:[#allocation2 + $0x8] sm:$0xff]  ;;  %v380_v43 = vld [vmem:[#allocation2] sm:$0xff] }
 0x109   : > { %v411_v40 = vld [vmem:[%s2680_s19 + $0x78] sm:$0xff]  ;;  %v389_v42 = vld [vmem:[#allocation2 + $0x48] sm:$0xff]  ;;  %v388_v44 = vld [vmem:[#allocation2 + $0x40] sm:$0xff] }
 0x10a   : > { %1631 = vmatpush3.bf16.msra.mxu0 %v1628_v9  ;;  %1694 = vmatpush3.bf16.msra.mxu1 %v1628_v9  ;;  %v383_v53 = vld [vmem:[#allocation2 + $0x18] sm:$0xff]  ;;  %v382_v55 = vld [vmem:[#allocation2 + $0x10] sm:$0xff]  ;;  %v385_v1 = vld [vmem:[#allocation2 + $0x28] sm:$0xff] }
 0x10b   : > { %1633 = vmatprep.subr.bf16.mxu0 %v1632_v14  ;;  %1687 = vmatprep.subr.bf16.mxu1 %v1632_v14  ;;  %v391_v54 = vld [vmem:[#allocation2 + $0x58] sm:$0xff]  ;;  %v390_v56 = vld [vmem:[#allocation2 + $0x50] sm:$0xff]  ;;  %v393_v2 = vld [vmem:[#allocation2 + $0x68] sm:$0xff] }
 0x10c   : > { %v384_v3 = vld [vmem:[#allocation2 + $0x20] sm:$0xff]  ;;  %v387_v13 = vld [vmem:[#allocation2 + $0x38] sm:$0xff]  ;;  %v386_v15 = vld [vmem:[#allocation2 + $0x30] sm:$0xff] }
 0x10d   : > { %v392_v4 = vld [vmem:[#allocation2 + $0x60] sm:$0xff]  ;;  %v394_v16 = vld [vmem:[#allocation2 + $0x70] sm:$0xff] }
 0x10e   : > { %1635 = vmatpush3.bf16.msra.mxu0 %v1632_v14  ;;  %1695 = vmatpush3.bf16.msra.mxu1 %v1632_v14  ;;  %v395_v14 = vld [vmem:[#allocation2 + $0x78] sm:$0xff] }
 0x10f   : > { %1637 = vmatprep.subr.bf16.mxu0 %v1636_v17  ;;  %1688 = vmatprep.subr.bf16.mxu1 %v1636_v17 }
 0x112   : > { %1639 = vmatpush3.bf16.msra.mxu0 %v1636_v17  ;;  %1696 = vmatpush3.bf16.msra.mxu1 %v1636_v17 }
 0x113   : > { %1641 = vmatprep.subr.bf16.mxu0 %v1640_v20  ;;  %1689 = vmatprep.subr.bf16.mxu1 %v1640_v20 }
 0x116   : > { %1643 = vmatpush3.bf16.msra.mxu0 %v1640_v20  ;;  %1697 = vmatpush3.bf16.msra.mxu1 %v1640_v20 }
 0x117   : > { %1645 = vmatprep.subr.bf16.mxu0 %v1644_v23  ;;  %1690 = vmatprep.subr.bf16.mxu1 %v1644_v23 }
 0x11a   : > { %1647 = vmatpush3.bf16.msra.mxu0 %v1644_v23  ;;  %1698 = vmatpush3.bf16.msra.mxu1 %v1644_v23 }
 0x11b   : > { %1649 = vmatprep.subr.bf16.mxu0 %v1648_v26  ;;  %1691 = vmatprep.subr.bf16.mxu1 %v1648_v26 }
 0x11e   : > { %1651 = vmatpush3.bf16.msra.mxu0 %v1648_v26  ;;  %1699 = vmatpush3.bf16.msra.mxu1 %v1648_v26 }
 0x121   : > { %1597 = vmatmul.mubr.f32.vlgmr.msra.gmra.mrb[0].mxu0 %v397_v27  ;;  %1609 = vmatmul.mubr.f32.vlgmr.msra.gmra.mrb[0].mxu1 %v405_v28 }
 0x122   : > { %1599 = vmatprep.mubr.f32.mxu0 %v398_v29  ;;  %1611 = vmatprep.mubr.f32.mxu1 %v406_v30 }
 0x125   : > { %1600 = vmatmul.mubr.f32.gmra.mrb[2].mxu0 %v399_v31  ;;  %1612 = vmatmul.mubr.f32.gmra.mrb[2].mxu1 %v407_v32 }
 0x126   : > { %1602 = vmatprep.mubr.f32.mxu0 %v400_v33  ;;  %1614 = vmatprep.mubr.f32.mxu1 %v408_v34 }
 0x129   : > { %1603 = vmatmul.mubr.f32.gmra.mrb[4].mxu0 %v401_v35  ;;  %1615 = vmatmul.mubr.f32.gmra.mrb[4].mxu1 %v409_v36 }
 0x12a   : > { %1605 = vmatprep.mubr.f32.mxu0 %v402_v37  ;;  %1617 = vmatprep.mubr.f32.mxu1 %v410_v38 }
 0x12d   : > { %1606 = vmatmul.mubr.f32.gmra.mrb[6].mxu0 %v403_v39  ;;  %1618 = vmatmul.mubr.f32.gmra.mrb[6].mxu1 %v411_v40 }
 0x1f4   : > { %v1598_v45 = vpop.f32.mrb[0].mxu0  ;;  %v1610_v46 = vpop.f32.mrb[0].mxu1 }
 0x1f5   : > { %v574_v47 = vadd.f32 %v1598_v45, %v381_v41  ;;  %v582_v48 = vadd.f32 %v1610_v46, %v389_v42  ;;  %v494_v49 = vpop.f32.mrb[1].mxu0  ;;  %v534_v50 = vpop.f32.mrb[1].mxu1 }
 0x1f6   : > { %v573_v51 = vadd.f32 %v494_v49, %v380_v43  ;;  %v581_v52 = vadd.f32 %v534_v50, %v388_v44 }
 0x1f7   : > { %590 = vst [vmem:[#allocation2 + $0x8] sm:$0xff] %v574_v47  ;;  %598 = vst [vmem:[#allocation2 + $0x48] sm:$0xff] %v582_v48 }
 0x1f8   : > { %589 = vst [vmem:[#allocation2] sm:$0xff] %v573_v51  ;;  %597 = vst [vmem:[#allocation2 + $0x40] sm:$0xff] %v581_v52  ;;  %v1601_v57 = vpop.f32.mrb[2].mxu0  ;;  %v1613_v58 = vpop.f32.mrb[2].mxu1 }
 0x1f9   : > { %v576_v59 = vadd.f32 %v1601_v57, %v383_v53  ;;  %v584_v60 = vadd.f32 %v1613_v58, %v391_v54  ;;  %v504_v61 = vpop.f32.mrb[3].mxu0  ;;  %v544_v62 = vpop.f32.mrb[3].mxu1 }
 0x1fa   : > { %v575_v63 = vadd.f32 %v504_v61, %v382_v55  ;;  %v583_v0 = vadd.f32 %v544_v62, %v390_v56 }
 0x1fb   : > { %592 = vst [vmem:[#allocation2 + $0x18] sm:$0xff] %v576_v59  ;;  %600 = vst [vmem:[#allocation2 + $0x58] sm:$0xff] %v584_v60 }
 0x1fc   : > { %591 = vst [vmem:[#allocation2 + $0x10] sm:$0xff] %v575_v63  ;;  %599 = vst [vmem:[#allocation2 + $0x50] sm:$0xff] %v583_v0  ;;  %v1604_v5 = vpop.f32.mrb[4].mxu0  ;;  %v1616_v6 = vpop.f32.mrb[4].mxu1 }
 0x1fd   : > { %v578_v7 = vadd.f32 %v1604_v5, %v385_v1  ;;  %v586_v8 = vadd.f32 %v1616_v6, %v393_v2  ;;  %v514_v9 = vpop.f32.mrb[5].mxu0  ;;  %v554_v10 = vpop.f32.mrb[5].mxu1 }
 0x1fe   : > { %v577_v11 = vadd.f32 %v514_v9, %v384_v3  ;;  %v585_v12 = vadd.f32 %v554_v10, %v392_v4 }
 0x1ff   : > { %594 = vst [vmem:[#allocation2 + $0x28] sm:$0xff] %v578_v7  ;;  %602 = vst [vmem:[#allocation2 + $0x68] sm:$0xff] %v586_v8 }
 0x200   : > { %593 = vst [vmem:[#allocation2 + $0x20] sm:$0xff] %v577_v11  ;;  %601 = vst [vmem:[#allocation2 + $0x60] sm:$0xff] %v585_v12  ;;  %v1607_v17 = vpop.f32.mrb[6].mxu0  ;;  %v1619_v18 = vpop.f32.mrb[6].mxu1 }
 0x201   : > { %v580_v19 = vadd.f32 %v1607_v17, %v387_v13  ;;  %v588_v20 = vadd.f32 %v1619_v18, %v395_v14  ;;  %v524_v21 = vpop.f32.mrb[7].mxu0  ;;  %v564_v22 = vpop.f32.mrb[7].mxu1 }
 0x202   : > { %v579_v23 = vadd.f32 %v524_v21, %v386_v15  ;;  %v587_v24 = vadd.f32 %v564_v22, %v394_v16 }
 0x203   : > { %596 = vst [vmem:[#allocation2 + $0x38] sm:$0xff] %v580_v19  ;;  %604 = vst [vmem:[#allocation2 + $0x78] sm:$0xff] %v588_v20 }
 0x204   : > { %595 = vst [vmem:[#allocation2 + $0x30] sm:$0xff] %v579_v23  ;;  %603 = vst [vmem:[#allocation2 + $0x70] sm:$0xff] %v587_v24 }
 0x205 PF: > { %s3538_s27 = sld [smem:[#allocation29_spill]] }
 0x20b   : > { %p1521_p12 = scmp.ne.s32.totalorder %s3538_s27, 1 }
 0x20c   : > { %v626_v25 = vld [vmem:[#allocation11 + $0x8] sm:$0xff] (!%p1521_p12)  ;;  %v628_v26 = vld [vmem:[#allocation11 + $0x18] sm:$0xff] (!%p1521_p12)  ;;  %v625_v27 = vld [vmem:[#allocation11] sm:$0xff] (!%p1521_p12)  ;;  %v2258_v32 = vmov (!%p1521_p12), 0.0   ;;  %s3539_s10 = sld [smem:[#allocation41_spill]] (!%p1521_p12) }
 0x20d   : > { %608 = sbr.rel (%p1521_p12) target bundleno = 1156 (0x484), region = 60  ;;  %v1652_v28 = vpack.c.bf16 (!%p1521_p12), %v628_v26, %v626_v25  ;;  %v627_v29 = vld [vmem:[#allocation11 + $0x10] sm:$0xff] (!%p1521_p12)  ;;  %v630_v30 = vld [vmem:[#allocation11 + $0x28] sm:$0xff] (!%p1521_p12)  ;;  %v632_v31 = vld [vmem:[#allocation11 + $0x38] sm:$0xff] (!%p1521_p12)  ;;  %731 = vmatprep.mubr.f32.mxu0 (!%p1521_p12), %v2258_v32  ;;  %779 = vmatprep.mubr.f32.mxu1 (!%p1521_p12), %v2258_v32  ;;  %v659_v26 = vlaneseq (!%p1521_p12) }
 0x20e   : > { %v1654_v33 = vpack.c.bf16 (!%p1521_p12), %v627_v29, %v625_v27  ;;  %v1656_v34 = vpack.c.bf16 (!%p1521_p12), %v632_v31, %v630_v30  ;;  %v629_v35 = vld [vmem:[#allocation11 + $0x20] sm:$0xff] (!%p1521_p12)  ;;  %v631_v36 = vld [vmem:[#allocation11 + $0x30] sm:$0xff] (!%p1521_p12)  ;;  %v634_v37 = vld [vmem:[#allocation11 + $0x48] sm:$0xff] (!%p1521_p12) }
 0x20f   : > { %1653 = vmatprep.subr.bf16.mxu0 (!%p1521_p12), %v1652_v28  ;;  %1700 = vmatprep.subr.bf16.mxu1 (!%p1521_p12), %v1652_v28  ;;  %v636_v38 = vld [vmem:[#allocation11 + $0x58] sm:$0xff] (!%p1521_p12)  ;;  %v1658_v39 = vpack.c.bf16 (!%p1521_p12), %v631_v36, %v629_v35  ;;  %v633_v41 = vld [vmem:[#allocation11 + $0x40] sm:$0xff] (!%p1521_p12)  ;;  %v635_v42 = vld [vmem:[#allocation11 + $0x50] sm:$0xff] (!%p1521_p12)  ;;  %v2755_v27 = vshrl.u32 (!%p1521_p12), %v659_v26, 7 }
 0x210   : > { %1655 = vmatpush1.bf16.msra.mxu0 (!%p1521_p12), %v1654_v33  ;;  %1708 = vmatpush1.bf16.msra.mxu1 (!%p1521_p12), %v1654_v33  ;;  %v1660_v40 = vpack.c.bf16 (!%p1521_p12), %v636_v38, %v634_v37  ;;  %v638_v43 = vld [vmem:[#allocation11 + $0x68] sm:$0xff] (!%p1521_p12)  ;;  %v640_v44 = vld [vmem:[#allocation11 + $0x78] sm:$0xff] (!%p1521_p12)  ;;  %v1662_v45 = vpack.c.bf16 (!%p1521_p12), %v635_v42, %v633_v41  ;;  %v637_v47 = vld [vmem:[#allocation11 + $0x60] sm:$0xff] (!%p1521_p12) }
 0x211   : > { %1657 = vmatprep.subr.bf16.mxu0 (!%p1521_p12), %v1656_v34  ;;  %1701 = vmatprep.subr.bf16.mxu1 (!%p1521_p12), %v1656_v34  ;;  %v1664_v46 = vpack.c.bf16 (!%p1521_p12), %v640_v44, %v638_v43  ;;  %v639_v48 = vld [vmem:[#allocation11 + $0x70] sm:$0xff] (!%p1521_p12)  ;;  %v642_v49 = vld [vmem:[#allocation11 + $0x88] sm:$0xff] (!%p1521_p12)  ;;  %v644_v50 = vld [vmem:[#allocation11 + $0x98] sm:$0xff] (!%p1521_p12)  ;;  %v661_v28 = vsub.s32 (!%p1521_p12), 0, %v2755_v27 }
 0x212   : > { %v1666_v51 = vpack.c.bf16 (!%p1521_p12), %v639_v48, %v637_v47  ;;  %v1668_v52 = vpack.c.bf16 (!%p1521_p12), %v644_v50, %v642_v49  ;;  %v641_v53 = vld [vmem:[#allocation11 + $0x80] sm:$0xff] (!%p1521_p12)  ;;  %v643_v54 = vld [vmem:[#allocation11 + $0x90] sm:$0xff] (!%p1521_p12)  ;;  %v646_v55 = vld [vmem:[#allocation11 + $0xa8] sm:$0xff] (!%p1521_p12) }
 0x213   : > { %v648_v56 = vld [vmem:[#allocation11 + $0xb8] sm:$0xff] (!%p1521_p12)  ;;  %v1670_v57 = vpack.c.bf16 (!%p1521_p12), %v643_v54, %v641_v53  ;;  %v645_v59 = vld [vmem:[#allocation11 + $0xa0] sm:$0xff] (!%p1521_p12)  ;;  %v647_v60 = vld [vmem:[#allocation11 + $0xb0] sm:$0xff] (!%p1521_p12) }
 0x214   : > { %1659 = vmatpush1.bf16.msra.mxu0 %v1658_v39  ;;  %1709 = vmatpush1.bf16.msra.mxu1 %v1658_v39  ;;  %v1672_v58 = vpack.c.bf16 %v648_v56, %v646_v55  ;;  %v650_v61 = vld [vmem:[#allocation11 + $0xc8] sm:$0xff]  ;;  %v652_v62 = vld [vmem:[#allocation11 + $0xd8] sm:$0xff]  ;;  %v1674_v63 = vpack.c.bf16 %v647_v60, %v645_v59  ;;  %v649_v1 = vld [vmem:[#allocation11 + $0xc0] sm:$0xff] }
 0x215   : > { %1661 = vmatprep.subr.bf16.mxu0 %v1660_v40  ;;  %1702 = vmatprep.subr.bf16.mxu1 %v1660_v40  ;;  %v1676_v0 = vpack.c.bf16 %v652_v62, %v650_v61  ;;  %v651_v2 = vld [vmem:[#allocation11 + $0xd0] sm:$0xff]  ;;  %v654_v3 = vld [vmem:[#allocation11 + $0xe8] sm:$0xff]  ;;  %v656_v4 = vld [vmem:[#allocation11 + $0xf8] sm:$0xff] }
 0x216   : > { %v1678_v5 = vpack.c.bf16 %v651_v2, %v649_v1  ;;  %v1680_v6 = vpack.c.bf16 %v656_v4, %v654_v3  ;;  %v653_v7 = vld [vmem:[#allocation11 + $0xe0] sm:$0xff]  ;;  %v655_v8 = vld [vmem:[#allocation11 + $0xf0] sm:$0xff]  ;;  %v610_v12 = vld [vmem:[#allocation2 + $0x8] sm:$0xff] }
 0x217   : > { %v1682_v9 = vpack.c.bf16 %v655_v8, %v653_v7  ;;  %v609_v10 = vld [vmem:[#allocation2] sm:$0xff]  ;;  %v618_v13 = vld [vmem:[#allocation2 + $0x48] sm:$0xff]  ;;  %v611_v14 = vld [vmem:[#allocation2 + $0x10] sm:$0xff] }
 0x218   : > { %1663 = vmatpush1.bf16.msra.mxu0 %v1662_v45  ;;  %1710 = vmatpush1.bf16.msra.mxu1 %v1662_v45  ;;  %v617_v11 = vld [vmem:[#allocation2 + $0x40] sm:$0xff]  ;;  %v619_v15 = vld [vmem:[#allocation2 + $0x50] sm:$0xff]  ;;  %v612_v16 = vld [vmem:[#allocation2 + $0x18] sm:$0xff] }
 0x219   : > { %1665 = vmatprep.subr.bf16.mxu0 %v1664_v46  ;;  %1703 = vmatprep.subr.bf16.mxu1 %v1664_v46  ;;  %v620_v17 = vld [vmem:[#allocation2 + $0x58] sm:$0xff]  ;;  %v613_v18 = vld [vmem:[#allocation2 + $0x20] sm:$0xff]  ;;  %v614_v20 = vld [vmem:[#allocation2 + $0x28] sm:$0xff] }
 0x21a   : > { %v621_v19 = vld [vmem:[#allocation2 + $0x60] sm:$0xff]  ;;  %v622_v21 = vld [vmem:[#allocation2 + $0x68] sm:$0xff]  ;;  %v615_v22 = vld [vmem:[#allocation2 + $0x30] sm:$0xff] }
 0x21b   : > { %v623_v23 = vld [vmem:[#allocation2 + $0x70] sm:$0xff]  ;;  %v616_v24 = vld [vmem:[#allocation2 + $0x38] sm:$0xff] }
 0x21c   : > { %1667 = vmatpush1.bf16.msra.mxu0 %v1666_v51  ;;  %1711 = vmatpush1.bf16.msra.mxu1 %v1666_v51  ;;  %v624_v25 = vld [vmem:[#allocation2 + $0x78] sm:$0xff]  ;;  %v2761_v29 = vld [vmem:[%s3539_s10] sm:$0xff] }
 0x21d   : > { %1669 = vmatprep.subr.bf16.mxu0 %v1668_v52  ;;  %1704 = vmatprep.subr.bf16.mxu1 %v1668_v52  ;;  %v2766_v30 = vld [vmem:[%s3539_s10 + $0x8] sm:$0xff]  ;;  %v2769_v31 = vrot.slane %v2761_v29, %v661_v28 }
 0x220   : > { %1671 = vmatpush1.bf16.msra.mxu0 %v1670_v57  ;;  %1712 = vmatpush1.bf16.msra.mxu1 %v1670_v57 }
 0x221   : > { %1673 = vmatprep.subr.bf16.mxu0 %v1672_v58  ;;  %1705 = vmatprep.subr.bf16.mxu1 %v1672_v58 }
 0x224   : > { %1675 = vmatpush1.bf16.msra.mxu0 %v1674_v63  ;;  %1713 = vmatpush1.bf16.msra.mxu1 %v1674_v63 }
 0x225   : > { %1677 = vmatprep.subr.bf16.mxu0 %v1676_v0  ;;  %1706 = vmatprep.subr.bf16.mxu1 %v1676_v0 }
 0x228   : > { %1679 = vmatpush1.bf16.msra.mxu0 %v1678_v5  ;;  %1714 = vmatpush1.bf16.msra.mxu1 %v1678_v5 }
 0x229   : > { %1681 = vmatprep.subr.bf16.mxu0 %v1680_v6  ;;  %1707 = vmatprep.subr.bf16.mxu1 %v1680_v6 }
 0x22c   : > { %1683 = vmatpush1.bf16.msra.mxu0 %v1682_v9  ;;  %1715 = vmatpush1.bf16.msra.mxu1 %v1682_v9 }
 0x22f   : > { %732 = vmatmul.mubr.f32.vlgmr.msra.gmra.mrb[0].mxu0 %v609_v10  ;;  %780 = vmatmul.mubr.f32.vlgmr.msra.gmra.mrb[0].mxu1 %v617_v11 }
 0x230   : > { %737 = vmatprep.mubr.f32.mxu0 %v2258_v32  ;;  %785 = vmatprep.mubr.f32.mxu1 %v2258_v32 }
 0x233   : > { %738 = vmatmul.mubr.f32.gmra.mrb[2].mxu0 %v610_v12  ;;  %786 = vmatmul.mubr.f32.gmra.mrb[2].mxu1 %v618_v13 }
 0x234   : > { %743 = vmatprep.mubr.f32.mxu0 %v2258_v32  ;;  %791 = vmatprep.mubr.f32.mxu1 %v2258_v32 }
 0x237   : > { %744 = vmatmul.mubr.f32.gmra.mrb[4].mxu0 %v611_v14  ;;  %792 = vmatmul.mubr.f32.gmra.mrb[4].mxu1 %v619_v15 }
 0x238   : > { %749 = vmatprep.mubr.f32.mxu0 %v2258_v32  ;;  %797 = vmatprep.mubr.f32.mxu1 %v2258_v32 }
 0x23b   : > { %750 = vmatmul.mubr.f32.gmra.mrb[6].mxu0 %v612_v16  ;;  %798 = vmatmul.mubr.f32.gmra.mrb[6].mxu1 %v620_v17 }
 0x23c   : > { %755 = vmatprep.mubr.f32.mxu0 %v2258_v32  ;;  %803 = vmatprep.mubr.f32.mxu1 %v2258_v32 }
 0x23f   : > { %756 = vmatmul.mubr.f32.gmra.mrb[8].mxu0 %v613_v18  ;;  %804 = vmatmul.mubr.f32.gmra.mrb[8].mxu1 %v621_v19 }
 0x240   : > { %761 = vmatprep.mubr.f32.mxu0 %v2258_v32  ;;  %809 = vmatprep.mubr.f32.mxu1 %v2258_v32 }
 0x243   : > { %762 = vmatmul.mubr.f32.gmra.mrb[10].mxu0 %v614_v20  ;;  %810 = vmatmul.mubr.f32.gmra.mrb[10].mxu1 %v622_v21 }
 0x244   : > { %767 = vmatprep.mubr.f32.mxu0 %v2258_v32  ;;  %815 = vmatprep.mubr.f32.mxu1 %v2258_v32 }
 0x247   : > { %768 = vmatmul.mubr.f32.gmra.mrb[12].mxu0 %v615_v22  ;;  %816 = vmatmul.mubr.f32.gmra.mrb[12].mxu1 %v623_v23 }
 0x248   : > { %773 = vmatprep.mubr.f32.mxu0 %v2258_v32  ;;  %821 = vmatprep.mubr.f32.mxu1 %v2258_v32  ;;  %v2772_v32 = vrot.slane %v2766_v30, %v661_v28 }
 0x24b   : > { %774 = vmatmul.mubr.f32.gmra.mrb[14].mxu0 %v616_v24  ;;  %822 = vmatmul.mubr.f32.gmra.mrb[14].mxu1 %v624_v25 }
 0x302   : > { %v733_v33 = vpop.f32.mrb[0].mxu0  ;;  %v781_v34 = vpop.f32.mrb[0].mxu1 }
 0x303   : > { %v734_v35 = vadd.f32 %v733_v33, %v2769_v31  ;;  %v782_v36 = vadd.f32 %v781_v34, %v2769_v31  ;;  %v735_v37 = vpop.f32.mrb[1].mxu0  ;;  %v783_v38 = vpop.f32.mrb[1].mxu1 }
 0x304   : > { %v736_v39 = vadd.f32 %v735_v37, %v2772_v32  ;;  %v784_v40 = vadd.f32 %v783_v38, %v2772_v32 }
 0x305   : > { %v860_v41 = vmul.f32 0.70710677, %v734_v35  ;;  %v876_v43 = vmul.f32 0.70710677, %v782_v36  ;;  %v828_v7 = vmul.f32 0.5, %v734_v35  ;;  %v2810_v15 = vmul.f32 0.5, %v782_v36 }
 0x306   : > { %v861_v42 = vmul.f32 0.70710677, %v736_v39  ;;  %v739_v44 = vpop.f32.mrb[2].mxu0  ;;  %v787_v45 = vpop.f32.mrb[2].mxu1  ;;  %v877_v46 = vmul.f32 0.70710677, %v784_v40 }
 0x307   : > { %1884 = verf.f32 %v860_v41  ;;  %v740_v47 = vadd.f32 %v739_v44, %v2769_v31  ;;  %v788_v48 = vadd.f32 %v787_v45, %v2769_v31  ;;  %v741_v49 = vpop.f32.mrb[3].mxu0  ;;  %v789_v50 = vpop.f32.mrb[3].mxu1  ;;  %v829_v16 = vmul.f32 0.5, %v736_v39 }
 0x308   : > { %1886 = verf.f32 %v861_v42  ;;  %v742_v51 = vadd.f32 %v741_v49, %v2772_v32  ;;  %v2782_v52 = vadd.f32 %v789_v50, %v2772_v32  ;;  %v2813_v21 = vmul.f32 0.5, %v784_v40 }
 0x309   : > { %v862_v53 = vmul.f32 0.70710677, %v740_v47  ;;  %1888 = verf.f32 %v876_v43  ;;  %v878_v56 = vmul.f32 0.70710677, %v788_v48  ;;  %v2815_v22 = vmul.f32 0.5, %v740_v47 }
 0x30a   : > { %v745_v54 = vpop.f32.mrb[4].mxu0  ;;  %v793_v55 = vpop.f32.mrb[4].mxu1  ;;  %v863_v57 = vmul.f32 0.70710677, %v742_v51  ;;  %1890 = verf.f32 %v877_v46  ;;  %v879_v58 = vmul.f32 0.70710677, %v2782_v52 }
 0x30b   : > { %v746_v59 = vadd.f32 %v745_v54, %v2769_v31  ;;  %v2787_v60 = vadd.f32 %v793_v55, %v2769_v31  ;;  %v747_v61 = vpop.f32.mrb[5].mxu0  ;;  %v795_v62 = vpop.f32.mrb[5].mxu1  ;;  %1892 = verf.f32 %v862_v53  ;;  %v2818_v26 = vmul.f32 0.5, %v788_v48 }
 0x30c   : > { %v2790_v63 = vadd.f32 %v747_v61, %v2772_v32  ;;  %v2793_v0 = vadd.f32 %v795_v62, %v2772_v32  ;;  %1894 = verf.f32 %v878_v56  ;;  %v2835_v40 = vmul.f32 0.5, %v742_v51 }
 0x30d   : > { %v864_v1 = vmul.f32 0.70710677, %v746_v59  ;;  %1896 = verf.f32 %v863_v57  ;;  %v880_v4 = vmul.f32 0.70710677, %v2787_v60  ;;  %v2843_v46 = vmul.f32 0.5, %v2782_v52 }
 0x30e   : > { %v751_v2 = vpop.f32.mrb[6].mxu0  ;;  %v799_v3 = vpop.f32.mrb[6].mxu1  ;;  %v865_v5 = vmul.f32 0.70710677, %v2790_v63  ;;  %1898 = verf.f32 %v879_v58  ;;  %v881_v8 = vmul.f32 0.70710677, %v2793_v0 }
 0x30f   : > { %v753_v6 = vpop.f32.mrb[7].mxu0  ;;  %v2799_v9 = vadd.f32 %v751_v2, %v2769_v31  ;;  %v801_v10 = vpop.f32.mrb[7].mxu1  ;;  %1900 = verf.f32 %v864_v1  ;;  %v2802_v12 = vadd.f32 %v799_v3, %v2769_v31  ;;  %v2845_v47 = vmul.f32 0.5, %v746_v59 }
 0x310   : > { %v2805_v13 = vadd.f32 %v753_v6, %v2772_v32  ;;  %v2808_v14 = vadd.f32 %v801_v10, %v2772_v32  ;;  %1902 = verf.f32 %v880_v4  ;;  %v2875_v6 = vmul.f32 0.5, %v2790_v63 }
 0x311   : > { %v1885_v11 = vpop.eup %1884  ;;  %v866_v17 = vmul.f32 0.70710677, %v2799_v9  ;;  %1904 = verf.f32 %v865_v5  ;;  %v882_v23 = vmul.f32 0.70710677, %v2802_v12  ;;  %v2872_v5 = vmul.f32 0.5, %v2787_v60 }
 0x312   : > { %v757_v18 = vpop.f32.mrb[8].mxu0  ;;  %v805_v19 = vpop.f32.mrb[8].mxu1  ;;  %1906 = verf.f32 %v881_v8  ;;  %v867_v28 = vmul.f32 0.70710677, %v2805_v13  ;;  %v924_v33 = vadd.f32 1.0, %v1885_v11  ;;  %v2888_v63 = vmul.f32 0.5, %v2802_v12 }
 0x313   : > { %v1887_v20 = vpop.eup %1886  ;;  %v759_v24 = vpop.f32.mrb[9].mxu0  ;;  %v883_v35 = vmul.f32 0.70710677, %v2808_v14  ;;  %v2825_v36 = vadd.f32 %v757_v18, %v2769_v31  ;;  %v2828_v37 = vadd.f32 %v805_v19, %v2769_v31  ;;  %1908 = verf.f32 %v866_v17 }
 0x314   : > { %v807_v25 = vpop.f32.mrb[9].mxu1  ;;  %v2821_v34 = vpop.eup %1888  ;;  %v2831_v38 = vadd.f32 %v759_v24, %v2772_v32  ;;  %v925_v44 = vadd.f32 1.0, %v1887_v20  ;;  %1910 = verf.f32 %v882_v23  ;;  %v2850_v55 = vmul.f32 %v924_v33, %v828_v7 }
 0x315   : > { %v2833_v39 = vpop.eup %1890  ;;  %v2838_v41 = vadd.f32 %v807_v25, %v2772_v32  ;;  %v868_v48 = vmul.f32 0.70710677, %v2825_v36  ;;  %1912 = verf.f32 %v867_v28  ;;  %v884_v53 = vmul.f32 0.70710677, %v2828_v37 }
 0x316   : > { %v763_v42 = vpop.f32.mrb[10].mxu0  ;;  %v811_v43 = vpop.f32.mrb[10].mxu1  ;;  %v869_v54 = vmul.f32 0.70710677, %v2831_v38  ;;  %1914 = verf.f32 %v883_v35  ;;  %v2867_v1 = vmul.f32 %v925_v44, %v829_v16  ;;  %v2881_v16 = vmul.f32 0.5, %v2793_v0 }
 0x317   : > { %v2840_v45 = vpop.eup %1892  ;;  %v765_v49 = vpop.f32.mrb[11].mxu0  ;;  %v885_v52 = vmul.f32 0.70710677, %v2838_v41  ;;  %v2856_v57 = vadd.f32 %v763_v42, %v2769_v31  ;;  %v2859_v58 = vadd.f32 %v811_v43, %v2769_v31  ;;  %1916 = verf.f32 %v868_v48 }
 0x318   : > { %v813_v50 = vpop.f32.mrb[11].mxu1  ;;  %v1895_v51 = vpop.eup %1894  ;;  %v2862_v61 = vadd.f32 %v765_v49, %v2772_v32  ;;  %1918 = verf.f32 %v884_v53  ;;  %v2884_v17 = vmul.f32 0.5, %v2799_v9  ;;  %v988_v20 = vadd.f32 %v2867_v1, %v2850_v55 }
 0x319   : > { %v2852_v56 = vpop.eup %1896  ;;  %v2865_v62 = vadd.f32 %v813_v50, %v2772_v32  ;;  %v870_v7 = vmul.f32 0.70710677, %v2856_v57  ;;  %1920 = verf.f32 %v869_v54  ;;  %v886_v60 = vmul.f32 0.70710677, %v2859_v58 }
 0x31a   : > { %v1899_v59 = vpop.eup %1898  ;;  %v769_v2 = vpop.f32.mrb[12].mxu0  ;;  %1922 = verf.f32 %v885_v52  ;;  %v871_v19 = vmul.f32 0.70710677, %v2862_v61  ;;  %989 = vadd.xlane.f32.xlu0 %v988_v20  ;;  %v942_v35 = vadd.f32 1.0, %v1895_v51  ;;  %v2909_v49 = vmul.f32 0.5, %v2805_v13 }
 0x31b   : > { %v817_v3 = vpop.f32.mrb[12].mxu1  ;;  %v2869_v4 = vpop.eup %1900  ;;  %v887_v0 = vmul.f32 0.70710677, %v2865_v62  ;;  %v2897_v9 = vadd.f32 %v769_v2, %v2769_v31  ;;  %1924 = verf.f32 %v870_v7  ;;  %v943_v42 = vadd.f32 1.0, %v1899_v59 }
 0x31c   : > { %v771_v8 = vpop.f32.mrb[13].mxu0  ;;  %v819_v10 = vpop.f32.mrb[13].mxu1  ;;  %v2900_v24 = vadd.f32 %v817_v3, %v2769_v31  ;;  %v2912_v50 = vmul.f32 0.5, %v2808_v14  ;;  %1926 = verf.f32 %v886_v60  ;;  %v2916_v52 = vmul.f32 0.5, %v2825_v36 }
 0x31d   : > { %v2878_v11 = vpop.eup %1902  ;;  %v2903_v25 = vadd.f32 %v771_v8, %v2772_v32  ;;  %v2906_v33 = vadd.f32 %v819_v10, %v2772_v32  ;;  %v872_v53 = vmul.f32 0.70710677, %v2897_v9  ;;  %1928 = verf.f32 %v871_v19 }
 0x31e   : > { %v1905_v18 = vpop.eup %1904  ;;  %v775_v12 = vpop.f32.mrb[14].mxu0  ;;  %v888_v51 = vmul.f32 0.70710677, %v2900_v24  ;;  %1930 = verf.f32 %v887_v0  ;;  %v2922_v3 = vmul.f32 %v942_v35, %v2818_v26  ;;  %v2925_v14 = vmul.f32 %v943_v42, %v2843_v46 }
 0x31f   : > { %v2893_v23 = vpop.eup %1906  ;;  %v823_v28 = vpop.f32.mrb[14].mxu1  ;;  %v873_v59 = vmul.f32 0.70710677, %v2903_v25  ;;  %v889_v13 = vmul.f32 0.70710677, %v2906_v33  ;;  %1932 = verf.f32 %v872_v53  ;;  %v940_v36 = vadd.f32 1.0, %v2821_v34 }
 0x320   : > { %v777_v43 = vpop.f32.mrb[15].mxu0  ;;  %v825_v44 = vpop.f32.mrb[15].mxu1  ;;  %v941_v8 = vadd.f32 1.0, %v2833_v39  ;;  %v2930_v10 = vadd.f32 %v775_v12, %v2769_v31  ;;  %1934 = verf.f32 %v888_v51  ;;  %v1015_v19 = vadd.f32 %v2925_v14, %v2922_v3 }
 0x321   : > { %v1909_v48 = vpop.eup %1908  ;;  %v2935_v26 = vadd.f32 %v823_v28, %v2769_v31  ;;  %v2938_v46 = vadd.f32 %v777_v43, %v2772_v32  ;;  %v837_v0 = vmul.f32 0.5, %v2831_v38  ;;  %1936 = verf.f32 %v873_v59 }
 0x322   : > { %v1911_v54 = vpop.eup %1910  ;;  %v2942_v34 = vmul.f32 %v940_v36, %v2810_v15  ;;  %v2945_v39 = vmul.f32 %v941_v8, %v2813_v21  ;;  %v838_v35 = vmul.f32 0.5, %v2856_v57  ;;  %1938 = verf.f32 %v889_v13  ;;  %1016 = vadd.xlane.f32.xlu1 %v1015_v19 }
 0x323   : > { %v1913_v2 = vpop.eup %1912  ;;  %v874_v31 = vmul.f32 0.70710677, %v2930_v10  ;;  %v890_v28 = vmul.f32 0.70710677, %v2935_v26  ;;  %v875_v43 = vmul.f32 0.70710677, %v2938_v46  ;;  %v2954_v15 = vadd.f32 %v825_v44, %v2772_v32 }
 0x324   : > { %v1915_v7 = vpop.eup %1914  ;;  %v1012_v38 = vadd.f32 %v2945_v39, %v2942_v34  ;;  %v928_v21 = vadd.f32 1.0, %v2869_v4  ;;  %v929_v53 = vadd.f32 1.0, %v1905_v18  ;;  %v926_v57 = vadd.f32 1.0, %v2840_v45 }
 0x325   : > { %v1917_v60 = vpop.eup %1916  ;;  %1940 = verf.f32 %v874_v31  ;;  %v927_v51 = vadd.f32 1.0, %v2852_v56  ;;  %v839_v13 = vmul.f32 0.5, %v2862_v61  ;;  %v891_v36 = vmul.f32 0.70710677, %v2954_v15 }
 0x326   : > { %v1919_v20 = vpop.eup %1918  ;;  %1013 = vadd.xlane.f32.xlu0 %v1012_v38  ;;  %1942 = verf.f32 %v890_v28  ;;  %v2962_v8 = vmul.f32 %v928_v21, %v2845_v47  ;;  %v2965_v4 = vmul.f32 %v929_v53, %v2875_v6  ;;  %v2968_v18 = vmul.f32 %v926_v57, %v2815_v22 }
 0x327   : > { %v1921_v12 = vpop.eup %1920  ;;  %1944 = verf.f32 %v875_v43  ;;  %v2971_v45 = vmul.f32 %v927_v51, %v2835_v40  ;;  %v930_v61 = vadd.f32 1.0, %v1909_v48  ;;  %v931_v44 = vadd.f32 1.0, %v1913_v2 }
 0x328   : > { %v1923_v42 = vpop.eup %1922  ;;  %1946 = verf.f32 %v891_v36  ;;  %v944_v19 = vadd.f32 1.0, %v2878_v11  ;;  %v994_v47 = vadd.f32 %v2965_v4, %v2962_v8  ;;  %v945_v28 = vadd.f32 1.0, %v2893_v23 }
 0x329   : > { %v1925_v59 = vpop.eup %1924  ;;  %v991_v6 = vadd.f32 %v2971_v45, %v2968_v18  ;;  %v946_v22 = vadd.f32 1.0, %v1911_v54  ;;  %v2980_v40 = vmul.f32 %v930_v61, %v2884_v17  ;;  %v2983_v43 = vmul.f32 %v931_v44, %v2909_v49 }
 0x32a   : > { %v1927_v32 = vpop.eup %1926  ;;  %v2986_v48 = vmul.f32 %v944_v19, %v2872_v5  ;;  %v947_v11 = vadd.f32 1.0, %v1915_v7  ;;  %995 = vadd.xlane.f32.xlu1 %v994_v47  ;;  %v2989_v21 = vmul.f32 %v945_v28, %v2881_v16  ;;  %v932_v54 = vadd.f32 1.0, %v1917_v60 }
 0x32b   : > { %v1929_v56 = vpop.eup %1928  ;;  %992 = vadd.xlane.f32.xlu0 %v991_v6  ;;  %v2992_v23 = vmul.f32 %v946_v22, %v2888_v63  ;;  %v933_v53 = vadd.f32 1.0, %v1921_v12  ;;  %v997_v49 = vadd.f32 %v2983_v43, %v2980_v40  ;;  %v934_v5 = vadd.f32 1.0, %v1925_v59 }
 0x32c   : > { %v1931_v31 = vpop.eup %1930  ;;  %v2997_v57 = vmul.f32 %v947_v11, %v2912_v50  ;;  %v935_v7 = vadd.f32 1.0, %v1929_v56  ;;  %v1018_v36 = vadd.f32 %v2989_v21, %v2986_v48  ;;  %v3002_v16 = vmul.f32 %v932_v54, %v2916_v52 }
 0x32d   : > { %v1933_v38 = vpop.eup %1932  ;;  %v3004_v63 = vmul.f32 %v933_v53, %v837_v0  ;;  %v948_v60 = vadd.f32 1.0, %v1919_v20  ;;  %v3006_v12 = vmul.f32 %v934_v5, %v838_v35  ;;  %v949_v44 = vadd.f32 1.0, %v1923_v42 }
 0x32e   : > { %v1935_v2 = vpop.eup %1934  ;;  %v3008_v61 = vmul.f32 %v935_v7, %v839_v13  ;;  %v852_v50 = vmul.f32 0.5, %v2828_v37  ;;  %v853_v59 = vmul.f32 0.5, %v2838_v41  ;;  %v840_v56 = vmul.f32 0.5, %v2897_v9  ;;  %998 = vadd.xlane.f32.xlu1 %v997_v49 }
 0x32f   : > { %v1937_v17 = vpop.eup %1936  ;;  %1019 = vadd.xlane.f32.xlu0 %v1018_v36  ;;  %v1000_v52 = vadd.f32 %v3004_v63, %v3002_v16  ;;  %v950_v47 = vadd.f32 1.0, %v1927_v32  ;;  %v951_v20 = vadd.f32 1.0, %v1931_v31  ;;  %v936_v35 = vadd.f32 1.0, %v1933_v38 }
 0x330   : > { %v1939_v51 = vpop.eup %1938  ;;  %v937_v6 = vadd.f32 1.0, %v1937_v17  ;;  %v841_v42 = vmul.f32 0.5, %v2903_v25  ;;  %v1021_v37 = vadd.f32 %v2997_v57, %v2992_v23  ;;  %v3018_v28 = vmul.f32 %v948_v60, %v852_v50 }
 0x331   : > { %v1941_v19 = vpop.eup %1940  ;;  %v3020_v41 = vmul.f32 %v949_v44, %v853_v59  ;;  %v854_v22 = vmul.f32 0.5, %v2859_v58  ;;  %v855_v11 = vmul.f32 0.5, %v2865_v62  ;;  %v1003_v32 = vadd.f32 %v3008_v61, %v3006_v12 }
 0x332   : > { %v1943_v0 = vpop.eup %1942  ;;  %1022 = vadd.xlane.f32.xlu1 %v1021_v37  ;;  %v3026_v31 = vmul.f32 %v936_v35, %v840_v56  ;;  %v3028_v25 = vmul.f32 %v937_v6, %v841_v42  ;;  %v938_v38 = vadd.f32 1.0, %v1941_v19  ;;  %v842_v53 = vmul.f32 0.5, %v2930_v10 }
 0x333   : > { %v1945_v13 = vpop.eup %1944  ;;  %1001 = vadd.xlane.f32.xlu0 %v1000_v52  ;;  %v3031_v17 = vmul.f32 %v950_v47, %v854_v22  ;;  %v3033_v49 = vmul.f32 %v951_v20, %v855_v11  ;;  %v843_v58 = vmul.f32 0.5, %v2938_v46  ;;  %v1024_v62 = vadd.f32 %v3020_v41, %v3018_v28 }
 0x334   : > { %v1947_v9 = vpop.eup %1946  ;;  %v939_v54 = vadd.f32 1.0, %v1945_v13  ;;  %v952_v5 = vadd.f32 1.0, %v1935_v2  ;;  %v953_v7 = vadd.f32 1.0, %v1939_v51  ;;  %v856_v36 = vmul.f32 0.5, %v2900_v24 }
 0x335   : > { %v857_v60 = vmul.f32 0.5, %v2906_v33  ;;  %v1006_v10 = vadd.f32 %v3028_v25, %v3026_v31  ;;  %v3042_v44 = vmul.f32 %v938_v38, %v842_v53  ;;  %v1027_v46 = vadd.f32 %v3033_v49, %v3031_v17 }
 0x336   : > { %1004 = vadd.xlane.f32.xlu1 %v1003_v32  ;;  %v3044_v19 = vmul.f32 %v939_v54, %v843_v58  ;;  %v3048_v50 = vmul.f32 %v952_v5, %v856_v36  ;;  %v954_v51 = vadd.f32 1.0, %v1943_v0  ;;  %v955_v24 = vadd.f32 1.0, %v1947_v9 }
 0x337   : > { %1025 = vadd.xlane.f32.xlu0 %v1024_v62  ;;  %v3050_v2 = vmul.f32 %v953_v7, %v857_v60  ;;  %v858_v33 = vmul.f32 0.5, %v2935_v26  ;;  %v859_v59 = vmul.f32 0.5, %v2954_v15 }
 0x338   : > { %v1009_v56 = vadd.f32 %v3044_v19, %v3042_v44 }
 0x339   : > { %v1030_v52 = vadd.f32 %v3050_v2, %v3048_v50  ;;  %v3058_v47 = vmul.f32 %v954_v51, %v858_v33  ;;  %v3060_v20 = vmul.f32 %v955_v24, %v859_v59 }
 0x33a   : > { %1028 = vadd.xlane.f32.xlu1 %v1027_v46 }
 0x33b   : > { %1007 = vadd.xlane.f32.xlu0 %v1006_v10  ;;  %v1033_v0 = vadd.f32 %v3060_v20, %v3058_v47 }
 0x33e   : > { %1010 = vadd.xlane.f32.xlu1 %v1009_v56 }
 0x33f   : > { %1031 = vadd.xlane.f32.xlu0 %v1030_v52 }
 0x342   : > { %1034 = vadd.xlane.f32.xlu1 %v1033_v0 }
 0x3a7   : > { %v990_v26 = vpop.xlane.xlu0 %989 }
 0x3a8   : > { %v1037_v15 = vmul.f32 0.00390625, %v990_v26 }
 0x3aa   : > { %v3065_v35 = vsub.f32 %v2850_v55, %v1037_v15  ;;  %v3068_v6 = vsub.f32 %v2867_v1, %v1037_v15 }
 0x3ac   : > { %v1085_v13 = vmul.f32 %v3065_v35, %v3065_v35  ;;  %v1086_v42 = vmul.f32 %v3068_v6, %v3068_v6 }
 0x3ae   : > { %v1117_v37 = vadd.f32 %v1086_v42, %v1085_v13 }
 0x3af   : > { %v1017_v9 = vpop.xlane.xlu1 %1016 }
 0x3b0   : > { %1118 = vadd.xlane.f32.xlu0 %v1117_v37  ;;  %v1046_v38 = vmul.f32 0.00390625, %v1017_v9 }
 0x3b2   : > { %v3097_v10 = vsub.f32 %v2922_v3, %v1046_v38  ;;  %v3100_v46 = vsub.f32 %v2925_v14, %v1046_v38 }
 0x3b3   : > { %v1014_v22 = vpop.xlane.xlu0 %1013 }
 0x3b4   : > { %v1045_v11 = vmul.f32 0.00390625, %v1014_v22  ;;  %v1103_v42 = vmul.f32 %v3097_v10, %v3097_v10 }
 0x3b6   : > { %v3075_v32 = vsub.f32 %v2942_v34, %v1045_v11  ;;  %v3078_v55 = vsub.f32 %v2945_v39, %v1045_v11 }
 0x3b7   : > { %v996_v1 = vpop.xlane.xlu1 %995 }
 0x3b8   : > { %v993_v54 = vpop.xlane.xlu0 %992  ;;  %v1101_v53 = vmul.f32 %v3075_v32, %v3075_v32  ;;  %v1102_v58 = vmul.f32 %v3078_v55, %v3078_v55  ;;  %v1039_v62 = vmul.f32 0.00390625, %v996_v1 }
 0x3b9   : > { %v1038_v5 = vmul.f32 0.00390625, %v993_v54 }
 0x3ba   : > { %v1141_v7 = vadd.f32 %v1102_v58, %v1101_v53  ;;  %v3085_v36 = vsub.f32 %v2962_v8, %v1039_v62  ;;  %v3088_v34 = vsub.f32 %v2965_v4, %v1039_v62 }
 0x3bb   : > { %v3091_v39 = vsub.f32 %v2968_v18, %v1038_v5  ;;  %v3094_v60 = vsub.f32 %v2971_v45, %v1038_v5  ;;  %v999_v51 = vpop.xlane.xlu1 %998 }
 0x3bc   : > { %v1020_v24 = vpop.xlane.xlu0 %1019  ;;  %1142 = vadd.xlane.f32.xlu0 %v1141_v7  ;;  %v1040_v8 = vmul.f32 0.00390625, %v999_v51  ;;  %v1089_v4 = vmul.f32 %v3085_v36, %v3085_v36  ;;  %v1090_v18 = vmul.f32 %v3088_v34, %v3088_v34 }
 0x3bd   : > { %v1047_v33 = vmul.f32 0.00390625, %v1020_v24  ;;  %v1087_v45 = vmul.f32 %v3091_v39, %v3091_v39  ;;  %v1088_v3 = vmul.f32 %v3094_v60, %v3094_v60 }
 0x3be   : > { %v3111_v14 = vsub.f32 %v2980_v40, %v1040_v8  ;;  %v3114_v59 = vsub.f32 %v2983_v43, %v1040_v8  ;;  %v1123_v15 = vadd.f32 %v1090_v18, %v1089_v4  ;;  %v1104_v40 = vmul.f32 %v3100_v46, %v3100_v46 }
 0x3bf   : > { %v3117_v56 = vsub.f32 %v2986_v48, %v1047_v33  ;;  %v3120_v52 = vsub.f32 %v2989_v21, %v1047_v33  ;;  %v1023_v0 = vpop.xlane.xlu1 %1022  ;;  %v1120_v13 = vadd.f32 %v1088_v3, %v1087_v45 }
 0x3c0   : > { %v1002_v26 = vpop.xlane.xlu0 %1001  ;;  %v1048_v37 = vmul.f32 0.00390625, %v1023_v0  ;;  %1124 = vadd.xlane.f32.xlu0 %v1123_v15  ;;  %v1091_v21 = vmul.f32 %v3111_v14, %v3111_v14  ;;  %v1092_v1 = vmul.f32 %v3114_v59, %v3114_v59  ;;  %v1144_v62 = vadd.f32 %v1104_v40, %v1103_v42 }
 0x3c1   : > { %v1041_v9 = vmul.f32 0.00390625, %v1002_v26  ;;  %v1105_v43 = vmul.f32 %v3117_v56, %v3117_v56  ;;  %v1106_v48 = vmul.f32 %v3120_v52, %v3120_v52  ;;  %1121 = vadd.xlane.f32.xlu1 %v1120_v13 }
 0x3c2   : > { %v3133_v22 = vsub.f32 %v2992_v23, %v1048_v37  ;;  %v3144_v54 = vsub.f32 %v2997_v57, %v1048_v37  ;;  %v1126_v24 = vadd.f32 %v1092_v1, %v1091_v21 }
 0x3c3   : > { %v3136_v11 = vsub.f32 %v3002_v16, %v1041_v9  ;;  %v3139_v38 = vsub.f32 %v3004_v63, %v1041_v9  ;;  %v1005_v53 = vpop.xlane.xlu1 %1004  ;;  %v1147_v5 = vadd.f32 %v1106_v48, %v1105_v43 }
 0x3c4   : > { %v1026_v58 = vpop.xlane.xlu0 %1025  ;;  %v1042_v7 = vmul.f32 0.00390625, %v1005_v53  ;;  %v1107_v8 = vmul.f32 %v3133_v22, %v3133_v22 }
 0x3c5   : > { %v1049_v51 = vmul.f32 0.00390625, %v1026_v58  ;;  %v1093_v23 = vmul.f32 %v3136_v11, %v3136_v11  ;;  %v1094_v16 = vmul.f32 %v3139_v38, %v3139_v38  ;;  %1145 = vadd.xlane.f32.xlu1 %v1144_v62  ;;  %1148 = vadd.xlane.f32.xlu0 %v1147_v5 }
 0x3c6   : > { %v3159_v33 = vsub.f32 %v3006_v12, %v1042_v7  ;;  %v3162_v4 = vsub.f32 %v3008_v61, %v1042_v7 }
 0x3c7   : > { %v3151_v63 = vsub.f32 %v3018_v28, %v1049_v51  ;;  %v3154_v57 = vsub.f32 %v3020_v41, %v1049_v51  ;;  %v1029_v18 = vpop.xlane.xlu1 %1028  ;;  %v1129_v3 = vadd.f32 %v1094_v16, %v1093_v23  ;;  %v1108_v28 = vmul.f32 %v3144_v54, %v3144_v54 }
 0x3c8   : > { %v1008_v45 = vpop.xlane.xlu0 %1007  ;;  %v1050_v0 = vmul.f32 0.00390625, %v1029_v18  ;;  %v1095_v48 = vmul.f32 %v3159_v33, %v3159_v33 }
 0x3c9   : > { %v1043_v26 = vmul.f32 0.00390625, %v1008_v45  ;;  %v1109_v41 = vmul.f32 %v3151_v63, %v3151_v63  ;;  %v1110_v15 = vmul.f32 %v3154_v57, %v3154_v57  ;;  %1127 = vadd.xlane.f32.xlu1 %v1126_v24  ;;  %1130 = vadd.xlane.f32.xlu0 %v1129_v3  ;;  %v1150_v9 = vadd.f32 %v1108_v28, %v1107_v8 }
 0x3ca   : > { %v3171_v12 = vsub.f32 %v3031_v17, %v1050_v0  ;;  %v3174_v61 = vsub.f32 %v3033_v49, %v1050_v0  ;;  %v1096_v17 = vmul.f32 %v3162_v4, %v3162_v4 }
 0x3cb   : > { %v3177_v13 = vsub.f32 %v3026_v31, %v1043_v26  ;;  %v3180_v42 = vsub.f32 %v3028_v25, %v1043_v26  ;;  %v1011_v40 = vpop.xlane.xlu1 %1010  ;;  %v1153_v43 = vadd.f32 %v1110_v15, %v1109_v41 }
 0x3cc   : > { %v1032_v37 = vpop.xlane.xlu0 %1031  ;;  %v1044_v21 = vmul.f32 0.00390625, %v1011_v40  ;;  %v1111_v58 = vmul.f32 %v3171_v12, %v3171_v12  ;;  %v1112_v62 = vmul.f32 %v3174_v61, %v3174_v61  ;;  %v1132_v23 = vadd.f32 %v1096_v17, %v1095_v48 }
 0x3cd   : > { %v1051_v1 = vmul.f32 0.00390625, %v1032_v37  ;;  %v1097_v49 = vmul.f32 %v3177_v13, %v3177_v13  ;;  %v1098_v31 = vmul.f32 %v3180_v42, %v3180_v42  ;;  %1151 = vadd.xlane.f32.xlu1 %v1150_v9  ;;  %1154 = vadd.xlane.f32.xlu0 %v1153_v43  ;;  %v1247_v40 = vsub.s32 1, %v2755_v27 }
 0x3ce   : > { %v3201_v5 = vsub.f32 %v3042_v44, %v1044_v21  ;;  %v3204_v7 = vsub.f32 %v3044_v19, %v1044_v21  ;;  %v1156_v8 = vadd.f32 %v1112_v62, %v1111_v58  ;;  %v1287_v43 = vsub.s32 2, %v2755_v27 }
 0x3cf   : > { %v3191_v25 = vsub.f32 %v3048_v50, %v1051_v1  ;;  %v3194_v53 = vsub.f32 %v3050_v2, %v1051_v1  ;;  %v1035_v51 = vpop.xlane.xlu1 %1034  ;;  %v1135_v16 = vadd.f32 %v1098_v31, %v1097_v49  ;;  %v3227_v17 = vrot.slane %v2761_v29, %v1247_v40 }
 0x3d0   : > { %v1052_v50 = vmul.f32 0.00390625, %v1035_v51  ;;  %v1099_v45 = vmul.f32 %v3201_v5, %v3201_v5  ;;  %v1100_v3 = vmul.f32 %v3204_v7, %v3204_v7  ;;  %v3230_v21 = vrot.slane %v2766_v30, %v1247_v40 }
 0x3d1   : > { %v1113_v2 = vmul.f32 %v3191_v25, %v3191_v25  ;;  %v1114_v24 = vmul.f32 %v3194_v53, %v3194_v53  ;;  %1133 = vadd.xlane.f32.xlu1 %v1132_v23  ;;  %1136 = vadd.xlane.f32.xlu0 %v1135_v16  ;;  %v3233_v49 = vrot.slane %v2761_v29, %v1287_v43 }
 0x3d2   : > { %v3211_v44 = vsub.f32 %v3058_v47, %v1052_v50  ;;  %v3214_v19 = vsub.f32 %v3060_v20, %v1052_v50  ;;  %v1138_v28 = vadd.f32 %v1100_v3, %v1099_v45  ;;  %v3236_v31 = vrot.slane %v2766_v30, %v1287_v43 }
 0x3d3   : > { %v1159_v18 = vadd.f32 %v1114_v24, %v1113_v2 }
 0x3d4   : > { %v1115_v0 = vmul.f32 %v3211_v44, %v3211_v44  ;;  %v1116_v26 = vmul.f32 %v3214_v19, %v3214_v19 }
 0x3d5   : > { %1157 = vadd.xlane.f32.xlu1 %v1156_v8  ;;  %1160 = vadd.xlane.f32.xlu0 %v1159_v18 }
 0x3d6   : > { %v1162_v47 = vadd.f32 %v1116_v26, %v1115_v0 }
 0x3d9   : > { %1139 = vadd.xlane.f32.xlu1 %v1138_v28 }
 0x3dd   : > { %1163 = vadd.xlane.f32.xlu1 %v1162_v47 }
 0x43d   : > { %v1119_v20 = vpop.xlane.xlu0 %1118 }
 0x43e   : > { %v1165_v41 = vmul.f32 0.00390625, %v1119_v20 }
 0x440   : > { %v1181_v15 = vadd.f32 1e-05, %v1165_v41 }
 0x442   : > { %1948 = vrsqrt.f32 %v1181_v15 }
 0x449   : > { %v1143_v37 = vpop.xlane.xlu0 %1142 }
 0x44a   : > { %v1173_v9 = vmul.f32 0.00390625, %v1143_v37 }
 0x44c   : > { %v1189_v48 = vadd.f32 1e-05, %v1173_v9  ;;  %v1949_v1 = vpop.eup %1948 }
 0x44d   : > { %v1213_v58 = vmul.f32 %v1949_v1, %v3065_v35  ;;  %v1214_v62 = vmul.f32 %v1949_v1, %v3068_v6  ;;  %v1125_v51 = vpop.xlane.xlu0 %1124 }
 0x44e   : > { %1950 = vrsqrt.f32 %v1189_v48  ;;  %v1122_v27 = vpop.xlane.xlu1 %1121  ;;  %v1167_v16 = vmul.f32 0.00390625, %v1125_v51 }
 0x44f   : > { %v1166_v23 = vmul.f32 0.00390625, %v1122_v27  ;;  %v1253_v50 = vmul.f32 %v3227_v17, %v1213_v58  ;;  %v1254_v2 = vmul.f32 %v3230_v21, %v1214_v62 }
 0x450   : > { %v1183_v29 = vadd.f32 1e-05, %v1167_v16 }
 0x451   : > { %v1182_v24 = vadd.f32 1e-05, %v1166_v23  ;;  %v1293_v8 = vadd.f32 %v3233_v49, %v1253_v50  ;;  %v1294_v30 = vadd.f32 %v3236_v31, %v1254_v2 }
 0x452   : > { %v1146_v18 = vpop.xlane.xlu1 %1145  ;;  %v1149_v35 = vpop.xlane.xlu0 %1148 }
 0x453   : > { %1952 = vrsqrt.f32 %v1182_v24  ;;  %v1174_v6 = vmul.f32 0.00390625, %v1146_v18  ;;  %v1175_v45 = vmul.f32 0.00390625, %v1149_v35  ;;  %1325 = vst [vmem:[%s2701_s28] sm:$0xff] %v1293_v8  ;;  %1326 = vst [vmem:[%s2701_s28 + $0x8] sm:$0xff] %v1294_v30 }
 0x454   : > { %1954 = vrsqrt.f32 %v1183_v29 }
 0x455   : > { %v1190_v3 = vadd.f32 1e-05, %v1174_v6  ;;  %v1191_v28 = vadd.f32 1e-05, %v1175_v45 }
 0x456   : > { %v1128_v0 = vpop.xlane.xlu1 %1127  ;;  %v1131_v26 = vpop.xlane.xlu0 %1130 }
 0x457   : > { %1956 = vrsqrt.f32 %v1190_v3  ;;  %v1168_v20 = vmul.f32 0.00390625, %v1128_v0  ;;  %v1169_v41 = vmul.f32 0.00390625, %v1131_v26 }
 0x458   : > { %v1951_v47 = vpop.eup %1950  ;;  %1958 = vrsqrt.f32 %v1191_v28 }
 0x459   : > { %v1229_v15 = vmul.f32 %v1951_v47, %v3075_v32  ;;  %v1230_v40 = vmul.f32 %v1951_v47, %v3078_v55  ;;  %v1184_v37 = vadd.f32 1e-05, %v1168_v20  ;;  %v1185_v9 = vadd.f32 1e-05, %v1169_v41 }
 0x45a   : > { %v1152_v1 = vpop.xlane.xlu1 %1151  ;;  %v1155_v58 = vpop.xlane.xlu0 %1154 }
 0x45b   : > { %v1269_v43 = vmul.f32 %v3227_v17, %v1229_v15  ;;  %v1270_v48 = vmul.f32 %v3230_v21, %v1230_v40  ;;  %1960 = vrsqrt.f32 %v1184_v37  ;;  %v1176_v62 = vmul.f32 0.00390625, %v1152_v1 }
 0x45c   : > { %v1177_v27 = vmul.f32 0.00390625, %v1155_v58  ;;  %1962 = vrsqrt.f32 %v1185_v9 }
 0x45d   : > { %v1309_v51 = vadd.f32 %v3233_v49, %v1269_v43  ;;  %v1310_v32 = vadd.f32 %v3236_v31, %v1270_v48  ;;  %v1953_v55 = vpop.eup %1952  ;;  %v1192_v23 = vadd.f32 1e-05, %v1176_v62 }
 0x45e   : > { %v1193_v16 = vadd.f32 1e-05, %v1177_v27  ;;  %v1955_v50 = vpop.eup %1954  ;;  %v1215_v2 = vmul.f32 %v1953_v55, %v3091_v39  ;;  %v1216_v24 = vmul.f32 %v1953_v55, %v3094_v60  ;;  %v1134_v29 = vpop.xlane.xlu1 %1133 }
 0x45f   : > { %1341 = vst [vmem:[%s2701_s28 + $0x80] sm:$0xff] %v1309_v51  ;;  %1342 = vst [vmem:[%s2701_s28 + $0x88] sm:$0xff] %v1310_v32  ;;  %v1137_v8 = vpop.xlane.xlu0 %1136  ;;  %v1217_v30 = vmul.f32 %v1955_v50, %v3085_v36  ;;  %v1218_v18 = vmul.f32 %v1955_v50, %v3088_v34  ;;  %1964 = vrsqrt.f32 %v1192_v23  ;;  %v1170_v35 = vmul.f32 0.00390625, %v1134_v29 }
 0x460   : > { %v1255_v6 = vmul.f32 %v3227_v17, %v1215_v2  ;;  %v1256_v45 = vmul.f32 %v3230_v21, %v1216_v24  ;;  %1966 = vrsqrt.f32 %v1193_v16  ;;  %v1171_v3 = vmul.f32 0.00390625, %v1137_v8 }
 0x461   : > { %v1957_v28 = vpop.eup %1956  ;;  %v1257_v39 = vmul.f32 %v3227_v17, %v1217_v30  ;;  %v1258_v60 = vmul.f32 %v3230_v21, %v1218_v18  ;;  %v1186_v0 = vadd.f32 1e-05, %v1170_v35 }
 0x462   : > { %v1959_v26 = vpop.eup %1958  ;;  %v1295_v36 = vadd.f32 %v3233_v49, %v1255_v6  ;;  %v1296_v34 = vadd.f32 %v3236_v31, %v1256_v45  ;;  %v1231_v47 = vmul.f32 %v1957_v28, %v3097_v10  ;;  %v1232_v20 = vmul.f32 %v1957_v28, %v3100_v46  ;;  %v1158_v41 = vpop.xlane.xlu1 %1157 }
 0x463   : > { %v1161_v15 = vpop.xlane.xlu0 %1160  ;;  %v1297_v40 = vadd.f32 %v3233_v49, %v1257_v39  ;;  %v1298_v37 = vadd.f32 %v3236_v31, %v1258_v60  ;;  %v1233_v9 = vmul.f32 %v1959_v26, %v3117_v56  ;;  %v1234_v43 = vmul.f32 %v1959_v26, %v3120_v52 }
 0x464   : > { %1327 = vst [vmem:[%s2701_s28 + $0x10] sm:$0xff] %v1295_v36  ;;  %1328 = vst [vmem:[%s2701_s28 + $0x18] sm:$0xff] %v1296_v34  ;;  %v1271_v48 = vmul.f32 %v3227_v17, %v1231_v47  ;;  %v1272_v1 = vmul.f32 %v3230_v21, %v1232_v20  ;;  %1968 = vrsqrt.f32 %v1186_v0  ;;  %v1187_v10 = vadd.f32 1e-05, %v1171_v3 }
 0x465   : > { %v1961_v58 = vpop.eup %1960  ;;  %1329 = vst [vmem:[%s2701_s28 + $0x20] sm:$0xff] %v1297_v40  ;;  %1330 = vst [vmem:[%s2701_s28 + $0x28] sm:$0xff] %v1298_v37  ;;  %v1273_v46 = vmul.f32 %v3227_v17, %v1233_v9  ;;  %v1274_v62 = vmul.f32 %v3230_v21, %v1234_v43  ;;  %v1178_v56 = vmul.f32 0.00390625, %v1158_v41  ;;  %v1179_v27 = vmul.f32 0.00390625, %v1161_v15 }
 0x466   : > { %v1963_v52 = vpop.eup %1962  ;;  %v1311_v51 = vadd.f32 %v3233_v49, %v1271_v48  ;;  %v1312_v32 = vadd.f32 %v3236_v31, %v1272_v1  ;;  %v1219_v55 = vmul.f32 %v1961_v58, %v3111_v14  ;;  %v1220_v23 = vmul.f32 %v1961_v58, %v3114_v59  ;;  %v1140_v16 = vpop.xlane.xlu1 %1139 }
 0x467   : > { %v1313_v50 = vadd.f32 %v3233_v49, %v1273_v46  ;;  %v1314_v2 = vadd.f32 %v3236_v31, %v1274_v62  ;;  %v1221_v24 = vmul.f32 %v1963_v52, %v3136_v11  ;;  %v1222_v29 = vmul.f32 %v1963_v52, %v3139_v38 }
 0x468   : > { %1343 = vst [vmem:[%s2701_s28 + $0x90] sm:$0xff] %v1311_v51  ;;  %1344 = vst [vmem:[%s2701_s28 + $0x98] sm:$0xff] %v1312_v32  ;;  %v1259_v8 = vmul.f32 %v3227_v17, %v1219_v55  ;;  %v1260_v30 = vmul.f32 %v3230_v21, %v1220_v23  ;;  %1970 = vrsqrt.f32 %v1187_v10  ;;  %v1194_v18 = vadd.f32 1e-05, %v1178_v56 }
 0x469   : > { %v1965_v14 = vpop.eup %1964  ;;  %1345 = vst [vmem:[%s2701_s28 + $0xa0] sm:$0xff] %v1313_v50  ;;  %1346 = vst [vmem:[%s2701_s28 + $0xa8] sm:$0xff] %v1314_v2  ;;  %v1261_v59 = vmul.f32 %v3227_v17, %v1221_v24  ;;  %v1262_v35 = vmul.f32 %v3230_v21, %v1222_v29  ;;  %v1195_v11 = vadd.f32 1e-05, %v1179_v27  ;;  %v1172_v6 = vmul.f32 0.00390625, %v1140_v16 }
 0x46a   : > { %v1967_v38 = vpop.eup %1966  ;;  %v1299_v45 = vadd.f32 %v3233_v49, %v1259_v8  ;;  %v1300_v3 = vadd.f32 %v3236_v31, %v1260_v30  ;;  %v1235_v28 = vmul.f32 %v1965_v14, %v3133_v22  ;;  %v1236_v39 = vmul.f32 %v1965_v14, %v3144_v54  ;;  %v1164_v60 = vpop.xlane.xlu1 %1163 }
 0x46b   : > { %v1301_v0 = vadd.f32 %v3233_v49, %v1261_v59  ;;  %v1302_v26 = vadd.f32 %v3236_v31, %v1262_v35  ;;  %v1237_v36 = vmul.f32 %v1967_v38, %v3151_v63  ;;  %v1238_v34 = vmul.f32 %v1967_v38, %v3154_v57 }
 0x46c   : > { %1331 = vst [vmem:[%s2701_s28 + $0x30] sm:$0xff] %v1299_v45  ;;  %1332 = vst [vmem:[%s2701_s28 + $0x38] sm:$0xff] %v1300_v3  ;;  %v1275_v47 = vmul.f32 %v3227_v17, %v1235_v28  ;;  %v1276_v20 = vmul.f32 %v3230_v21, %v1236_v39  ;;  %1972 = vrsqrt.f32 %v1194_v18  ;;  %v1188_v22 = vadd.f32 1e-05, %v1172_v6 }
 0x46d   : > { %1333 = vst [vmem:[%s2701_s28 + $0x40] sm:$0xff] %v1301_v0  ;;  %1334 = vst [vmem:[%s2701_s28 + $0x48] sm:$0xff] %v1302_v26  ;;  %v1277_v54 = vmul.f32 %v3227_v17, %v1237_v36  ;;  %v1278_v63 = vmul.f32 %v3230_v21, %v1238_v34  ;;  %1974 = vrsqrt.f32 %v1195_v11  ;;  %v1180_v57 = vmul.f32 0.00390625, %v1164_v60 }
 0x46e   : > { %v1969_v41 = vpop.eup %1968  ;;  %v1315_v15 = vadd.f32 %v3233_v49, %v1275_v47  ;;  %v1316_v40 = vadd.f32 %v3236_v31, %v1276_v20  ;;  %1976 = vrsqrt.f32 %v1188_v22 }
 0x46f   : > { %v1317_v37 = vadd.f32 %v3233_v49, %v1277_v54  ;;  %v1318_v9 = vadd.f32 %v3236_v31, %v1278_v63  ;;  %v1223_v43 = vmul.f32 %v1969_v41, %v3159_v33  ;;  %v1224_v48 = vmul.f32 %v1969_v41, %v3162_v4 }
 0x470   : > { %1347 = vst [vmem:[%s2701_s28 + $0xb0] sm:$0xff] %v1315_v15  ;;  %1348 = vst [vmem:[%s2701_s28 + $0xb8] sm:$0xff] %v1316_v40  ;;  %v1196_v1 = vadd.f32 1e-05, %v1180_v57 }
 0x471   : > { %1349 = vst [vmem:[%s2701_s28 + $0xc0] sm:$0xff] %v1317_v37  ;;  %1350 = vst [vmem:[%s2701_s28 + $0xc8] sm:$0xff] %v1318_v9  ;;  %v1263_v10 = vmul.f32 %v3227_v17, %v1223_v43  ;;  %v1264_v58 = vmul.f32 %v3230_v21, %v1224_v48 }
 0x472   : > { %v1971_v46 = vpop.eup %1970  ;;  %1978 = vrsqrt.f32 %v1196_v1 }
 0x473   : > { %v1303_v62 = vadd.f32 %v3233_v49, %v1263_v10  ;;  %v1304_v56 = vadd.f32 %v3236_v31, %v1264_v58  ;;  %v1225_v33 = vmul.f32 %v1971_v46, %v3177_v13  ;;  %v1226_v4 = vmul.f32 %v1971_v46, %v3180_v42 }
 0x475   : > { %1335 = vst [vmem:[%s2701_s28 + $0x50] sm:$0xff] %v1303_v62  ;;  %1336 = vst [vmem:[%s2701_s28 + $0x58] sm:$0xff] %v1304_v56  ;;  %v1265_v27 = vmul.f32 %v3227_v17, %v1225_v33  ;;  %v1266_v52 = vmul.f32 %v3230_v21, %v1226_v4 }
 0x476   : > { %v1973_v51 = vpop.eup %1972 }
 0x477   : > { %v1975_v32 = vpop.eup %1974  ;;  %v1305_v55 = vadd.f32 %v3233_v49, %v1265_v27  ;;  %v1306_v23 = vadd.f32 %v3236_v31, %v1266_v52  ;;  %v1239_v16 = vmul.f32 %v1973_v51, %v3171_v12  ;;  %v1240_v50 = vmul.f32 %v1973_v51, %v3174_v61 }
 0x478   : > { %v1977_v13 = vpop.eup %1976  ;;  %v1241_v2 = vmul.f32 %v1975_v32, %v3191_v25  ;;  %v1242_v42 = vmul.f32 %v1975_v32, %v3194_v53 }
 0x479   : > { %1337 = vst [vmem:[%s2701_s28 + $0x60] sm:$0xff] %v1305_v55  ;;  %1338 = vst [vmem:[%s2701_s28 + $0x68] sm:$0xff] %v1306_v23  ;;  %v1279_v24 = vmul.f32 %v3227_v17, %v1239_v16  ;;  %v1280_v29 = vmul.f32 %v3230_v21, %v1240_v50  ;;  %v1227_v8 = vmul.f32 %v1977_v13, %v3201_v5 }
 0x47a   : > { %v1228_v30 = vmul.f32 %v1977_v13, %v3204_v7  ;;  %v1281_v12 = vmul.f32 %v3227_v17, %v1241_v2  ;;  %v1282_v61 = vmul.f32 %v3230_v21, %v1242_v42 }
 0x47b   : > { %v1319_v25 = vadd.f32 %v3233_v49, %v1279_v24  ;;  %v1320_v53 = vadd.f32 %v3236_v31, %v1280_v29  ;;  %v1267_v18 = vmul.f32 %v3227_v17, %v1227_v8 }
 0x47c   : > { %v1268_v14 = vmul.f32 %v3230_v21, %v1228_v30  ;;  %v1979_v59 = vpop.eup %1978  ;;  %v1321_v5 = vadd.f32 %v3233_v49, %v1281_v12  ;;  %v1322_v7 = vadd.f32 %v3236_v31, %v1282_v61 }
 0x47d   : > { %1351 = vst [vmem:[%s2701_s28 + $0xd0] sm:$0xff] %v1319_v25  ;;  %1352 = vst [vmem:[%s2701_s28 + $0xd8] sm:$0xff] %v1320_v53  ;;  %v1307_v35 = vadd.f32 %v3233_v49, %v1267_v18  ;;  %v1243_v6 = vmul.f32 %v1979_v59, %v3211_v44  ;;  %v1244_v38 = vmul.f32 %v1979_v59, %v3214_v19 }
 0x47e   : > { %v1308_v11 = vadd.f32 %v3236_v31, %v1268_v14  ;;  %1353 = vst [vmem:[%s2701_s28 + $0xe0] sm:$0xff] %v1321_v5  ;;  %1354 = vst [vmem:[%s2701_s28 + $0xe8] sm:$0xff] %v1322_v7 }
 0x47f   : > { %1339 = vst [vmem:[%s2701_s28 + $0x70] sm:$0xff] %v1307_v35  ;;  %v1283_v45 = vmul.f32 %v3227_v17, %v1243_v6  ;;  %v1284_v3 = vmul.f32 %v3230_v21, %v1244_v38 }
 0x480   : > { %1340 = vst [vmem:[%s2701_s28 + $0x78] sm:$0xff] %v1308_v11 }
 0x481   : > { %v1323_v28 = vadd.f32 %v3233_v49, %v1283_v45  ;;  %v1324_v39 = vadd.f32 %v3236_v31, %v1284_v3 }
 0x483   : > { %1355 = vst [vmem:[%s2701_s28 + $0xf0] sm:$0xff] %v1323_v28  ;;  %1356 = vst [vmem:[%s2701_s28 + $0xf8] sm:$0xff] %v1324_v39 }
 0x484 PF: > { %s3540_s19 = sld [smem:[#allocation30_spill]]  ;;  %s3542_s25 = sld [smem:[#allocation34_spill]] }
 0x485   : > { %s3543_s13 = sld [smem:[#allocation42_spill]]  ;;  %s1372_s2 = sshll.u32 %s2701_s28, 4  ;;  %s3373_s2 = int_to_ptr.vmem [resolvable:$true] %s1372_s2 }
 0x486   : > { %s3377_s16 = scalar_lea.sflag [#allocation8], %s335_s24  ;;  %s2090_s6 = scalar_lea.vmem %s3373_s2, 4096 }
 0x487   : > { %p2091_p3 = scmp.ne.s32.totalorder %s3373_s2, %s2090_s6  ;;  %s2259_s4 = smov [#allocation12]  }
 0x488   : > { %s2094_s26 = sshll.u32 %s2259_s4, 4  ;;  %s2095_s26 = int_to_ptr.vmem [resolvable:$false] %s2094_s26 }
 0x489   : > { %s2096_s27 = scalar_lea.vmem %s2095_s26, 8192  ;;  %p2097_p13 = scmp.lt.s32.totalorder %s3373_s2, %s2095_s26 }
 0x48a   : > { %s1531_s12 = sshll.u32 %s3540_s19, 12  ;;  %p3545_p2 = scmp.ne.s32.totalorder %s3542_s25, 0 }
 0x48b   : > { %s3544_s29 = smov %s3543_s13  ;;  %s3370_s1 = scalar_lea.hbm %s3543_s13, %s1531_s12 }
 0x48c   : > { %p2092_p1 = pnand %p2091_p3, %p3545_p2  ;;  %p2098_p9 = scmp.lt.s32.totalorder %s2096_s27, %s2090_s6 }
 0x48e   : > { %p2093_p11 = pneg %p2092_p1  ;;  %p2099_p7 = por %p2098_p9, %p2097_p13 }
 0x490   : > { %p2100_p10 = pnand %p2099_p7, %p2093_p11 }
 0x492   : > { %2103 = shalt.err (!%p2100_p10)
}
 0x493   : > { %s2104_s24 = scalar_lea.hbm %s3370_s1, 4096  ;;  %s2108_s5 = scalar_lea.hbm %s3544_s29, 8192 }
 0x494   : > { %p2105_p6 = scmp.ne.s32.totalorder %s3370_s1, %s2104_s24  ;;  %p2109_p0 = scmp.lt.u32.totalorder %s3370_s1, %s3544_s29 }
 0x495   : > { %p2110_p8 = scmp.lt.u32.totalorder %s2108_s5, %s2104_s24  ;;  %p2112_p3 = scmp.lt.u32.totalorder %s2104_s24, %s3370_s1 }
 0x496   : > { %p2106_p4 = pnand %p2105_p6, %p3545_p2 }
 0x497   : > { %p2111_p12 = por %p2110_p8, %p2109_p0 }
 0x498   : > { %p2107_p5 = pneg %p2106_p4 }
 0x499   : > { %p2113_p1 = por %p2112_p3, %p2111_p12 }
 0x49b   : > { %p2114_p11 = pnand %p2113_p1, %p2107_p5 }
 0x49d   : > { %2117 = shalt.err (!%p2114_p11)
}
 0x49e   : > { %s2260_s19 = smov 256   ;;  %s2261_s0 = smov 16  }
 0x49f   : > { %1732 = dma.vmem_to_hbm [thread:$0]  (%p3545_p2), %s3373_s2, 4096, %s3370_s1, %s3377_s16, %s2260_s19, %s2260_s19, %s2261_s0  }
 0x4a0 PF: > { %s3546_s12 = sld [smem:[#allocation26_spill]]  ;;  %s3547_s8 = sld [smem:[#allocation35_spill]] }
 0x4a1   : > { %p1760_p13 = scmp.ge.s32.totalorder %s2246_s23, 2 }
 0x4a6   : > { %s1387_s20 = sand.u32 1, %s3546_s12   ;;  %p3548_p9 = scmp.ne.s32.totalorder %s3547_s8, 0 }
 0x4a7   : > { %s1388_s13 = scalar_lea.sflag [#allocation8], %s1387_s20 }
 0x4a8   : > { %p1754_p7 = pnand %p1760_p13, %p3548_p9 }
 0x4aa   : > { %2189 = dma.done.wait (!%p1754_p7), %s1388_s13, 4096  }
 0x4ab   : > { %2191 = vsyncadd (!%p1754_p7), %s1388_s13, 4294963200  ;;  %s33_s23 = sadd.s32 1, %s2246_s23   ;;  %s3550_s0 = sld [smem:[#allocation27_spill]] }
 0x4ac   : > { %p3406_p10 = scmp.ge.s32.totalorder %s33_s23, 6   ;;  %s3551_s1 = sld [smem:[#allocation28_spill]] }
 0x4ad   : > { %s3552_s12 = sld [smem:[#allocation36_spill]]  ;;  %s3553_s25 = sld [smem:[#allocation38_spill]] }
 0x4ae   : > { %s3554_s2 = sld [smem:[#allocation37_spill]]  ;;  %s3555_s4 = sld [smem:[#allocation33_spill]] }
 0x4af   : > { %s3556_s13 = smov %s2210_s14  ;;  %s3557_s14 = smov %s2214_s15 }
 0x4b0   : > { %s3558_s15 = smov %s2623_s7  ;;  %s3559_s16 = smov %s2222_s17 }
 0x4b1   : > { %s3560_s17 = smov %s2226_s18  ;;  %s3562_s19 = smov %s2238_s21 }
 0x4b2   : > { %s3563_s20 = smov %s2242_s22  ;;  %32 = sbr.rel (!%p3406_p10) target bundleno = 35 (0x23), region = 110 }
 0x4b3   : > { %s3561_s18 = smov %s3553_s25 }
 0x4b4   : > { %s3564_s21 = smov %s3554_s2  ;;  %s3565_s22 = smov %s3555_s4 }
 0x4b9   :  { %1393 = vsyncpa [#allocation7], 1 }
 0x4ba   :  { %1395 = vsyncpa [#allocation7 + $0x1], 1 }
 0x4bb   :  { %1396 = vsyncpa [#allocation10], 1 }
 0x4bc   :  { %1398 = vsyncpa [#allocation10 + $0x1], 1 }
 0x4bd   :  { %1399 = vsyncpa [#allocation8], 1 }
 0x4be   :  { %1401 = vsyncpa [#allocation8 + $0x1], 1 }

// kernel: tpu_custom_call.1
= control target key start
LH: loop header
LB: loop body
LE: loop exit
PB: predicated region body
PF: predicated region fallthrough
CT: control target
= control target key end

     0   :  { %s3453_s0 = inlined_call_operand.hbm [shape: s32[4], index: 0, kind: input, shape index: {}]   ;;  %s3454_s2 = inlined_call_operand.hbm [shape: f32[256,256], index: 2, kind: input, shape index: {}]   ;;  %s3455_s3 = inlined_call_operand.hbm [shape: f32[256,128], index: 3, kind: input, shape index: {}]   ;;  %s3456_s4 = inlined_call_operand.hbm [shape: f32[128,256], index: 4, kind: input, shape index: {}]   ;;  %s3457_s5 = inlined_call_operand.vmem [shape: f32[8,256], index: 5, kind: input, shape index: {}]   ;;  %s3458_s6 = inlined_call_operand.hbm [shape: f32[256,256], index: 6, kind: output, shape index: {}]   ;;  %s3459_s1 = inlined_call_operand.vmem [shape: s32[2], index: 1, kind: input, shape index: {}]  }
   0x1   :  { %3486 = sst [smem:[#allocation39_spill]] %s3454_s2  ;;  %s1980_s23 = scalar_lea.hbm %s3453_s0, 16 }
   0x2   :  { %3487 = sst [smem:[#allocation40_spill]] %s3456_s4  ;;  %p1981_p0 = scmp.ne.s32.totalorder %s3453_s0, %s1980_s23 }
   0x3   :  { %3488 = sst [smem:[#allocation41_spill]] %s3457_s5  ;;  %p1984_p1 = scmp.lt.u32.totalorder %s1980_s23, %s3453_s0 }
   0x4   :  { %3489 = sst [smem:[#allocation42_spill]] %s3458_s6 }
   0x5   :  { %p1986_p2 = pnand %p1984_p1, %p1981_p0 }
   0x7   :  { %1989 = shalt.err (!%p1986_p2)  }
   0x8   :  { %s2248_s28 = smov [#allocation4]   ;;  %s13_s9 = sshll.u32 %s3459_s1, 4  ;;  %s14_s9 = int_to_ptr.vmem [resolvable:$true] %s13_s9 }
   0x9   :  { %12 = dma.hbm_to_smem %s3453_s0, 16, %s2248_s28, [#allocation3] }
   0xa   :  { %s1990_s10 = scalar_lea.vmem %s14_s9, 16  ;;  %p1995_p4 = scmp.lt.s32.totalorder %s14_s9, %s14_s9 }
   0xb   :  { %p1991_p3 = scmp.ne.s32.totalorder %s14_s9, %s1990_s10  ;;  %p1996_p5 = scmp.lt.s32.totalorder %s1990_s10, %s1990_s10 }
   0xd   :  { %p1997_p6 = por %p1996_p5, %p1995_p4 }
   0xf   :  { %p1998_p7 = pnand %p1997_p6, %p1991_p3 }
  0x11   :  { %2001 = shalt.err (!%p1998_p7)  }
  0x12   :  { %s2249_s11 = smov [#allocation5]  }
  0x13   :  { %16 = dma.vmem_to_smem %s14_s9, 16, %s2249_s11, [#allocation3] }
  0x14   :  { %2174 = dma.done.wait [#allocation3], 32 }
  0x15   :  { %2175 = vsyncadd [#allocation3], 4294967264 }
  0x16   :  { %18 = sfence }
  0x17   :  { %19 = vsyncpa [#allocation7], 0 }
  0x18   :  { %21 = vsyncpa [#allocation7 + $0x1], 0 }
  0x19   :  { %22 = vsyncpa [#allocation10], 0 }
  0x1a   :  { %24 = vsyncpa [#allocation10 + $0x1], 0 }
  0x1b   :  { %25 = vsyncpa [#allocation8], 0 }
  0x1c   :  { %27 = vsyncpa [#allocation8 + $0x1], 0  ;;  %s2312_s0 = smov 0   ;;  %s2314_s1 = smov 0  }
  0x1d   :  { %s2316_s12 = smov 0   ;;  %s2318_s13 = smov 0  }
  0x1e   :  { %s2320_s14 = smov 0   ;;  %s2322_s15 = smov 0  }
  0x1f   :  { %s2324_s16 = smov 0   ;;  %s2326_s17 = smov 0  }
  0x20   :  { %s2328_s18 = smov 0   ;;  %s2330_s19 = smov 0  }
  0x21   :  { %s2332_s20 = smov 0   ;;  %s2334_s21 = smov 0  }
  0x22   :  { %s2336_s22 = smov 0   ;;  %s2338_s23 = smov 0  }
  0x23 LB: > { %3490 = sst [smem:[#allocation26_spill]] %s2194_s0  ;;  %s2379_s24 = sadd.s32 4294967295, %s2246_s23   ;;  %s2246_s23 = sphi %s2338_s23, %s33_s23   ;;  %s2242_s22 = sphi %s2336_s22, %s3565_s22   ;;  %s2238_s21 = sphi %s2334_s21, %s3564_s21   ;;  %s2234_s20 = sphi %s2332_s20, %s3563_s20   ;;  %s2230_s19 = sphi %s2330_s19, %s3562_s19   ;;  %s2226_s18 = sphi %s2328_s18, %s3561_s18   ;;  %s2222_s17 = sphi %s2326_s17, %s3560_s17   ;;  %s2218_s16 = sphi %s2324_s16, %s3559_s16   ;;  %s2214_s15 = sphi %s2322_s15, %s3558_s15   ;;  %s2210_s14 = sphi %s2320_s14, %s3557_s14   ;;  %s2206_s13 = sphi %s2318_s13, %s3556_s13   ;;  %s2202_s12 = sphi %s2316_s12, %s3552_s12   ;;  %s2198_s1 = sphi %s2314_s1, %s3551_s1   ;;  %s2194_s0 = sphi %s2312_s0, %s3550_s0  }
  0x24   : > { %3491 = sst [smem:[#allocation27_spill]] %s2198_s1  ;;  %s1491_s25 = sadd.s32 4294967294, %s2246_s23  }
  0x25   : > { %3492 = sst [smem:[#allocation28_spill]] %s2202_s12  ;;  %s3460_s26 = sadd.s32 1, %s2238_s21 }
  0x26   : > { %3493 = sst [smem:[#allocation29_spill]] %s2230_s19  ;;  %s45_s27 = sadd.s32 1, %s2242_s22 }
  0x27   : > { %3494 = sst [smem:[#allocation30_spill]] %s2234_s20  ;;  %p2386_p8 = scmp.ge.s32.totalorder %s3460_s26, 2 }
  0x28   : > { %3495 = sst [smem:[#allocation31_spill]] %s2379_s24  ;;  %p81_p9 = scmp.ne.s32.totalorder %s2222_s17, %s2218_s16 }
  0x29   : > { %s3496_s28 = scalar_select %p2386_p8, 1, 0 }
  0x2a   : > { %p3467_p10 = scmp.eq.s32.totalorder %s2379_s24, 0  ;;  %p121_p11 = scmp.ne.s32.totalorder %s2210_s14, %s2206_s13 }
  0x2b   : > { %s3567_s27 = smov (!%p2386_p8, %s45_s27), %s2242_s22  ;;  %s176_s7 = sadd.s32 1, %s2202_s12 }
  0x2c   : > { %p2398_p12 = por %p3467_p10, %p81_p9  ;;  %p2404_p13 = por %p121_p11, %p3467_p10 }
  0x2d   : > { %p47_p0 = scmp.ge.s32.totalorder %s3567_s27, 2  ;;  %p186_p1 = scmp.ne.s32.totalorder %s2202_s12, %s2198_s1 }
  0x2e   : > { %s3497_s29 = scalar_select %p2398_p12, 1, 0 }
  0x2f   : > { %s3498_s30 = scalar_select %p2404_p13, 1, 0 }
  0x30   : > { %p187_p2 = scmp.eq.s32.totalorder %s2379_s24, 3  ;;  %s3569_s27 = smov (%p47_p0, %s3567_s27), 0 }
  0x31   : > { %3499 = sst [smem:[#allocation32_spill]] %s3498_s30  ;;  %p192_p4 = scmp.ne.s32.totalorder %s2198_s1, %s2194_s0 }
  0x32   : > { %3500 = sst [smem:[#allocation33_spill]] %s3569_s27  ;;  %p2414_p3 = por %p187_p2, %p186_p1 }
  0x33   : > { %s2422_s9 = ssub.s32 %s2242_s22, %s3569_s27  ;;  %p193_p5 = scmp.eq.s32.totalorder %s1491_s25, 3 }
  0x34   : > { %s3501_s8 = scalar_select %p2414_p3, 1, 0 }
  0x35   : > { %p174_p6 = scmp.eq.s32.totalorder %s2422_s9, 0  ;;  %p1500_p7 = scmp.ge.s32.totalorder %s2246_s23, 1 }
  0x36   : > { %3502 = sst [smem:[#allocation34_spill]] %s3501_s8  ;;  %p2426_p9 = por %p193_p5, %p192_p4 }
  0x37   : > { %p200_p11 = scmp.lt.s32.totalorder %s2246_s23, 5  ;;  %s2250_s16 = smov [#allocation11]  }
  0x38   : > { %s3503_s10 = scalar_select %p2426_p9, 1, 0 }
  0x39   : > { %s2432_s11 = scalar_select %p174_p6, %s2202_s12, %s176_s7  }
  0x3a   : > { %3504 = sst [smem:[#allocation35_spill]] %s3503_s10  ;;  %p2434_p0 = pnand %p1500_p7, %p200_p11 }
  0x3b   : > { %3505 = sst [smem:[#allocation36_spill]] %s2432_s11  ;;  %s212_s26 = sshll.u32 %s2250_s16, 4  ;;  %s213_s26 = int_to_ptr.vmem [resolvable:$true] %s212_s26 }
  0x3c   : > { %s3506_s13 = scalar_select %p2434_p0, 1, 0 }
  0x3d   : > { %p1734_p1 = pneg %p2434_p0  ;;  %s3508_s4 = sld [smem:[#allocation40_spill]] }
  0x3f   : > { %p2442_p2 = pnand %p1734_p1, %p3467_p10 }
  0x41   : > { %p2004_p5 = pneg %p2442_p2 }
  0x43   : > { %s2002_s7 = scalar_lea.hbm %s3508_s4, 4096 }
  0x44   : > { %p2003_p4 = scmp.ne.s32.totalorder %s3508_s4, %s2002_s7  ;;  %p2009_p11 = scmp.lt.u32.totalorder %s2002_s7, %s3508_s4 }
  0x46   : > { %p2005_p6 = pnand %p2004_p5, %p2003_p4 }
  0x48   : > { %p2006_p7 = pneg %p2005_p6 }
  0x4a   : > { %p2011_p1 = pnand %p2009_p11, %p2006_p7 }
  0x4c   : > { %2014 = shalt.err (!%p2011_p1)
}
  0x4d   : > { %s2015_s8 = scalar_lea.vmem %s213_s26, 4096  ;;  %p2023_p13 = scmp.lt.s32.totalorder %s213_s26, %s213_s26 }
  0x4e   : > { %p2016_p10 = scmp.ne.s32.totalorder %s213_s26, %s2015_s8  ;;  %p2024_p12 = scmp.lt.s32.totalorder %s2015_s8, %s2015_s8 }
  0x50   : > { %p2018_p9 = pnand %p2016_p10, %p2004_p5  ;;  %p2025_p0 = por %p2024_p12, %p2023_p13 }
  0x52   : > { %p2019_p3 = pneg %p2018_p9 }
  0x54   : > { %p2026_p8 = pnand %p2025_p0, %p2019_p3 }
  0x56   : > { %2029 = shalt.err (!%p2026_p8)
}
  0x57   : > { %s3473_s0 = smov 256   ;;  %s2252_s6 = smov 16  }
  0x58   : > { %1737 = dma.hbm_to_vmem [thread:$0]  (!%p2442_p2), %s3508_s4, 4096, %s213_s26, [#allocation10], %s3473_s0, %s3473_s0, %s2252_s6  }
  0x59   : > { %s49_s10 = sld [smem:[#allocation5 + %s2242_s22]]  ;;  %s3509_s7 = sadd.s32 1, %s2238_s21 }
  0x5a   : > { %s56_s11 = sld [smem:[#allocation5 + %s3569_s27]]  ;;  %p3510_p8 = scmp.ne.s32.totalorder %s3496_s28, 0 }
  0x5b   : > { %p75_p10 = scmp.ne.s32.totalorder %s2226_s18, %s2222_s17  ;;  %p76_p12 = scmp.eq.s32.totalorder %s2246_s23, 0 }
  0x5c   : > { %s3571_s7 = smov (%p3510_p8, %s3509_s7), 0  ;;  %s2476_s25 = sshll.u32 %s2242_s22, 1 }
  0x5d   : > { %3511 = sst [smem:[#allocation37_spill]] %s3571_s7  ;;  %p2484_p9 = por %p76_p12, %p75_p10 }
  0x5e   : > { %s91_s26 = sld [smem:[#allocation5 + %s2242_s22]]  ;;  %p3484_p0 = scmp.lt.s32.totalorder %s2246_s23, 4 }
  0x5f   : > { %s1492_s12 = sadd.s32 4294967295, %s49_s10  ;;  %s3479_s20 = sand.u32 1, %s2226_s18  }
  0x60   : > { %p51_p13 = scmp.lt.s32.totalorder %s2238_s21, %s1492_s12  ;;  %s1494_s6 = sadd.s32 4294967295, %s56_s11 }
  0x61   : > { %p58_p3 = scmp.lt.s32.totalorder %s3571_s7, %s1494_s6  ;;  %s3513_s11 = sshll.u32 %s3569_s27, 1 }
  0x62   : > { %s52_s8 = scalar_select %p51_p13, %s2238_s21, %s1492_s12 }
  0x63   : > { %s59_s0 = scalar_select %p58_p3, %s3571_s7, %s1494_s6 }
  0x64   : > { %s54_s10 = sadd.s32 %s2476_s25, %s52_s8  ;;  %s68_s1 = sadd.s32 1, %s2226_s18 }
  0x65   : > { %s55_s16 = sld [smem:[#allocation4 + %s54_s10]]  ;;  %s61_s4 = sadd.s32 %s3513_s11, %s59_s0 }
  0x66   : > { %s62_s5 = sld [smem:[#allocation4 + %s61_s4]]  ;;  %s1496_s30 = sadd.s32 4294967295, %s91_s26 }
  0x67   : > { %s1718_s19 = scalar_select %p2484_p9, [#allocation5], [#allocation13] }
  0x68   : > { %s1503_s12 = sshll.u32 %s3479_s20, 7  ;;  %p2510_p2 = pnand %p3484_p0, %p2484_p9 }
  0x69   : > { %s1719_s6 = scalar_select %p2484_p9, %s2242_s22, 0 }
  0x6a   : > { %s3573_s19 = smov (!%p3484_p0, %s1718_s19), [#allocation17]  ;;  %p93_p5 = scmp.lt.s32.totalorder %s2238_s21, %s1496_s30 }
  0x6b   : > { %s3575_s6 = smov (!%p3484_p0, %s1719_s6), 0  ;;  %s233_s10 = scalar_lea.vmem [#allocation6], %s1503_s12 }
  0x6c   : > { %s64_s8 = ssub.s32 %s55_s16, %s62_s5  ;;  %s234_s5 = sld [smem:[%s3573_s19 + %s3575_s6]] }
  0x6d   : > { %s65_s0 = sor.u32 %s64_s8, %s2422_s9  ;;  %s1528_s16 = sshll.u32 %s2242_s22, 5 }
  0x6e   : > { %p66_p4 = scmp.eq.s32.totalorder %s65_s0, 0  ;;  %s249_s11 = sshll.u32 %s233_s10, 4  ;;  %s2527_s11 = int_to_ptr.vmem [resolvable:$true] %s249_s11 }
  0x6f   : > { %s94_s9 = scalar_select %p93_p5, %s2238_s21, %s1496_s30 }
  0x70   : > { %s2518_s26 = scalar_select %p66_p4, %s2226_s18, %s68_s1  }
  0x71   : > { %s1720_s8 = scalar_select %p2484_p9, [#allocation4], [#allocation14] }
  0x72   : > { %3515 = sst [smem:[#allocation38_spill]] %s2518_s26  ;;  %s96_s20 = sadd.s32 %s2476_s25, %s94_s9 }
  0x73   : > { %s98_s0 = sld [smem:[#allocation5 + %s3569_s27]]  ;;  %s1504_s24 = sadd.s32 4294967295, %s234_s5 }
  0x74   : > { %p236_p6 = scmp.lt.s32.totalorder %s2238_s21, %s1504_s24  ;;  %p115_p7 = scmp.ne.s32.totalorder %s2214_s15, %s2210_s14 }
  0x75   : > { %s3577_s8 = smov (!%p3484_p0, %s1720_s8), [#allocation18]  ;;  %s2547_s5 = sld [smem:[#allocation4 + %s96_s20]] }
  0x76   : > { %s237_s1 = scalar_select %p236_p6, %s2238_s21, %s1504_s24 }
  0x77   : > { %p2540_p1 = por %p115_p7, %p76_p12  ;;  %s3517_s28 = sshll.u32 %s3569_s27, 1 }
  0x78   : > { %s239_s19 = sadd.s32 %s2476_s25, %s237_s1  ;;  %s3519_s2 = sld [smem:[#allocation39_spill]] }
  0x79   : > { %s1498_s30 = sadd.s32 4294967295, %s98_s0  ;;  %s3579_s19 = smov (!%p2484_p9, %s239_s19), 0 }
  0x7a   : > { %p100_p11 = scmp.lt.s32.totalorder %s3571_s7, %s1498_s30  ;;  %s3581_s19 = smov (!%p3484_p0, %s3579_s19), 0 }
  0x7b   : > { %s240_s6 = sld [smem:[%s3577_s8 + %s3581_s19]]  ;;  %p2557_p8 = pnand %p3484_p0, %p2540_p1 }
  0x7c   : > { %s101_s24 = scalar_select %p100_p11, %s3571_s7, %s1498_s30 }
  0x7d   : > { %s3518_s0 = scalar_select %p2557_p8, 1, 0 }
  0x7e   : > { %s103_s9 = sadd.s32 %s3517_s28, %s101_s24  ;;  %s108_s30 = sadd.s32 1, %s2214_s15 }
  0x7f   : > { %s2551_s10 = sld [smem:[#allocation4 + %s103_s9]]  ;;  %s3520_s7 = sand.u32 1, %s2226_s18  }
  0x80   : > { %s1723_s1 = scalar_select %p2540_p1, [#allocation5], [#allocation15] }
  0x81   : > { %s246_s20 = sadd.s32 %s1528_s16, %s240_s6  ;;  %s2580_s26 = scalar_lea.sflag [#allocation7], %s3520_s7 }
  0x82   : > { %s3583_s1 = smov (!%p3484_p0, %s1723_s1), [#allocation19]  ;;  %s1508_s19 = sshll.u32 %s246_s20, 7 }
  0x83   : > { %s2574_s9 = scalar_lea.hbm %s3519_s2, %s1508_s19  ;;  %p2032_p12 = pneg %p2510_p2 }
  0x84   : > { %s2030_s8 = scalar_lea.hbm %s2574_s9, 2048  ;;  %s2035_s20 = scalar_lea.hbm %s3519_s2, 8192 }
  0x85   : > { %s105_s27 = ssub.s32 %s2547_s5, %s2551_s10  ;;  %p2031_p10 = scmp.ne.s32.totalorder %s2574_s9, %s2030_s8 }
  0x86   : > { %p2036_p9 = scmp.lt.u32.totalorder %s2574_s9, %s3519_s2  ;;  %p2037_p4 = scmp.lt.u32.totalorder %s2035_s20, %s2030_s8 }
  0x87   : > { %p2033_p13 = pnand %p2032_p12, %p2031_p10  ;;  %p2039_p6 = scmp.lt.u32.totalorder %s2030_s8, %s2574_s9 }
  0x88   : > { %p2038_p5 = por %p2037_p4, %p2036_p9 }
  0x89   : > { %p2034_p3 = pneg %p2033_p13 }
  0x8a   : > { %p2040_p7 = por %p2039_p6, %p2038_p5 }
  0x8c   : > { %p2041_p11 = pnand %p2040_p7, %p2034_p3 }
  0x8e   : > { %2044 = shalt.err (!%p2041_p11)
}
  0x8f   : > { %s2045_s7 = scalar_lea.vmem %s2527_s11, 2048  ;;  %s2253_s28 = smov [#allocation6]  }
  0x90   : > { %p2046_p10 = scmp.ne.s32.totalorder %s2527_s11, %s2045_s7  ;;  %s2050_s16 = sshll.u32 %s2253_s28, 4  ;;  %s2051_s16 = int_to_ptr.vmem [resolvable:$false] %s2050_s16 }
  0x91   : > { %s2052_s6 = scalar_lea.vmem %s2051_s16, 4096  ;;  %p2053_p8 = scmp.lt.s32.totalorder %s2527_s11, %s2051_s16 }
  0x92   : > { %p2048_p13 = pnand %p2046_p10, %p2032_p12  ;;  %p2054_p9 = scmp.lt.s32.totalorder %s2052_s6, %s2045_s7 }
  0x94   : > { %p2049_p0 = pneg %p2048_p13  ;;  %p2055_p4 = por %p2054_p9, %p2053_p8 }
  0x96   : > { %p2056_p5 = pnand %p2055_p4, %p2049_p0 }
  0x98   : > { %2059 = shalt.err (!%p2056_p5)
}
  0x99   : > { %s2254_s8 = smov 128   ;;  %s2255_s20 = smov 8  }
  0x9a   : > { %s3521_s19 = smov 256   ;;  %p106_p0 = scmp.eq.s32.totalorder %s105_s27, 0 }
  0x9b   : > { %1745 = dma.hbm_to_vmem [thread:$0]  (!%p2510_p2), %s2574_s9, 2048, %s2527_s11, %s2580_s26, %s3521_s19, %s2254_s8, %s2255_s20  }
  0x9c   : > { %s3522_s24 = scalar_select %p2540_p1, %s2242_s22, 0 }
  0x9d   : > { %p3523_p8 = scmp.lt.s32.totalorder %s2246_s23, 4  ;;  %s261_s4 = sand.u32 1, %s2214_s15  }
  0x9e   : > { %s2623_s7 = scalar_select %p106_p0, %s2214_s15, %s108_s30  }
  0x9f   : > { %s3585_s24 = smov (!%p3523_p8, %s3522_s24), 0  ;;  %p3524_p3 = pmov %p3523_p8 }
  0xa0   : > { %s264_s28 = sld [smem:[%s3583_s1 + %s3585_s24]]  ;;  %s1509_s26 = sshll.u32 %s261_s4, 7 }
  0xa1   : > { %s1725_s16 = scalar_select %p2540_p1, [#allocation4], [#allocation16] }
  0xa2   : > { %p3525_p2 = pmov %p3524_p3  ;;  %s259_s5 = sand.u32 1, %s2246_s23  }
  0xa3   : > { %s3587_s16 = smov (!%p3524_p3, %s1725_s16), [#allocation20]  ;;  %s263_s10 = scalar_lea.vmem [#allocation9], %s1509_s26 }
  0xa4   : > { %s277_s1 = sshll.u32 %s263_s10, 4  ;;  %p3526_p6 = scmp.ne.s32.totalorder %s3518_s0, 0  ;;  %s2639_s1 = int_to_ptr.vmem [resolvable:$true] %s277_s1 }
  0xa6   : > { %s1510_s6 = sadd.s32 4294967295, %s264_s28  ;;  %p2062_p7 = pneg %p3526_p6 }
  0xa7   : > { %p266_p12 = scmp.lt.s32.totalorder %s2238_s21, %s1510_s6 }
  0xa9   : > { %s267_s2 = scalar_select %p266_p12, %s2238_s21, %s1510_s6 }
  0xab   : > { %s269_s27 = sadd.s32 %s2476_s25, %s267_s2  ;;  %s2646_s2 = scalar_lea.sflag [#allocation10], %s259_s5 }
  0xac   : > { %s3589_s27 = smov (!%p2540_p1, %s269_s27), 0 }
  0xad   : > { %s3591_s27 = smov (!%p3525_p2, %s3589_s27), 0 }
  0xae   : > { %s270_s11 = sld [smem:[%s3587_s16 + %s3591_s27]]  ;;  %s2065_s16 = scalar_lea.hbm %s3455_s3, 4096 }
  0xb4   : > { %s1529_s30 = sshll.u32 %s270_s11, 11 }
  0xb5   : > { %s2644_s24 = scalar_lea.hbm %s3455_s3, %s1529_s30 }
  0xb6   : > { %s2060_s25 = scalar_lea.hbm %s2644_s24, 2048  ;;  %p2066_p13 = scmp.lt.u32.totalorder %s2644_s24, %s3455_s3 }
  0xb7   : > { %p2061_p1 = scmp.ne.s32.totalorder %s2644_s24, %s2060_s25  ;;  %p2067_p9 = scmp.lt.u32.totalorder %s2065_s16, %s2060_s25 }
  0xb8   : > { %p2069_p5 = scmp.lt.u32.totalorder %s2060_s25, %s2644_s24 }
  0xb9   : > { %p2063_p11 = pnand %p2062_p7, %p2061_p1  ;;  %p2068_p4 = por %p2067_p9, %p2066_p13 }
  0xbb   : > { %p2064_p10 = pneg %p2063_p11  ;;  %p2070_p0 = por %p2069_p5, %p2068_p4 }
  0xbd   : > { %p2071_p8 = pnand %p2070_p0, %p2064_p10 }
  0xbf   : > { %2074 = shalt.err (!%p2071_p8)
}
  0xc0   : > { %s2075_s26 = scalar_lea.vmem %s2639_s1, 2048  ;;  %s2256_s27 = smov [#allocation9]  }
  0xc1   : > { %p2076_p12 = scmp.ne.s32.totalorder %s2639_s1, %s2075_s26  ;;  %s2080_s11 = sshll.u32 %s2256_s27, 4  ;;  %s2081_s11 = int_to_ptr.vmem [resolvable:$false] %s2080_s11 }
  0xc2   : > { %s2082_s5 = scalar_lea.vmem %s2081_s11, 4096  ;;  %p2083_p1 = scmp.lt.s32.totalorder %s2639_s1, %s2081_s11 }
  0xc3   : > { %p2078_p3 = pnand %p2076_p12, %p2062_p7  ;;  %p2084_p11 = scmp.lt.s32.totalorder %s2082_s5, %s2075_s26 }
  0xc5   : > { %p2079_p2 = pneg %p2078_p3  ;;  %p2085_p13 = por %p2084_p11, %p2083_p1 }
  0xc7   : > { %p2086_p9 = pnand %p2085_p13, %p2079_p2 }
  0xc9   : > { %2089 = shalt.err (!%p2086_p9)
}
  0xca   : > { %1752 = dma.hbm_to_vmem [thread:$0]  (!%p3526_p6), %s2644_s24, 2048, %s2639_s1, %s2646_s2, %s2254_s8, %s2254_s8, %s2255_s20  }
  0xcb   : > { %p3527_p7 = scmp.ne.s32.totalorder %s3506_s13, 0 }
  0xcc   : > { %s291_s10 = sand.u32 (!%p3527_p7), 1, %s2222_s17   ;;  %p3528_p10 = scmp.ne.s32.totalorder (!%p3527_p7), %s3497_s29, 0 }
  0xcd   : > { %289 = sbr.rel (%p3527_p7) target bundleno = 1184 (0x4a0), region = 36  ;;  %s1515_s30 = sshll.u32 (!%p3527_p7), %s291_s10, 7 }
  0xce   : > { %s292_s9 = scalar_lea.sflag (!%p3527_p7), [#allocation7], %s291_s10  ;;  %s2680_s19 = scalar_lea.vmem (!%p3527_p7), [#allocation6], %s1515_s30 }
  0xd4   : > { %2177 = dma.done.wait (%p3528_p10), %s292_s9, 2048  }
  0xd5   : > { %2179 = vsyncadd (%p3528_p10), %s292_s9, 4294965248  ;;  %s3529_s0 = sld [smem:[#allocation31_spill]]  ;;  %s3530_s25 = sld [smem:[#allocation32_spill]] }
  0xd6   : > { %s302_s8 = sand.u32 1, %s2210_s14  }
  0xd7   : > { %s1516_s20 = sshll.u32 %s302_s8, 7 }
  0xd8   : > { %s2688_s1 = scalar_lea.vmem [#allocation9], %s1516_s20 }
  0xdb   : > { %s300_s12 = sand.u32 1, %s3529_s0   ;;  %p3531_p6 = scmp.ne.s32.totalorder %s3530_s25, 0 }
  0xdc   : > { %s301_s13 = scalar_lea.sflag [#allocation10], %s300_s12 }
  0xdd   : > { %2181 = dma.done.wait (%p3531_p6), %s301_s13, 2048  }
  0xde   : > { %2183 = vsyncadd (%p3531_p6), %s301_s13, 4294965248  ;;  %p3532_p4 = scmp.eq.s32.totalorder %s3529_s0, 0 }
  0xe0   : > { %2185 = dma.done.wait (%p3532_p4), [#allocation10], 4096   ;;  %p3533_p5 = pmov %p3532_p4 }
  0xe1   : > { %s3534_s29 = sld [smem:[#allocation27_spill]]  ;;  %s3535_s16 = sld [smem:[#allocation29_spill]] }
  0xe2   : > { %2187 = vsyncadd (%p3533_p5), [#allocation10], 4294963200 }
  0xe7   : > { %s335_s24 = sand.u32 1, %s3534_s29   ;;  %p1519_p0 = scmp.ne.s32.totalorder %s3535_s16, 0 }
  0xe8   : > { %s1518_s2 = sshll.u32 %s335_s24, 8  ;;  %v2257_v0 = vmov (!%p1519_p0), 0.0  }
  0xe9   : > { %s2701_s28 = scalar_lea.vmem [#allocation12], %s1518_s2  ;;  %358 = sbr.rel (%p1519_p0) target bundleno = 241 (0xf1), region = 52  ;;  %359 = vst [vmem:[#allocation2] sm:$0xff] (!%p1519_p0), %v2257_v0  ;;  %360 = vst [vmem:[#allocation2 + $0x8] sm:$0xff] (!%p1519_p0), %v2257_v0 }
  0xea   : > { %361 = vst [vmem:[#allocation2 + $0x10] sm:$0xff] (!%p1519_p0), %v2257_v0  ;;  %362 = vst [vmem:[#allocation2 + $0x18] sm:$0xff] (!%p1519_p0), %v2257_v0 }
  0xeb   : > { %363 = vst [vmem:[#allocation2 + $0x20] sm:$0xff] (!%p1519_p0), %v2257_v0  ;;  %364 = vst [vmem:[#allocation2 + $0x28] sm:$0xff] (!%p1519_p0), %v2257_v0 }
  0xec   : > { %365 = vst [vmem:[#allocation2 + $0x30] sm:$0xff] (!%p1519_p0), %v2257_v0  ;;  %366 = vst [vmem:[#allocation2 + $0x38] sm:$0xff] (!%p1519_p0), %v2257_v0 }
  0xed   : > { %367 = vst [vmem:[#allocation2 + $0x40] sm:$0xff] (!%p1519_p0), %v2257_v0  ;;  %368 = vst [vmem:[#allocation2 + $0x48] sm:$0xff] (!%p1519_p0), %v2257_v0 }
  0xee   : > { %369 = vst [vmem:[#allocation2 + $0x50] sm:$0xff] (!%p1519_p0), %v2257_v0  ;;  %370 = vst [vmem:[#allocation2 + $0x58] sm:$0xff] (!%p1519_p0), %v2257_v0 }
  0xef   : > { %371 = vst [vmem:[#allocation2 + $0x60] sm:$0xff] (!%p1519_p0), %v2257_v0  ;;  %372 = vst [vmem:[#allocation2 + $0x68] sm:$0xff] (!%p1519_p0), %v2257_v0 }
  0xf0   : > { %373 = vst [vmem:[#allocation2 + $0x70] sm:$0xff] %v2257_v0  ;;  %374 = vst [vmem:[#allocation2 + $0x78] sm:$0xff] %v2257_v0 }
  0xf1 PF: > { %s3536_s6 = sld [smem:[#allocation30_spill]]  ;;  %s3537_s26 = sld [smem:[#allocation29_spill]] }
  0xf7   : > { %s375_s4 = sld [smem:[#allocation5 + %s3536_s6]] }
  0xfd   : > { %p1520_p8 = scmp.ge.s32.totalorder %s3537_s26, %s375_s4 }
  0xfe   : > { %v412_v1 = vld [vmem:[%s2688_s1] sm:$0xff] (!%p1520_p8)  ;;  %v413_v2 = vld [vmem:[%s2688_s1 + $0x8] sm:$0xff] (!%p1520_p8)  ;;  %v414_v3 = vld [vmem:[%s2688_s1 + $0x10] sm:$0xff] (!%p1520_p8) }
  0xff   : > { %379 = sbr.rel (%p1520_p8) target bundleno = 517 (0x205), region = 56  ;;  %v1620_v4 = vpack.c.bf16 (!%p1520_p8), %v413_v2, %v412_v1  ;;  %v415_v5 = vld [vmem:[%s2688_s1 + $0x18] sm:$0xff] (!%p1520_p8)  ;;  %v416_v7 = vld [vmem:[%s2688_s1 + $0x20] sm:$0xff] (!%p1520_p8)  ;;  %v417_v8 = vld [vmem:[%s2688_s1 + $0x28] sm:$0xff] (!%p1520_p8) }
 0x100   : > { %v1624_v6 = vpack.c.bf16 (!%p1520_p8), %v415_v5, %v414_v3  ;;  %v1628_v9 = vpack.c.bf16 (!%p1520_p8), %v417_v8, %v416_v7  ;;  %v396_v10 = vld [vmem:[%s2680_s19] sm:$0xff] (!%p1520_p8)  ;;  %v418_v12 = vld [vmem:[%s2688_s1 + $0x30] sm:$0xff] (!%p1520_p8)  ;;  %v419_v13 = vld [vmem:[%s2688_s1 + $0x38] sm:$0xff] (!%p1520_p8) }
 0x101   : > { %1621 = vmatprep.subr.bf16.mxu0 (!%p1520_p8), %v1620_v4  ;;  %1684 = vmatprep.subr.bf16.mxu1 (!%p1520_p8), %v1620_v4  ;;  %v404_v11 = vld [vmem:[%s2680_s19 + $0x40] sm:$0xff] (!%p1520_p8)  ;;  %v1632_v14 = vpack.c.bf16 (!%p1520_p8), %v419_v13, %v418_v12  ;;  %v421_v16 = vld [vmem:[%s2688_s1 + $0x48] sm:$0xff] (!%p1520_p8)  ;;  %v422_v18 = vld [vmem:[%s2688_s1 + $0x50] sm:$0xff] (!%p1520_p8) }
 0x102   : > { %1623 = vmatpush3.bf16.msra.mxu0 (!%p1520_p8), %v1620_v4  ;;  %1692 = vmatpush3.bf16.msra.mxu1 (!%p1520_p8), %v1620_v4  ;;  %v420_v15 = vld [vmem:[%s2688_s1 + $0x40] sm:$0xff] (!%p1520_p8)  ;;  %v423_v19 = vld [vmem:[%s2688_s1 + $0x58] sm:$0xff] (!%p1520_p8)  ;;  %v425_v22 = vld [vmem:[%s2688_s1 + $0x68] sm:$0xff] (!%p1520_p8) }
 0x103   : > { %1625 = vmatprep.subr.bf16.mxu0 (!%p1520_p8), %v1624_v6  ;;  %1685 = vmatprep.subr.bf16.mxu1 (!%p1520_p8), %v1624_v6  ;;  %v1636_v17 = vpack.c.bf16 (!%p1520_p8), %v421_v16, %v420_v15  ;;  %v1640_v20 = vpack.c.bf16 (!%p1520_p8), %v423_v19, %v422_v18  ;;  %v424_v21 = vld [vmem:[%s2688_s1 + $0x60] sm:$0xff] (!%p1520_p8)  ;;  %v426_v24 = vld [vmem:[%s2688_s1 + $0x70] sm:$0xff] (!%p1520_p8)  ;;  %v427_v25 = vld [vmem:[%s2688_s1 + $0x78] sm:$0xff] (!%p1520_p8) }
 0x104   : > { %1596 = vmatprep.mubr.f32.mxu0 (!%p1520_p8), %v396_v10  ;;  %1608 = vmatprep.mubr.f32.mxu1 (!%p1520_p8), %v404_v11  ;;  %v1644_v23 = vpack.c.bf16 (!%p1520_p8), %v425_v22, %v424_v21  ;;  %v1648_v26 = vpack.c.bf16 (!%p1520_p8), %v427_v25, %v426_v24  ;;  %v397_v27 = vld [vmem:[%s2680_s19 + $0x8] sm:$0xff] (!%p1520_p8)  ;;  %v398_v29 = vld [vmem:[%s2680_s19 + $0x10] sm:$0xff] (!%p1520_p8)  ;;  %v399_v31 = vld [vmem:[%s2680_s19 + $0x18] sm:$0xff] (!%p1520_p8) }
 0x105   : > { %v405_v28 = vld [vmem:[%s2680_s19 + $0x48] sm:$0xff] (!%p1520_p8)  ;;  %v406_v30 = vld [vmem:[%s2680_s19 + $0x50] sm:$0xff] (!%p1520_p8)  ;;  %v407_v32 = vld [vmem:[%s2680_s19 + $0x58] sm:$0xff] (!%p1520_p8) }
 0x106   : > { %1627 = vmatpush3.bf16.msra.mxu0 %v1624_v6  ;;  %1693 = vmatpush3.bf16.msra.mxu1 %v1624_v6  ;;  %v400_v33 = vld [vmem:[%s2680_s19 + $0x20] sm:$0xff]  ;;  %v401_v35 = vld [vmem:[%s2680_s19 + $0x28] sm:$0xff]  ;;  %v402_v37 = vld [vmem:[%s2680_s19 + $0x30] sm:$0xff] }
 0x107   : > { %1629 = vmatprep.subr.bf16.mxu0 %v1628_v9  ;;  %1686 = vmatprep.subr.bf16.mxu1 %v1628_v9  ;;  %v408_v34 = vld [vmem:[%s2680_s19 + $0x60] sm:$0xff]  ;;  %v409_v36 = vld [vmem:[%s2680_s19 + $0x68] sm:$0xff]  ;;  %v410_v38 = vld [vmem:[%s2680_s19 + $0x70] sm:$0xff] }
 0x108   : > { %v403_v39 = vld [vmem:[%s2680_s19 + $0x38] sm:$0xff]  ;;  %v381_v41 = vld [vmem:[#allocation2 + $0x8] sm:$0xff]  ;;  %v380_v43 = vld [vmem:[#allocation2] sm:$0xff] }
 0x109   : > { %v411_v40 = vld [vmem:[%s2680_s19 + $0x78] sm:$0xff]  ;;  %v389_v42 = vld [vmem:[#allocation2 + $0x48] sm:$0xff]  ;;  %v388_v44 = vld [vmem:[#allocation2 + $0x40] sm:$0xff] }
 0x10a   : > { %1631 = vmatpush3.bf16.msra.mxu0 %v1628_v9  ;;  %1694 = vmatpush3.bf16.msra.mxu1 %v1628_v9  ;;  %v383_v53 = vld [vmem:[#allocation2 + $0x18] sm:$0xff]  ;;  %v382_v55 = vld [vmem:[#allocation2 + $0x10] sm:$0xff]  ;;  %v385_v1 = vld [vmem:[#allocation2 + $0x28] sm:$0xff] }
 0x10b   : > { %1633 = vmatprep.subr.bf16.mxu0 %v1632_v14  ;;  %1687 = vmatprep.subr.bf16.mxu1 %v1632_v14  ;;  %v391_v54 = vld [vmem:[#allocation2 + $0x58] sm:$0xff]  ;;  %v390_v56 = vld [vmem:[#allocation2 + $0x50] sm:$0xff]  ;;  %v393_v2 = vld [vmem:[#allocation2 + $0x68] sm:$0xff] }
 0x10c   : > { %v384_v3 = vld [vmem:[#allocation2 + $0x20] sm:$0xff]  ;;  %v387_v13 = vld [vmem:[#allocation2 + $0x38] sm:$0xff]  ;;  %v386_v15 = vld [vmem:[#allocation2 + $0x30] sm:$0xff] }
 0x10d   : > { %v392_v4 = vld [vmem:[#allocation2 + $0x60] sm:$0xff]  ;;  %v394_v16 = vld [vmem:[#allocation2 + $0x70] sm:$0xff] }
 0x10e   : > { %1635 = vmatpush3.bf16.msra.mxu0 %v1632_v14  ;;  %1695 = vmatpush3.bf16.msra.mxu1 %v1632_v14  ;;  %v395_v14 = vld [vmem:[#allocation2 + $0x78] sm:$0xff] }
 0x10f   : > { %1637 = vmatprep.subr.bf16.mxu0 %v1636_v17  ;;  %1688 = vmatprep.subr.bf16.mxu1 %v1636_v17 }
 0x112   : > { %1639 = vmatpush3.bf16.msra.mxu0 %v1636_v17  ;;  %1696 = vmatpush3.bf16.msra.mxu1 %v1636_v17 }
 0x113   : > { %1641 = vmatprep.subr.bf16.mxu0 %v1640_v20  ;;  %1689 = vmatprep.subr.bf16.mxu1 %v1640_v20 }
 0x116   : > { %1643 = vmatpush3.bf16.msra.mxu0 %v1640_v20  ;;  %1697 = vmatpush3.bf16.msra.mxu1 %v1640_v20 }
 0x117   : > { %1645 = vmatprep.subr.bf16.mxu0 %v1644_v23  ;;  %1690 = vmatprep.subr.bf16.mxu1 %v1644_v23 }
 0x11a   : > { %1647 = vmatpush3.bf16.msra.mxu0 %v1644_v23  ;;  %1698 = vmatpush3.bf16.msra.mxu1 %v1644_v23 }
 0x11b   : > { %1649 = vmatprep.subr.bf16.mxu0 %v1648_v26  ;;  %1691 = vmatprep.subr.bf16.mxu1 %v1648_v26 }
 0x11e   : > { %1651 = vmatpush3.bf16.msra.mxu0 %v1648_v26  ;;  %1699 = vmatpush3.bf16.msra.mxu1 %v1648_v26 }
 0x121   : > { %1597 = vmatmul.mubr.f32.vlgmr.msra.gmra.mrb[0].mxu0 %v397_v27  ;;  %1609 = vmatmul.mubr.f32.vlgmr.msra.gmra.mrb[0].mxu1 %v405_v28 }
 0x122   : > { %1599 = vmatprep.mubr.f32.mxu0 %v398_v29  ;;  %1611 = vmatprep.mubr.f32.mxu1 %v406_v30 }
 0x125   : > { %1600 = vmatmul.mubr.f32.gmra.mrb[2].mxu0 %v399_v31  ;;  %1612 = vmatmul.mubr.f32.gmra.mrb[2].mxu1 %v407_v32 }
 0x126   : > { %1602 = vmatprep.mubr.f32.mxu0 %v400_v33  ;;  %1614 = vmatprep.mubr.f32.mxu1 %v408_v34 }
 0x129   : > { %1603 = vmatmul.mubr.f32.gmra.mrb[4].mxu0 %v401_v35  ;;  %1615 = vmatmul.mubr.f32.gmra.mrb[4].mxu1 %v409_v36 }
 0x12a   : > { %1605 = vmatprep.mubr.f32.mxu0 %v402_v37  ;;  %1617 = vmatprep.mubr.f32.mxu1 %v410_v38 }
 0x12d   : > { %1606 = vmatmul.mubr.f32.gmra.mrb[6].mxu0 %v403_v39  ;;  %1618 = vmatmul.mubr.f32.gmra.mrb[6].mxu1 %v411_v40 }
 0x1f4   : > { %v1598_v45 = vpop.f32.mrb[0].mxu0  ;;  %v1610_v46 = vpop.f32.mrb[0].mxu1 }
 0x1f5   : > { %v574_v47 = vadd.f32 %v1598_v45, %v381_v41  ;;  %v582_v48 = vadd.f32 %v1610_v46, %v389_v42  ;;  %v494_v49 = vpop.f32.mrb[1].mxu0  ;;  %v534_v50 = vpop.f32.mrb[1].mxu1 }
 0x1f6   : > { %v573_v51 = vadd.f32 %v494_v49, %v380_v43  ;;  %v581_v52 = vadd.f32 %v534_v50, %v388_v44 }
 0x1f7   : > { %590 = vst [vmem:[#allocation2 + $0x8] sm:$0xff] %v574_v47  ;;  %598 = vst [vmem:[#allocation2 + $0x48] sm:$0xff] %v582_v48 }
 0x1f8   : > { %589 = vst [vmem:[#allocation2] sm:$0xff] %v573_v51  ;;  %597 = vst [vmem:[#allocation2 + $0x40] sm:$0xff] %v581_v52  ;;  %v1601_v57 = vpop.f32.mrb[2].mxu0  ;;  %v1613_v58 = vpop.f32.mrb[2].mxu1 }
 0x1f9   : > { %v576_v59 = vadd.f32 %v1601_v57, %v383_v53  ;;  %v584_v60 = vadd.f32 %v1613_v58, %v391_v54  ;;  %v504_v61 = vpop.f32.mrb[3].mxu0  ;;  %v544_v62 = vpop.f32.mrb[3].mxu1 }
 0x1fa   : > { %v575_v63 = vadd.f32 %v504_v61, %v382_v55  ;;  %v583_v0 = vadd.f32 %v544_v62, %v390_v56 }
 0x1fb   : > { %592 = vst [vmem:[#allocation2 + $0x18] sm:$0xff] %v576_v59  ;;  %600 = vst [vmem:[#allocation2 + $0x58] sm:$0xff] %v584_v60 }
 0x1fc   : > { %591 = vst [vmem:[#allocation2 + $0x10] sm:$0xff] %v575_v63  ;;  %599 = vst [vmem:[#allocation2 + $0x50] sm:$0xff] %v583_v0  ;;  %v1604_v5 = vpop.f32.mrb[4].mxu0  ;;  %v1616_v6 = vpop.f32.mrb[4].mxu1 }
 0x1fd   : > { %v578_v7 = vadd.f32 %v1604_v5, %v385_v1  ;;  %v586_v8 = vadd.f32 %v1616_v6, %v393_v2  ;;  %v514_v9 = vpop.f32.mrb[5].mxu0  ;;  %v554_v10 = vpop.f32.mrb[5].mxu1 }
 0x1fe   : > { %v577_v11 = vadd.f32 %v514_v9, %v384_v3  ;;  %v585_v12 = vadd.f32 %v554_v10, %v392_v4 }
 0x1ff   : > { %594 = vst [vmem:[#allocation2 + $0x28] sm:$0xff] %v578_v7  ;;  %602 = vst [vmem:[#allocation2 + $0x68] sm:$0xff] %v586_v8 }
 0x200   : > { %593 = vst [vmem:[#allocation2 + $0x20] sm:$0xff] %v577_v11  ;;  %601 = vst [vmem:[#allocation2 + $0x60] sm:$0xff] %v585_v12  ;;  %v1607_v17 = vpop.f32.mrb[6].mxu0  ;;  %v1619_v18 = vpop.f32.mrb[6].mxu1 }
 0x201   : > { %v580_v19 = vadd.f32 %v1607_v17, %v387_v13  ;;  %v588_v20 = vadd.f32 %v1619_v18, %v395_v14  ;;  %v524_v21 = vpop.f32.mrb[7].mxu0  ;;  %v564_v22 = vpop.f32.mrb[7].mxu1 }
 0x202   : > { %v579_v23 = vadd.f32 %v524_v21, %v386_v15  ;;  %v587_v24 = vadd.f32 %v564_v22, %v394_v16 }
 0x203   : > { %596 = vst [vmem:[#allocation2 + $0x38] sm:$0xff] %v580_v19  ;;  %604 = vst [vmem:[#allocation2 + $0x78] sm:$0xff] %v588_v20 }
 0x204   : > { %595 = vst [vmem:[#allocation2 + $0x30] sm:$0xff] %v579_v23  ;;  %603 = vst [vmem:[#allocation2 + $0x70] sm:$0xff] %v587_v24 }
 0x205 PF: > { %s3538_s27 = sld [smem:[#allocation29_spill]] }
 0x20b   : > { %p1521_p12 = scmp.ne.s32.totalorder %s3538_s27, 1 }
 0x20c   : > { %v626_v25 = vld [vmem:[#allocation11 + $0x8] sm:$0xff] (!%p1521_p12)  ;;  %v628_v26 = vld [vmem:[#allocation11 + $0x18] sm:$0xff] (!%p1521_p12)  ;;  %v625_v27 = vld [vmem:[#allocation11] sm:$0xff] (!%p1521_p12)  ;;  %v2258_v32 = vmov (!%p1521_p12), 0.0   ;;  %s3539_s10 = sld [smem:[#allocation41_spill]] (!%p1521_p12) }
 0x20d   : > { %608 = sbr.rel (%p1521_p12) target bundleno = 1156 (0x484), region = 60  ;;  %v1652_v28 = vpack.c.bf16 (!%p1521_p12), %v628_v26, %v626_v25  ;;  %v627_v29 = vld [vmem:[#allocation11 + $0x10] sm:$0xff] (!%p1521_p12)  ;;  %v630_v30 = vld [vmem:[#allocation11 + $0x28] sm:$0xff] (!%p1521_p12)  ;;  %v632_v31 = vld [vmem:[#allocation11 + $0x38] sm:$0xff] (!%p1521_p12)  ;;  %731 = vmatprep.mubr.f32.mxu0 (!%p1521_p12), %v2258_v32  ;;  %779 = vmatprep.mubr.f32.mxu1 (!%p1521_p12), %v2258_v32  ;;  %v659_v26 = vlaneseq (!%p1521_p12) }
 0x20e   : > { %v1654_v33 = vpack.c.bf16 (!%p1521_p12), %v627_v29, %v625_v27  ;;  %v1656_v34 = vpack.c.bf16 (!%p1521_p12), %v632_v31, %v630_v30  ;;  %v629_v35 = vld [vmem:[#allocation11 + $0x20] sm:$0xff] (!%p1521_p12)  ;;  %v631_v36 = vld [vmem:[#allocation11 + $0x30] sm:$0xff] (!%p1521_p12)  ;;  %v634_v37 = vld [vmem:[#allocation11 + $0x48] sm:$0xff] (!%p1521_p12) }
 0x20f   : > { %1653 = vmatprep.subr.bf16.mxu0 (!%p1521_p12), %v1652_v28  ;;  %1700 = vmatprep.subr.bf16.mxu1 (!%p1521_p12), %v1652_v28  ;;  %v636_v38 = vld [vmem:[#allocation11 + $0x58] sm:$0xff] (!%p1521_p12)  ;;  %v1658_v39 = vpack.c.bf16 (!%p1521_p12), %v631_v36, %v629_v35  ;;  %v633_v41 = vld [vmem:[#allocation11 + $0x40] sm:$0xff] (!%p1521_p12)  ;;  %v635_v42 = vld [vmem:[#allocation11 + $0x50] sm:$0xff] (!%p1521_p12)  ;;  %v2755_v27 = vshrl.u32 (!%p1521_p12), %v659_v26, 7 }
 0x210   : > { %1655 = vmatpush1.bf16.msra.mxu0 (!%p1521_p12), %v1654_v33  ;;  %1708 = vmatpush1.bf16.msra.mxu1 (!%p1521_p12), %v1654_v33  ;;  %v1660_v40 = vpack.c.bf16 (!%p1521_p12), %v636_v38, %v634_v37  ;;  %v638_v43 = vld [vmem:[#allocation11 + $0x68] sm:$0xff] (!%p1521_p12)  ;;  %v640_v44 = vld [vmem:[#allocation11 + $0x78] sm:$0xff] (!%p1521_p12)  ;;  %v1662_v45 = vpack.c.bf16 (!%p1521_p12), %v635_v42, %v633_v41  ;;  %v637_v47 = vld [vmem:[#allocation11 + $0x60] sm:$0xff] (!%p1521_p12) }
 0x211   : > { %1657 = vmatprep.subr.bf16.mxu0 (!%p1521_p12), %v1656_v34  ;;  %1701 = vmatprep.subr.bf16.mxu1 (!%p1521_p12), %v1656_v34  ;;  %v1664_v46 = vpack.c.bf16 (!%p1521_p12), %v640_v44, %v638_v43  ;;  %v639_v48 = vld [vmem:[#allocation11 + $0x70] sm:$0xff] (!%p1521_p12)  ;;  %v642_v49 = vld [vmem:[#allocation11 + $0x88] sm:$0xff] (!%p1521_p12)  ;;  %v644_v50 = vld [vmem:[#allocation11 + $0x98] sm:$0xff] (!%p1521_p12)  ;;  %v661_v28 = vsub.s32 (!%p1521_p12), 0, %v2755_v27 }
 0x212   : > { %v1666_v51 = vpack.c.bf16 (!%p1521_p12), %v639_v48, %v637_v47  ;;  %v1668_v52 = vpack.c.bf16 (!%p1521_p12), %v644_v50, %v642_v49  ;;  %v641_v53 = vld [vmem:[#allocation11 + $0x80] sm:$0xff] (!%p1521_p12)  ;;  %v643_v54 = vld [vmem:[#allocation11 + $0x90] sm:$0xff] (!%p1521_p12)  ;;  %v646_v55 = vld [vmem:[#allocation11 + $0xa8] sm:$0xff] (!%p1521_p12) }
 0x213   : > { %v648_v56 = vld [vmem:[#allocation11 + $0xb8] sm:$0xff] (!%p1521_p12)  ;;  %v1670_v57 = vpack.c.bf16 (!%p1521_p12), %v643_v54, %v641_v53  ;;  %v645_v59 = vld [vmem:[#allocation11 + $0xa0] sm:$0xff] (!%p1521_p12)  ;;  %v647_v60 = vld [vmem:[#allocation11 + $0xb0] sm:$0xff] (!%p1521_p12) }
 0x214   : > { %1659 = vmatpush1.bf16.msra.mxu0 %v1658_v39  ;;  %1709 = vmatpush1.bf16.msra.mxu1 %v1658_v39  ;;  %v1672_v58 = vpack.c.bf16 %v648_v56, %v646_v55  ;;  %v650_v61 = vld [vmem:[#allocation11 + $0xc8] sm:$0xff]  ;;  %v652_v62 = vld [vmem:[#allocation11 + $0xd8] sm:$0xff]  ;;  %v1674_v63 = vpack.c.bf16 %v647_v60, %v645_v59  ;;  %v649_v1 = vld [vmem:[#allocation11 + $0xc0] sm:$0xff] }
 0x215   : > { %1661 = vmatprep.subr.bf16.mxu0 %v1660_v40  ;;  %1702 = vmatprep.subr.bf16.mxu1 %v1660_v40  ;;  %v1676_v0 = vpack.c.bf16 %v652_v62, %v650_v61  ;;  %v651_v2 = vld [vmem:[#allocation11 + $0xd0] sm:$0xff]  ;;  %v654_v3 = vld [vmem:[#allocation11 + $0xe8] sm:$0xff]  ;;  %v656_v4 = vld [vmem:[#allocation11 + $0xf8] sm:$0xff] }
 0x216   : > { %v1678_v5 = vpack.c.bf16 %v651_v2, %v649_v1  ;;  %v1680_v6 = vpack.c.bf16 %v656_v4, %v654_v3  ;;  %v653_v7 = vld [vmem:[#allocation11 + $0xe0] sm:$0xff]  ;;  %v655_v8 = vld [vmem:[#allocation11 + $0xf0] sm:$0xff]  ;;  %v610_v12 = vld [vmem:[#allocation2 + $0x8] sm:$0xff] }
 0x217   : > { %v1682_v9 = vpack.c.bf16 %v655_v8, %v653_v7  ;;  %v609_v10 = vld [vmem:[#allocation2] sm:$0xff]  ;;  %v618_v13 = vld [vmem:[#allocation2 + $0x48] sm:$0xff]  ;;  %v611_v14 = vld [vmem:[#allocation2 + $0x10] sm:$0xff] }
 0x218   : > { %1663 = vmatpush1.bf16.msra.mxu0 %v1662_v45  ;;  %1710 = vmatpush1.bf16.msra.mxu1 %v1662_v45  ;;  %v617_v11 = vld [vmem:[#allocation2 + $0x40] sm:$0xff]  ;;  %v619_v15 = vld [vmem:[#allocation2 + $0x50] sm:$0xff]  ;;  %v612_v16 = vld [vmem:[#allocation2 + $0x18] sm:$0xff] }
 0x219   : > { %1665 = vmatprep.subr.bf16.mxu0 %v1664_v46  ;;  %1703 = vmatprep.subr.bf16.mxu1 %v1664_v46  ;;  %v620_v17 = vld [vmem:[#allocation2 + $0x58] sm:$0xff]  ;;  %v613_v18 = vld [vmem:[#allocation2 + $0x20] sm:$0xff]  ;;  %v614_v20 = vld [vmem:[#allocation2 + $0x28] sm:$0xff] }
 0x21a   : > { %v621_v19 = vld [vmem:[#allocation2 + $0x60] sm:$0xff]  ;;  %v622_v21 = vld [vmem:[#allocation2 + $0x68] sm:$0xff]  ;;  %v615_v22 = vld [vmem:[#allocation2 + $0x30] sm:$0xff] }
 0x21b   : > { %v623_v23 = vld [vmem:[#allocation2 + $0x70] sm:$0xff]  ;;  %v616_v24 = vld [vmem:[#allocation2 + $0x38] sm:$0xff] }
 0x21c   : > { %1667 = vmatpush1.bf16.msra.mxu0 %v1666_v51  ;;  %1711 = vmatpush1.bf16.msra.mxu1 %v1666_v51  ;;  %v624_v25 = vld [vmem:[#allocation2 + $0x78] sm:$0xff]  ;;  %v2761_v29 = vld [vmem:[%s3539_s10] sm:$0xff] }
 0x21d   : > { %1669 = vmatprep.subr.bf16.mxu0 %v1668_v52  ;;  %1704 = vmatprep.subr.bf16.mxu1 %v1668_v52  ;;  %v2766_v30 = vld [vmem:[%s3539_s10 + $0x8] sm:$0xff]  ;;  %v2769_v31 = vrot.slane %v2761_v29, %v661_v28 }
 0x220   : > { %1671 = vmatpush1.bf16.msra.mxu0 %v1670_v57  ;;  %1712 = vmatpush1.bf16.msra.mxu1 %v1670_v57 }
 0x221   : > { %1673 = vmatprep.subr.bf16.mxu0 %v1672_v58  ;;  %1705 = vmatprep.subr.bf16.mxu1 %v1672_v58 }
 0x224   : > { %1675 = vmatpush1.bf16.msra.mxu0 %v1674_v63  ;;  %1713 = vmatpush1.bf16.msra.mxu1 %v1674_v63 }
 0x225   : > { %1677 = vmatprep.subr.bf16.mxu0 %v1676_v0  ;;  %1706 = vmatprep.subr.bf16.mxu1 %v1676_v0 }
 0x228   : > { %1679 = vmatpush1.bf16.msra.mxu0 %v1678_v5  ;;  %1714 = vmatpush1.bf16.msra.mxu1 %v1678_v5 }
 0x229   : > { %1681 = vmatprep.subr.bf16.mxu0 %v1680_v6  ;;  %1707 = vmatprep.subr.bf16.mxu1 %v1680_v6 }
 0x22c   : > { %1683 = vmatpush1.bf16.msra.mxu0 %v1682_v9  ;;  %1715 = vmatpush1.bf16.msra.mxu1 %v1682_v9 }
 0x22f   : > { %732 = vmatmul.mubr.f32.vlgmr.msra.gmra.mrb[0].mxu0 %v609_v10  ;;  %780 = vmatmul.mubr.f32.vlgmr.msra.gmra.mrb[0].mxu1 %v617_v11 }
 0x230   : > { %737 = vmatprep.mubr.f32.mxu0 %v2258_v32  ;;  %785 = vmatprep.mubr.f32.mxu1 %v2258_v32 }
 0x233   : > { %738 = vmatmul.mubr.f32.gmra.mrb[2].mxu0 %v610_v12  ;;  %786 = vmatmul.mubr.f32.gmra.mrb[2].mxu1 %v618_v13 }
 0x234   : > { %743 = vmatprep.mubr.f32.mxu0 %v2258_v32  ;;  %791 = vmatprep.mubr.f32.mxu1 %v2258_v32 }
 0x237   : > { %744 = vmatmul.mubr.f32.gmra.mrb[4].mxu0 %v611_v14  ;;  %792 = vmatmul.mubr.f32.gmra.mrb[4].mxu1 %v619_v15 }
 0x238   : > { %749 = vmatprep.mubr.f32.mxu0 %v2258_v32  ;;  %797 = vmatprep.mubr.f32.mxu1 %v2258_v32 }
 0x23b   : > { %750 = vmatmul.mubr.f32.gmra.mrb[6].mxu0 %v612_v16  ;;  %798 = vmatmul.mubr.f32.gmra.mrb[6].mxu1 %v620_v17 }
 0x23c   : > { %755 = vmatprep.mubr.f32.mxu0 %v2258_v32  ;;  %803 = vmatprep.mubr.f32.mxu1 %v2258_v32 }
 0x23f   : > { %756 = vmatmul.mubr.f32.gmra.mrb[8].mxu0 %v613_v18  ;;  %804 = vmatmul.mubr.f32.gmra.mrb[8].mxu1 %v621_v19 }
 0x240   : > { %761 = vmatprep.mubr.f32.mxu0 %v2258_v32  ;;  %809 = vmatprep.mubr.f32.mxu1 %v2258_v32 }
 0x243   : > { %762 = vmatmul.mubr.f32.gmra.mrb[10].mxu0 %v614_v20  ;;  %810 = vmatmul.mubr.f32.gmra.mrb[10].mxu1 %v622_v21 }
 0x244   : > { %767 = vmatprep.mubr.f32.mxu0 %v2258_v32  ;;  %815 = vmatprep.mubr.f32.mxu1 %v2258_v32 }
 0x247   : > { %768 = vmatmul.mubr.f32.gmra.mrb[12].mxu0 %v615_v22  ;;  %816 = vmatmul.mubr.f32.gmra.mrb[12].mxu1 %v623_v23 }
 0x248   : > { %773 = vmatprep.mubr.f32.mxu0 %v2258_v32  ;;  %821 = vmatprep.mubr.f32.mxu1 %v2258_v32  ;;  %v2772_v32 = vrot.slane %v2766_v30, %v661_v28 }
 0x24b   : > { %774 = vmatmul.mubr.f32.gmra.mrb[14].mxu0 %v616_v24  ;;  %822 = vmatmul.mubr.f32.gmra.mrb[14].mxu1 %v624_v25 }
 0x302   : > { %v733_v33 = vpop.f32.mrb[0].mxu0  ;;  %v781_v34 = vpop.f32.mrb[0].mxu1 }
 0x303   : > { %v734_v35 = vadd.f32 %v733_v33, %v2769_v31  ;;  %v782_v36 = vadd.f32 %v781_v34, %v2769_v31  ;;  %v735_v37 = vpop.f32.mrb[1].mxu0  ;;  %v783_v38 = vpop.f32.mrb[1].mxu1 }
 0x304   : > { %v736_v39 = vadd.f32 %v735_v37, %v2772_v32  ;;  %v784_v40 = vadd.f32 %v783_v38, %v2772_v32 }
 0x305   : > { %v860_v41 = vmul.f32 0.70710677, %v734_v35  ;;  %v876_v43 = vmul.f32 0.70710677, %v782_v36  ;;  %v828_v7 = vmul.f32 0.5, %v734_v35  ;;  %v2810_v15 = vmul.f32 0.5, %v782_v36 }
 0x306   : > { %v861_v42 = vmul.f32 0.70710677, %v736_v39  ;;  %v739_v44 = vpop.f32.mrb[2].mxu0  ;;  %v787_v45 = vpop.f32.mrb[2].mxu1  ;;  %v877_v46 = vmul.f32 0.70710677, %v784_v40 }
 0x307   : > { %1884 = verf.f32 %v860_v41  ;;  %v740_v47 = vadd.f32 %v739_v44, %v2769_v31  ;;  %v788_v48 = vadd.f32 %v787_v45, %v2769_v31  ;;  %v741_v49 = vpop.f32.mrb[3].mxu0  ;;  %v789_v50 = vpop.f32.mrb[3].mxu1  ;;  %v829_v16 = vmul.f32 0.5, %v736_v39 }
 0x308   : > { %1886 = verf.f32 %v861_v42  ;;  %v742_v51 = vadd.f32 %v741_v49, %v2772_v32  ;;  %v2782_v52 = vadd.f32 %v789_v50, %v2772_v32  ;;  %v2813_v21 = vmul.f32 0.5, %v784_v40 }
 0x309   : > { %v862_v53 = vmul.f32 0.70710677, %v740_v47  ;;  %1888 = verf.f32 %v876_v43  ;;  %v878_v56 = vmul.f32 0.70710677, %v788_v48  ;;  %v2815_v22 = vmul.f32 0.5, %v740_v47 }
 0x30a   : > { %v745_v54 = vpop.f32.mrb[4].mxu0  ;;  %v793_v55 = vpop.f32.mrb[4].mxu1  ;;  %v863_v57 = vmul.f32 0.70710677, %v742_v51  ;;  %1890 = verf.f32 %v877_v46  ;;  %v879_v58 = vmul.f32 0.70710677, %v2782_v52 }
 0x30b   : > { %v746_v59 = vadd.f32 %v745_v54, %v2769_v31  ;;  %v2787_v60 = vadd.f32 %v793_v55, %v2769_v31  ;;  %v747_v61 = vpop.f32.mrb[5].mxu0  ;;  %v795_v62 = vpop.f32.mrb[5].mxu1  ;;  %1892 = verf.f32 %v862_v53  ;;  %v2818_v26 = vmul.f32 0.5, %v788_v48 }
 0x30c   : > { %v2790_v63 = vadd.f32 %v747_v61, %v2772_v32  ;;  %v2793_v0 = vadd.f32 %v795_v62, %v2772_v32  ;;  %1894 = verf.f32 %v878_v56  ;;  %v2835_v40 = vmul.f32 0.5, %v742_v51 }
 0x30d   : > { %v864_v1 = vmul.f32 0.70710677, %v746_v59  ;;  %1896 = verf.f32 %v863_v57  ;;  %v880_v4 = vmul.f32 0.70710677, %v2787_v60  ;;  %v2843_v46 = vmul.f32 0.5, %v2782_v52 }
 0x30e   : > { %v751_v2 = vpop.f32.mrb[6].mxu0  ;;  %v799_v3 = vpop.f32.mrb[6].mxu1  ;;  %v865_v5 = vmul.f32 0.70710677, %v2790_v63  ;;  %1898 = verf.f32 %v879_v58  ;;  %v881_v8 = vmul.f32 0.70710677, %v2793_v0 }
 0x30f   : > { %v753_v6 = vpop.f32.mrb[7].mxu0  ;;  %v2799_v9 = vadd.f32 %v751_v2, %v2769_v31  ;;  %v801_v10 = vpop.f32.mrb[7].mxu1  ;;  %1900 = verf.f32 %v864_v1  ;;  %v2802_v12 = vadd.f32 %v799_v3, %v2769_v31  ;;  %v2845_v47 = vmul.f32 0.5, %v746_v59 }
 0x310   : > { %v2805_v13 = vadd.f32 %v753_v6, %v2772_v32  ;;  %v2808_v14 = vadd.f32 %v801_v10, %v2772_v32  ;;  %1902 = verf.f32 %v880_v4  ;;  %v2875_v6 = vmul.f32 0.5, %v2790_v63 }
 0x311   : > { %v1885_v11 = vpop.eup %1884  ;;  %v866_v17 = vmul.f32 0.70710677, %v2799_v9  ;;  %1904 = verf.f32 %v865_v5  ;;  %v882_v23 = vmul.f32 0.70710677, %v2802_v12  ;;  %v2872_v5 = vmul.f32 0.5, %v2787_v60 }
 0x312   : > { %v757_v18 = vpop.f32.mrb[8].mxu0  ;;  %v805_v19 = vpop.f32.mrb[8].mxu1  ;;  %1906 = verf.f32 %v881_v8  ;;  %v867_v28 = vmul.f32 0.70710677, %v2805_v13  ;;  %v924_v33 = vadd.f32 1.0, %v1885_v11  ;;  %v2888_v63 = vmul.f32 0.5, %v2802_v12 }
 0x313   : > { %v1887_v20 = vpop.eup %1886  ;;  %v759_v24 = vpop.f32.mrb[9].mxu0  ;;  %v883_v35 = vmul.f32 0.70710677, %v2808_v14  ;;  %v2825_v36 = vadd.f32 %v757_v18, %v2769_v31  ;;  %v2828_v37 = vadd.f32 %v805_v19, %v2769_v31  ;;  %1908 = verf.f32 %v866_v17 }
 0x314   : > { %v807_v25 = vpop.f32.mrb[9].mxu1  ;;  %v2821_v34 = vpop.eup %1888  ;;  %v2831_v38 = vadd.f32 %v759_v24, %v2772_v32  ;;  %v925_v44 = vadd.f32 1.0, %v1887_v20  ;;  %1910 = verf.f32 %v882_v23  ;;  %v2850_v55 = vmul.f32 %v924_v33, %v828_v7 }
 0x315   : > { %v2833_v39 = vpop.eup %1890  ;;  %v2838_v41 = vadd.f32 %v807_v25, %v2772_v32  ;;  %v868_v48 = vmul.f32 0.70710677, %v2825_v36  ;;  %1912 = verf.f32 %v867_v28  ;;  %v884_v53 = vmul.f32 0.70710677, %v2828_v37 }
 0x316   : > { %v763_v42 = vpop.f32.mrb[10].mxu0  ;;  %v811_v43 = vpop.f32.mrb[10].mxu1  ;;  %v869_v54 = vmul.f32 0.70710677, %v2831_v38  ;;  %1914 = verf.f32 %v883_v35  ;;  %v2867_v1 = vmul.f32 %v925_v44, %v829_v16  ;;  %v2881_v16 = vmul.f32 0.5, %v2793_v0 }
 0x317   : > { %v2840_v45 = vpop.eup %1892  ;;  %v765_v49 = vpop.f32.mrb[11].mxu0  ;;  %v885_v52 = vmul.f32 0.70710677, %v2838_v41  ;;  %v2856_v57 = vadd.f32 %v763_v42, %v2769_v31  ;;  %v2859_v58 = vadd.f32 %v811_v43, %v2769_v31  ;;  %1916 = verf.f32 %v868_v48 }
 0x318   : > { %v813_v50 = vpop.f32.mrb[11].mxu1  ;;  %v1895_v51 = vpop.eup %1894  ;;  %v2862_v61 = vadd.f32 %v765_v49, %v2772_v32  ;;  %1918 = verf.f32 %v884_v53  ;;  %v2884_v17 = vmul.f32 0.5, %v2799_v9  ;;  %v988_v20 = vadd.f32 %v2867_v1, %v2850_v55 }
 0x319   : > { %v2852_v56 = vpop.eup %1896  ;;  %v2865_v62 = vadd.f32 %v813_v50, %v2772_v32  ;;  %v870_v7 = vmul.f32 0.70710677, %v2856_v57  ;;  %1920 = verf.f32 %v869_v54  ;;  %v886_v60 = vmul.f32 0.70710677, %v2859_v58 }
 0x31a   : > { %v1899_v59 = vpop.eup %1898  ;;  %v769_v2 = vpop.f32.mrb[12].mxu0  ;;  %1922 = verf.f32 %v885_v52  ;;  %v871_v19 = vmul.f32 0.70710677, %v2862_v61  ;;  %989 = vadd.xlane.f32.xlu0 %v988_v20  ;;  %v942_v35 = vadd.f32 1.0, %v1895_v51  ;;  %v2909_v49 = vmul.f32 0.5, %v2805_v13 }
 0x31b   : > { %v817_v3 = vpop.f32.mrb[12].mxu1  ;;  %v2869_v4 = vpop.eup %1900  ;;  %v887_v0 = vmul.f32 0.70710677, %v2865_v62  ;;  %v2897_v9 = vadd.f32 %v769_v2, %v2769_v31  ;;  %1924 = verf.f32 %v870_v7  ;;  %v943_v42 = vadd.f32 1.0, %v1899_v59 }
 0x31c   : > { %v771_v8 = vpop.f32.mrb[13].mxu0  ;;  %v819_v10 = vpop.f32.mrb[13].mxu1  ;;  %v2900_v24 = vadd.f32 %v817_v3, %v2769_v31  ;;  %v2912_v50 = vmul.f32 0.5, %v2808_v14  ;;  %1926 = verf.f32 %v886_v60  ;;  %v2916_v52 = vmul.f32 0.5, %v2825_v36 }
 0x31d   : > { %v2878_v11 = vpop.eup %1902  ;;  %v2903_v25 = vadd.f32 %v771_v8, %v2772_v32  ;;  %v2906_v33 = vadd.f32 %v819_v10, %v2772_v32  ;;  %v872_v53 = vmul.f32 0.70710677, %v2897_v9  ;;  %1928 = verf.f32 %v871_v19 }
 0x31e   : > { %v1905_v18 = vpop.eup %1904  ;;  %v775_v12 = vpop.f32.mrb[14].mxu0  ;;  %v888_v51 = vmul.f32 0.70710677, %v2900_v24  ;;  %1930 = verf.f32 %v887_v0  ;;  %v2922_v3 = vmul.f32 %v942_v35, %v2818_v26  ;;  %v2925_v14 = vmul.f32 %v943_v42, %v2843_v46 }
 0x31f   : > { %v2893_v23 = vpop.eup %1906  ;;  %v823_v28 = vpop.f32.mrb[14].mxu1  ;;  %v873_v59 = vmul.f32 0.70710677, %v2903_v25  ;;  %v889_v13 = vmul.f32 0.70710677, %v2906_v33  ;;  %1932 = verf.f32 %v872_v53  ;;  %v940_v36 = vadd.f32 1.0, %v2821_v34 }
 0x320   : > { %v777_v43 = vpop.f32.mrb[15].mxu0  ;;  %v825_v44 = vpop.f32.mrb[15].mxu1  ;;  %v941_v8 = vadd.f32 1.0, %v2833_v39  ;;  %v2930_v10 = vadd.f32 %v775_v12, %v2769_v31  ;;  %1934 = verf.f32 %v888_v51  ;;  %v1015_v19 = vadd.f32 %v2925_v14, %v2922_v3 }
 0x321   : > { %v1909_v48 = vpop.eup %1908  ;;  %v2935_v26 = vadd.f32 %v823_v28, %v2769_v31  ;;  %v2938_v46 = vadd.f32 %v777_v43, %v2772_v32  ;;  %v837_v0 = vmul.f32 0.5, %v2831_v38  ;;  %1936 = verf.f32 %v873_v59 }
 0x322   : > { %v1911_v54 = vpop.eup %1910  ;;  %v2942_v34 = vmul.f32 %v940_v36, %v2810_v15  ;;  %v2945_v39 = vmul.f32 %v941_v8, %v2813_v21  ;;  %v838_v35 = vmul.f32 0.5, %v2856_v57  ;;  %1938 = verf.f32 %v889_v13  ;;  %1016 = vadd.xlane.f32.xlu1 %v1015_v19 }
 0x323   : > { %v1913_v2 = vpop.eup %1912  ;;  %v874_v31 = vmul.f32 0.70710677, %v2930_v10  ;;  %v890_v28 = vmul.f32 0.70710677, %v2935_v26  ;;  %v875_v43 = vmul.f32 0.70710677, %v2938_v46  ;;  %v2954_v15 = vadd.f32 %v825_v44, %v2772_v32 }
 0x324   : > { %v1915_v7 = vpop.eup %1914  ;;  %v1012_v38 = vadd.f32 %v2945_v39, %v2942_v34  ;;  %v928_v21 = vadd.f32 1.0, %v2869_v4  ;;  %v929_v53 = vadd.f32 1.0, %v1905_v18  ;;  %v926_v57 = vadd.f32 1.0, %v2840_v45 }
 0x325   : > { %v1917_v60 = vpop.eup %1916  ;;  %1940 = verf.f32 %v874_v31  ;;  %v927_v51 = vadd.f32 1.0, %v2852_v56  ;;  %v839_v13 = vmul.f32 0.5, %v2862_v61  ;;  %v891_v36 = vmul.f32 0.70710677, %v2954_v15 }
 0x326   : > { %v1919_v20 = vpop.eup %1918  ;;  %1013 = vadd.xlane.f32.xlu0 %v1012_v38  ;;  %1942 = verf.f32 %v890_v28  ;;  %v2962_v8 = vmul.f32 %v928_v21, %v2845_v47  ;;  %v2965_v4 = vmul.f32 %v929_v53, %v2875_v6  ;;  %v2968_v18 = vmul.f32 %v926_v57, %v2815_v22 }
 0x327   : > { %v1921_v12 = vpop.eup %1920  ;;  %1944 = verf.f32 %v875_v43  ;;  %v2971_v45 = vmul.f32 %v927_v51, %v2835_v40  ;;  %v930_v61 = vadd.f32 1.0, %v1909_v48  ;;  %v931_v44 = vadd.f32 1.0, %v1913_v2 }
 0x328   : > { %v1923_v42 = vpop.eup %1922  ;;  %1946 = verf.f32 %v891_v36  ;;  %v944_v19 = vadd.f32 1.0, %v2878_v11  ;;  %v994_v47 = vadd.f32 %v2965_v4, %v2962_v8  ;;  %v945_v28 = vadd.f32 1.0, %v2893_v23 }
 0x329   : > { %v1925_v59 = vpop.eup %1924  ;;  %v991_v6 = vadd.f32 %v2971_v45, %v2968_v18  ;;  %v946_v22 = vadd.f32 1.0, %v1911_v54  ;;  %v2980_v40 = vmul.f32 %v930_v61, %v2884_v17  ;;  %v2983_v43 = vmul.f32 %v931_v44, %v2909_v49 }
 0x32a   : > { %v1927_v32 = vpop.eup %1926  ;;  %v2986_v48 = vmul.f32 %v944_v19, %v2872_v5  ;;  %v947_v11 = vadd.f32 1.0, %v1915_v7  ;;  %995 = vadd.xlane.f32.xlu1 %v994_v47  ;;  %v2989_v21 = vmul.f32 %v945_v28, %v2881_v16  ;;  %v932_v54 = vadd.f32 1.0, %v1917_v60 }
 0x32b   : > { %v1929_v56 = vpop.eup %1928  ;;  %992 = vadd.xlane.f32.xlu0 %v991_v6  ;;  %v2992_v23 = vmul.f32 %v946_v22, %v2888_v63  ;;  %v933_v53 = vadd.f32 1.0, %v1921_v12  ;;  %v997_v49 = vadd.f32 %v2983_v43, %v2980_v40  ;;  %v934_v5 = vadd.f32 1.0, %v1925_v59 }
 0x32c   : > { %v1931_v31 = vpop.eup %1930  ;;  %v2997_v57 = vmul.f32 %v947_v11, %v2912_v50  ;;  %v935_v7 = vadd.f32 1.0, %v1929_v56  ;;  %v1018_v36 = vadd.f32 %v2989_v21, %v2986_v48  ;;  %v3002_v16 = vmul.f32 %v932_v54, %v2916_v52 }
 0x32d   : > { %v1933_v38 = vpop.eup %1932  ;;  %v3004_v63 = vmul.f32 %v933_v53, %v837_v0  ;;  %v948_v60 = vadd.f32 1.0, %v1919_v20  ;;  %v3006_v12 = vmul.f32 %v934_v5, %v838_v35  ;;  %v949_v44 = vadd.f32 1.0, %v1923_v42 }
 0x32e   : > { %v1935_v2 = vpop.eup %1934  ;;  %v3008_v61 = vmul.f32 %v935_v7, %v839_v13  ;;  %v852_v50 = vmul.f32 0.5, %v2828_v37  ;;  %v853_v59 = vmul.f32 0.5, %v2838_v41  ;;  %v840_v56 = vmul.f32 0.5, %v2897_v9  ;;  %998 = vadd.xlane.f32.xlu1 %v997_v49 }
 0x32f   : > { %v1937_v17 = vpop.eup %1936  ;;  %1019 = vadd.xlane.f32.xlu0 %v1018_v36  ;;  %v1000_v52 = vadd.f32 %v3004_v63, %v3002_v16  ;;  %v950_v47 = vadd.f32 1.0, %v1927_v32  ;;  %v951_v20 = vadd.f32 1.0, %v1931_v31  ;;  %v936_v35 = vadd.f32 1.0, %v1933_v38 }
 0x330   : > { %v1939_v51 = vpop.eup %1938  ;;  %v937_v6 = vadd.f32 1.0, %v1937_v17  ;;  %v841_v42 = vmul.f32 0.5, %v2903_v25  ;;  %v1021_v37 = vadd.f32 %v2997_v57, %v2992_v23  ;;  %v3018_v28 = vmul.f32 %v948_v60, %v852_v50 }
 0x331   : > { %v1941_v19 = vpop.eup %1940  ;;  %v3020_v41 = vmul.f32 %v949_v44, %v853_v59  ;;  %v854_v22 = vmul.f32 0.5, %v2859_v58  ;;  %v855_v11 = vmul.f32 0.5, %v2865_v62  ;;  %v1003_v32 = vadd.f32 %v3008_v61, %v3006_v12 }
 0x332   : > { %v1943_v0 = vpop.eup %1942  ;;  %1022 = vadd.xlane.f32.xlu1 %v1021_v37  ;;  %v3026_v31 = vmul.f32 %v936_v35, %v840_v56  ;;  %v3028_v25 = vmul.f32 %v937_v6, %v841_v42  ;;  %v938_v38 = vadd.f32 1.0, %v1941_v19  ;;  %v842_v53 = vmul.f32 0.5, %v2930_v10 }
 0x333   : > { %v1945_v13 = vpop.eup %1944  ;;  %1001 = vadd.xlane.f32.xlu0 %v1000_v52  ;;  %v3031_v17 = vmul.f32 %v950_v47, %v854_v22  ;;  %v3033_v49 = vmul.f32 %v951_v20, %v855_v11  ;;  %v843_v58 = vmul.f32 0.5, %v2938_v46  ;;  %v1024_v62 = vadd.f32 %v3020_v41, %v3018_v28 }
 0x334   : > { %v1947_v9 = vpop.eup %1946  ;;  %v939_v54 = vadd.f32 1.0, %v1945_v13  ;;  %v952_v5 = vadd.f32 1.0, %v1935_v2  ;;  %v953_v7 = vadd.f32 1.0, %v1939_v51  ;;  %v856_v36 = vmul.f32 0.5, %v2900_v24 }
 0x335   : > { %v857_v60 = vmul.f32 0.5, %v2906_v33  ;;  %v1006_v10 = vadd.f32 %v3028_v25, %v3026_v31  ;;  %v3042_v44 = vmul.f32 %v938_v38, %v842_v53  ;;  %v1027_v46 = vadd.f32 %v3033_v49, %v3031_v17 }
 0x336   : > { %1004 = vadd.xlane.f32.xlu1 %v1003_v32  ;;  %v3044_v19 = vmul.f32 %v939_v54, %v843_v58  ;;  %v3048_v50 = vmul.f32 %v952_v5, %v856_v36  ;;  %v954_v51 = vadd.f32 1.0, %v1943_v0  ;;  %v955_v24 = vadd.f32 1.0, %v1947_v9 }
 0x337   : > { %1025 = vadd.xlane.f32.xlu0 %v1024_v62  ;;  %v3050_v2 = vmul.f32 %v953_v7, %v857_v60  ;;  %v858_v33 = vmul.f32 0.5, %v2935_v26  ;;  %v859_v59 = vmul.f32 0.5, %v2954_v15 }
 0x338   : > { %v1009_v56 = vadd.f32 %v3044_v19, %v3042_v44 }
 0x339   : > { %v1030_v52 = vadd.f32 %v3050_v2, %v3048_v50  ;;  %v3058_v47 = vmul.f32 %v954_v51, %v858_v33  ;;  %v3060_v20 = vmul.f32 %v955_v24, %v859_v59 }
 0x33a   : > { %1028 = vadd.xlane.f32.xlu1 %v1027_v46 }
 0x33b   : > { %1007 = vadd.xlane.f32.xlu0 %v1006_v10  ;;  %v1033_v0 = vadd.f32 %v3060_v20, %v3058_v47 }
 0x33e   : > { %1010 = vadd.xlane.f32.xlu1 %v1009_v56 }
 0x33f   : > { %1031 = vadd.xlane.f32.xlu0 %v1030_v52 }
 0x342   : > { %1034 = vadd.xlane.f32.xlu1 %v1033_v0 }
 0x3a7   : > { %v990_v26 = vpop.xlane.xlu0 %989 }
 0x3a8   : > { %v1037_v15 = vmul.f32 0.00390625, %v990_v26 }
 0x3aa   : > { %v3065_v35 = vsub.f32 %v2850_v55, %v1037_v15  ;;  %v3068_v6 = vsub.f32 %v2867_v1, %v1037_v15 }
 0x3ac   : > { %v1085_v13 = vmul.f32 %v3065_v35, %v3065_v35  ;;  %v1086_v42 = vmul.f32 %v3068_v6, %v3068_v6 }
 0x3ae   : > { %v1117_v37 = vadd.f32 %v1086_v42, %v1085_v13 }
 0x3af   : > { %v1017_v9 = vpop.xlane.xlu1 %1016 }
 0x3b0   : > { %1118 = vadd.xlane.f32.xlu0 %v1117_v37  ;;  %v1046_v38 = vmul.f32 0.00390625, %v1017_v9 }
 0x3b2   : > { %v3097_v10 = vsub.f32 %v2922_v3, %v1046_v38  ;;  %v3100_v46 = vsub.f32 %v2925_v14, %v1046_v38 }
 0x3b3   : > { %v1014_v22 = vpop.xlane.xlu0 %1013 }
 0x3b4   : > { %v1045_v11 = vmul.f32 0.00390625, %v1014_v22  ;;  %v1103_v42 = vmul.f32 %v3097_v10, %v3097_v10 }
 0x3b6   : > { %v3075_v32 = vsub.f32 %v2942_v34, %v1045_v11  ;;  %v3078_v55 = vsub.f32 %v2945_v39, %v1045_v11 }
 0x3b7   : > { %v996_v1 = vpop.xlane.xlu1 %995 }
 0x3b8   : > { %v993_v54 = vpop.xlane.xlu0 %992  ;;  %v1101_v53 = vmul.f32 %v3075_v32, %v3075_v32  ;;  %v1102_v58 = vmul.f32 %v3078_v55, %v3078_v55  ;;  %v1039_v62 = vmul.f32 0.00390625, %v996_v1 }
 0x3b9   : > { %v1038_v5 = vmul.f32 0.00390625, %v993_v54 }
 0x3ba   : > { %v1141_v7 = vadd.f32 %v1102_v58, %v1101_v53  ;;  %v3085_v36 = vsub.f32 %v2962_v8, %v1039_v62  ;;  %v3088_v34 = vsub.f32 %v2965_v4, %v1039_v62 }
 0x3bb   : > { %v3091_v39 = vsub.f32 %v2968_v18, %v1038_v5  ;;  %v3094_v60 = vsub.f32 %v2971_v45, %v1038_v5  ;;  %v999_v51 = vpop.xlane.xlu1 %998 }
 0x3bc   : > { %v1020_v24 = vpop.xlane.xlu0 %1019  ;;  %1142 = vadd.xlane.f32.xlu0 %v1141_v7  ;;  %v1040_v8 = vmul.f32 0.00390625, %v999_v51  ;;  %v1089_v4 = vmul.f32 %v3085_v36, %v3085_v36  ;;  %v1090_v18 = vmul.f32 %v3088_v34, %v3088_v34 }
 0x3bd   : > { %v1047_v33 = vmul.f32 0.00390625, %v1020_v24  ;;  %v1087_v45 = vmul.f32 %v3091_v39, %v3091_v39  ;;  %v1088_v3 = vmul.f32 %v3094_v60, %v3094_v60 }
 0x3be   : > { %v3111_v14 = vsub.f32 %v2980_v40, %v1040_v8  ;;  %v3114_v59 = vsub.f32 %v2983_v43, %v1040_v8  ;;  %v1123_v15 = vadd.f32 %v1090_v18, %v1089_v4  ;;  %v1104_v40 = vmul.f32 %v3100_v46, %v3100_v46 }
 0x3bf   : > { %v3117_v56 = vsub.f32 %v2986_v48, %v1047_v33  ;;  %v3120_v52 = vsub.f32 %v2989_v21, %v1047_v33  ;;  %v1023_v0 = vpop.xlane.xlu1 %1022  ;;  %v1120_v13 = vadd.f32 %v1088_v3, %v1087_v45 }
 0x3c0   : > { %v1002_v26 = vpop.xlane.xlu0 %1001  ;;  %v1048_v37 = vmul.f32 0.00390625, %v1023_v0  ;;  %1124 = vadd.xlane.f32.xlu0 %v1123_v15  ;;  %v1091_v21 = vmul.f32 %v3111_v14, %v3111_v14  ;;  %v1092_v1 = vmul.f32 %v3114_v59, %v3114_v59  ;;  %v1144_v62 = vadd.f32 %v1104_v40, %v1103_v42 }
 0x3c1   : > { %v1041_v9 = vmul.f32 0.00390625, %v1002_v26  ;;  %v1105_v43 = vmul.f32 %v3117_v56, %v3117_v56  ;;  %v1106_v48 = vmul.f32 %v3120_v52, %v3120_v52  ;;  %1121 = vadd.xlane.f32.xlu1 %v1120_v13 }
 0x3c2   : > { %v3133_v22 = vsub.f32 %v2992_v23, %v1048_v37  ;;  %v3144_v54 = vsub.f32 %v2997_v57, %v1048_v37  ;;  %v1126_v24 = vadd.f32 %v1092_v1, %v1091_v21 }
 0x3c3   : > { %v3136_v11 = vsub.f32 %v3002_v16, %v1041_v9  ;;  %v3139_v38 = vsub.f32 %v3004_v63, %v1041_v9  ;;  %v1005_v53 = vpop.xlane.xlu1 %1004  ;;  %v1147_v5 = vadd.f32 %v1106_v48, %v1105_v43 }
 0x3c4   : > { %v1026_v58 = vpop.xlane.xlu0 %1025  ;;  %v1042_v7 = vmul.f32 0.00390625, %v1005_v53  ;;  %v1107_v8 = vmul.f32 %v3133_v22, %v3133_v22 }
 0x3c5   : > { %v1049_v51 = vmul.f32 0.00390625, %v1026_v58  ;;  %v1093_v23 = vmul.f32 %v3136_v11, %v3136_v11  ;;  %v1094_v16 = vmul.f32 %v3139_v38, %v3139_v38  ;;  %1145 = vadd.xlane.f32.xlu1 %v1144_v62  ;;  %1148 = vadd.xlane.f32.xlu0 %v1147_v5 }
 0x3c6   : > { %v3159_v33 = vsub.f32 %v3006_v12, %v1042_v7  ;;  %v3162_v4 = vsub.f32 %v3008_v61, %v1042_v7 }
 0x3c7   : > { %v3151_v63 = vsub.f32 %v3018_v28, %v1049_v51  ;;  %v3154_v57 = vsub.f32 %v3020_v41, %v1049_v51  ;;  %v1029_v18 = vpop.xlane.xlu1 %1028  ;;  %v1129_v3 = vadd.f32 %v1094_v16, %v1093_v23  ;;  %v1108_v28 = vmul.f32 %v3144_v54, %v3144_v54 }
 0x3c8   : > { %v1008_v45 = vpop.xlane.xlu0 %1007  ;;  %v1050_v0 = vmul.f32 0.00390625, %v1029_v18  ;;  %v1095_v48 = vmul.f32 %v3159_v33, %v3159_v33 }
 0x3c9   : > { %v1043_v26 = vmul.f32 0.00390625, %v1008_v45  ;;  %v1109_v41 = vmul.f32 %v3151_v63, %v3151_v63  ;;  %v1110_v15 = vmul.f32 %v3154_v57, %v3154_v57  ;;  %1127 = vadd.xlane.f32.xlu1 %v1126_v24  ;;  %1130 = vadd.xlane.f32.xlu0 %v1129_v3  ;;  %v1150_v9 = vadd.f32 %v1108_v28, %v1107_v8 }
 0x3ca   : > { %v3171_v12 = vsub.f32 %v3031_v17, %v1050_v0  ;;  %v3174_v61 = vsub.f32 %v3033_v49, %v1050_v0  ;;  %v1096_v17 = vmul.f32 %v3162_v4, %v3162_v4 }
 0x3cb   : > { %v3177_v13 = vsub.f32 %v3026_v31, %v1043_v26  ;;  %v3180_v42 = vsub.f32 %v3028_v25, %v1043_v26  ;;  %v1011_v40 = vpop.xlane.xlu1 %1010  ;;  %v1153_v43 = vadd.f32 %v1110_v15, %v1109_v41 }
 0x3cc   : > { %v1032_v37 = vpop.xlane.xlu0 %1031  ;;  %v1044_v21 = vmul.f32 0.00390625, %v1011_v40  ;;  %v1111_v58 = vmul.f32 %v3171_v12, %v3171_v12  ;;  %v1112_v62 = vmul.f32 %v3174_v61, %v3174_v61  ;;  %v1132_v23 = vadd.f32 %v1096_v17, %v1095_v48 }
 0x3cd   : > { %v1051_v1 = vmul.f32 0.00390625, %v1032_v37  ;;  %v1097_v49 = vmul.f32 %v3177_v13, %v3177_v13  ;;  %v1098_v31 = vmul.f32 %v3180_v42, %v3180_v42  ;;  %1151 = vadd.xlane.f32.xlu1 %v1150_v9  ;;  %1154 = vadd.xlane.f32.xlu0 %v1153_v43  ;;  %v1247_v40 = vsub.s32 1, %v2755_v27 }
 0x3ce   : > { %v3201_v5 = vsub.f32 %v3042_v44, %v1044_v21  ;;  %v3204_v7 = vsub.f32 %v3044_v19, %v1044_v21  ;;  %v1156_v8 = vadd.f32 %v1112_v62, %v1111_v58  ;;  %v1287_v43 = vsub.s32 2, %v2755_v27 }
 0x3cf   : > { %v3191_v25 = vsub.f32 %v3048_v50, %v1051_v1  ;;  %v3194_v53 = vsub.f32 %v3050_v2, %v1051_v1  ;;  %v1035_v51 = vpop.xlane.xlu1 %1034  ;;  %v1135_v16 = vadd.f32 %v1098_v31, %v1097_v49  ;;  %v3227_v17 = vrot.slane %v2761_v29, %v1247_v40 }
 0x3d0   : > { %v1052_v50 = vmul.f32 0.00390625, %v1035_v51  ;;  %v1099_v45 = vmul.f32 %v3201_v5, %v3201_v5  ;;  %v1100_v3 = vmul.f32 %v3204_v7, %v3204_v7  ;;  %v3230_v21 = vrot.slane %v2766_v30, %v1247_v40 }
 0x3d1   : > { %v1113_v2 = vmul.f32 %v3191_v25, %v3191_v25  ;;  %v1114_v24 = vmul.f32 %v3194_v53, %v3194_v53  ;;  %1133 = vadd.xlane.f32.xlu1 %v1132_v23  ;;  %1136 = vadd.xlane.f32.xlu0 %v1135_v16  ;;  %v3233_v49 = vrot.slane %v2761_v29, %v1287_v43 }
 0x3d2   : > { %v3211_v44 = vsub.f32 %v3058_v47, %v1052_v50  ;;  %v3214_v19 = vsub.f32 %v3060_v20, %v1052_v50  ;;  %v1138_v28 = vadd.f32 %v1100_v3, %v1099_v45  ;;  %v3236_v31 = vrot.slane %v2766_v30, %v1287_v43 }
 0x3d3   : > { %v1159_v18 = vadd.f32 %v1114_v24, %v1113_v2 }
 0x3d4   : > { %v1115_v0 = vmul.f32 %v3211_v44, %v3211_v44  ;;  %v1116_v26 = vmul.f32 %v3214_v19, %v3214_v19 }
 0x3d5   : > { %1157 = vadd.xlane.f32.xlu1 %v1156_v8  ;;  %1160 = vadd.xlane.f32.xlu0 %v1159_v18 }
 0x3d6   : > { %v1162_v47 = vadd.f32 %v1116_v26, %v1115_v0 }
 0x3d9   : > { %1139 = vadd.xlane.f32.xlu1 %v1138_v28 }
 0x3dd   : > { %1163 = vadd.xlane.f32.xlu1 %v1162_v47 }
 0x43d   : > { %v1119_v20 = vpop.xlane.xlu0 %1118 }
 0x43e   : > { %v1165_v41 = vmul.f32 0.00390625, %v1119_v20 }
 0x440   : > { %v1181_v15 = vadd.f32 1e-05, %v1165_v41 }
 0x442   : > { %1948 = vrsqrt.f32 %v1181_v15 }
 0x449   : > { %v1143_v37 = vpop.xlane.xlu0 %1142 }
 0x44a   : > { %v1173_v9 = vmul.f32 0.00390625, %v1143_v37 }
 0x44c   : > { %v1189_v48 = vadd.f32 1e-05, %v1173_v9  ;;  %v1949_v1 = vpop.eup %1948 }
 0x44d   : > { %v1213_v58 = vmul.f32 %v1949_v1, %v3065_v35  ;;  %v1214_v62 = vmul.f32 %v1949_v1, %v3068_v6  ;;  %v1125_v51 = vpop.xlane.xlu0 %1124 }
 0x44e   : > { %1950 = vrsqrt.f32 %v1189_v48  ;;  %v1122_v27 = vpop.xlane.xlu1 %1121  ;;  %v1167_v16 = vmul.f32 0.00390625, %v1125_v51 }
 0x44f   : > { %v1166_v23 = vmul.f32 0.00390625, %v1122_v27  ;;  %v1253_v50 = vmul.f32 %v3227_v17, %v1213_v58  ;;  %v1254_v2 = vmul.f32 %v3230_v21, %v1214_v62 }
 0x450   : > { %v1183_v29 = vadd.f32 1e-05, %v1167_v16 }
 0x451   : > { %v1182_v24 = vadd.f32 1e-05, %v1166_v23  ;;  %v1293_v8 = vadd.f32 %v3233_v49, %v1253_v50  ;;  %v1294_v30 = vadd.f32 %v3236_v31, %v1254_v2 }
 0x452   : > { %v1146_v18 = vpop.xlane.xlu1 %1145  ;;  %v1149_v35 = vpop.xlane.xlu0 %1148 }
 0x453   : > { %1952 = vrsqrt.f32 %v1182_v24  ;;  %v1174_v6 = vmul.f32 0.00390625, %v1146_v18  ;;  %v1175_v45 = vmul.f32 0.00390625, %v1149_v35  ;;  %1325 = vst [vmem:[%s2701_s28] sm:$0xff] %v1293_v8  ;;  %1326 = vst [vmem:[%s2701_s28 + $0x8] sm:$0xff] %v1294_v30 }
 0x454   : > { %1954 = vrsqrt.f32 %v1183_v29 }
 0x455   : > { %v1190_v3 = vadd.f32 1e-05, %v1174_v6  ;;  %v1191_v28 = vadd.f32 1e-05, %v1175_v45 }
 0x456   : > { %v1128_v0 = vpop.xlane.xlu1 %1127  ;;  %v1131_v26 = vpop.xlane.xlu0 %1130 }
 0x457   : > { %1956 = vrsqrt.f32 %v1190_v3  ;;  %v1168_v20 = vmul.f32 0.00390625, %v1128_v0  ;;  %v1169_v41 = vmul.f32 0.00390625, %v1131_v26 }
 0x458   : > { %v1951_v47 = vpop.eup %1950  ;;  %1958 = vrsqrt.f32 %v1191_v28 }
 0x459   : > { %v1229_v15 = vmul.f32 %v1951_v47, %v3075_v32  ;;  %v1230_v40 = vmul.f32 %v1951_v47, %v3078_v55  ;;  %v1184_v37 = vadd.f32 1e-05, %v1168_v20  ;;  %v1185_v9 = vadd.f32 1e-05, %v1169_v41 }
 0x45a   : > { %v1152_v1 = vpop.xlane.xlu1 %1151  ;;  %v1155_v58 = vpop.xlane.xlu0 %1154 }
 0x45b   : > { %v1269_v43 = vmul.f32 %v3227_v17, %v1229_v15  ;;  %v1270_v48 = vmul.f32 %v3230_v21, %v1230_v40  ;;  %1960 = vrsqrt.f32 %v1184_v37  ;;  %v1176_v62 = vmul.f32 0.00390625, %v1152_v1 }
 0x45c   : > { %v1177_v27 = vmul.f32 0.00390625, %v1155_v58  ;;  %1962 = vrsqrt.f32 %v1185_v9 }
 0x45d   : > { %v1309_v51 = vadd.f32 %v3233_v49, %v1269_v43  ;;  %v1310_v32 = vadd.f32 %v3236_v31, %v1270_v48  ;;  %v1953_v55 = vpop.eup %1952  ;;  %v1192_v23 = vadd.f32 1e-05, %v1176_v62 }
 0x45e   : > { %v1193_v16 = vadd.f32 1e-05, %v1177_v27  ;;  %v1955_v50 = vpop.eup %1954  ;;  %v1215_v2 = vmul.f32 %v1953_v55, %v3091_v39  ;;  %v1216_v24 = vmul.f32 %v1953_v55, %v3094_v60  ;;  %v1134_v29 = vpop.xlane.xlu1 %1133 }
 0x45f   : > { %1341 = vst [vmem:[%s2701_s28 + $0x80] sm:$0xff] %v1309_v51  ;;  %1342 = vst [vmem:[%s2701_s28 + $0x88] sm:$0xff] %v1310_v32  ;;  %v1137_v8 = vpop.xlane.xlu0 %1136  ;;  %v1217_v30 = vmul.f32 %v1955_v50, %v3085_v36  ;;  %v1218_v18 = vmul.f32 %v1955_v50, %v3088_v34  ;;  %1964 = vrsqrt.f32 %v1192_v23  ;;  %v1170_v35 = vmul.f32 0.00390625, %v1134_v29 }
 0x460   : > { %v1255_v6 = vmul.f32 %v3227_v17, %v1215_v2  ;;  %v1256_v45 = vmul.f32 %v3230_v21, %v1216_v24  ;;  %1966 = vrsqrt.f32 %v1193_v16  ;;  %v1171_v3 = vmul.f32 0.00390625, %v1137_v8 }
 0x461   : > { %v1957_v28 = vpop.eup %1956  ;;  %v1257_v39 = vmul.f32 %v3227_v17, %v1217_v30  ;;  %v1258_v60 = vmul.f32 %v3230_v21, %v1218_v18  ;;  %v1186_v0 = vadd.f32 1e-05, %v1170_v35 }
 0x462   : > { %v1959_v26 = vpop.eup %1958  ;;  %v1295_v36 = vadd.f32 %v3233_v49, %v1255_v6  ;;  %v1296_v34 = vadd.f32 %v3236_v31, %v1256_v45  ;;  %v1231_v47 = vmul.f32 %v1957_v28, %v3097_v10  ;;  %v1232_v20 = vmul.f32 %v1957_v28, %v3100_v46  ;;  %v1158_v41 = vpop.xlane.xlu1 %1157 }
 0x463   : > { %v1161_v15 = vpop.xlane.xlu0 %1160  ;;  %v1297_v40 = vadd.f32 %v3233_v49, %v1257_v39  ;;  %v1298_v37 = vadd.f32 %v3236_v31, %v1258_v60  ;;  %v1233_v9 = vmul.f32 %v1959_v26, %v3117_v56  ;;  %v1234_v43 = vmul.f32 %v1959_v26, %v3120_v52 }
 0x464   : > { %1327 = vst [vmem:[%s2701_s28 + $0x10] sm:$0xff] %v1295_v36  ;;  %1328 = vst [vmem:[%s2701_s28 + $0x18] sm:$0xff] %v1296_v34  ;;  %v1271_v48 = vmul.f32 %v3227_v17, %v1231_v47  ;;  %v1272_v1 = vmul.f32 %v3230_v21, %v1232_v20  ;;  %1968 = vrsqrt.f32 %v1186_v0  ;;  %v1187_v10 = vadd.f32 1e-05, %v1171_v3 }
 0x465   : > { %v1961_v58 = vpop.eup %1960  ;;  %1329 = vst [vmem:[%s2701_s28 + $0x20] sm:$0xff] %v1297_v40  ;;  %1330 = vst [vmem:[%s2701_s28 + $0x28] sm:$0xff] %v1298_v37  ;;  %v1273_v46 = vmul.f32 %v3227_v17, %v1233_v9  ;;  %v1274_v62 = vmul.f32 %v3230_v21, %v1234_v43  ;;  %v1178_v56 = vmul.f32 0.00390625, %v1158_v41  ;;  %v1179_v27 = vmul.f32 0.00390625, %v1161_v15 }
 0x466   : > { %v1963_v52 = vpop.eup %1962  ;;  %v1311_v51 = vadd.f32 %v3233_v49, %v1271_v48  ;;  %v1312_v32 = vadd.f32 %v3236_v31, %v1272_v1  ;;  %v1219_v55 = vmul.f32 %v1961_v58, %v3111_v14  ;;  %v1220_v23 = vmul.f32 %v1961_v58, %v3114_v59  ;;  %v1140_v16 = vpop.xlane.xlu1 %1139 }
 0x467   : > { %v1313_v50 = vadd.f32 %v3233_v49, %v1273_v46  ;;  %v1314_v2 = vadd.f32 %v3236_v31, %v1274_v62  ;;  %v1221_v24 = vmul.f32 %v1963_v52, %v3136_v11  ;;  %v1222_v29 = vmul.f32 %v1963_v52, %v3139_v38 }
 0x468   : > { %1343 = vst [vmem:[%s2701_s28 + $0x90] sm:$0xff] %v1311_v51  ;;  %1344 = vst [vmem:[%s2701_s28 + $0x98] sm:$0xff] %v1312_v32  ;;  %v1259_v8 = vmul.f32 %v3227_v17, %v1219_v55  ;;  %v1260_v30 = vmul.f32 %v3230_v21, %v1220_v23  ;;  %1970 = vrsqrt.f32 %v1187_v10  ;;  %v1194_v18 = vadd.f32 1e-05, %v1178_v56 }
 0x469   : > { %v1965_v14 = vpop.eup %1964  ;;  %1345 = vst [vmem:[%s2701_s28 + $0xa0] sm:$0xff] %v1313_v50  ;;  %1346 = vst [vmem:[%s2701_s28 + $0xa8] sm:$0xff] %v1314_v2  ;;  %v1261_v59 = vmul.f32 %v3227_v17, %v1221_v24  ;;  %v1262_v35 = vmul.f32 %v3230_v21, %v1222_v29  ;;  %v1195_v11 = vadd.f32 1e-05, %v1179_v27  ;;  %v1172_v6 = vmul.f32 0.00390625, %v1140_v16 }
 0x46a   : > { %v1967_v38 = vpop.eup %1966  ;;  %v1299_v45 = vadd.f32 %v3233_v49, %v1259_v8  ;;  %v1300_v3 = vadd.f32 %v3236_v31, %v1260_v30  ;;  %v1235_v28 = vmul.f32 %v1965_v14, %v3133_v22  ;;  %v1236_v39 = vmul.f32 %v1965_v14, %v3144_v54  ;;  %v1164_v60 = vpop.xlane.xlu1 %1163 }
 0x46b   : > { %v1301_v0 = vadd.f32 %v3233_v49, %v1261_v59  ;;  %v1302_v26 = vadd.f32 %v3236_v31, %v1262_v35  ;;  %v1237_v36 = vmul.f32 %v1967_v38, %v3151_v63  ;;  %v1238_v34 = vmul.f32 %v1967_v38, %v3154_v57 }
 0x46c   : > { %1331 = vst [vmem:[%s2701_s28 + $0x30] sm:$0xff] %v1299_v45  ;;  %1332 = vst [vmem:[%s2701_s28 + $0x38] sm:$0xff] %v1300_v3  ;;  %v1275_v47 = vmul.f32 %v3227_v17, %v1235_v28  ;;  %v1276_v20 = vmul.f32 %v3230_v21, %v1236_v39  ;;  %1972 = vrsqrt.f32 %v1194_v18  ;;  %v1188_v22 = vadd.f32 1e-05, %v1172_v6 }
 0x46d   : > { %1333 = vst [vmem:[%s2701_s28 + $0x40] sm:$0xff] %v1301_v0  ;;  %1334 = vst [vmem:[%s2701_s28 + $0x48] sm:$0xff] %v1302_v26  ;;  %v1277_v54 = vmul.f32 %v3227_v17, %v1237_v36  ;;  %v1278_v63 = vmul.f32 %v3230_v21, %v1238_v34  ;;  %1974 = vrsqrt.f32 %v1195_v11  ;;  %v1180_v57 = vmul.f32 0.00390625, %v1164_v60 }
 0x46e   : > { %v1969_v41 = vpop.eup %1968  ;;  %v1315_v15 = vadd.f32 %v3233_v49, %v1275_v47  ;;  %v1316_v40 = vadd.f32 %v3236_v31, %v1276_v20  ;;  %1976 = vrsqrt.f32 %v1188_v22 }
 0x46f   : > { %v1317_v37 = vadd.f32 %v3233_v49, %v1277_v54  ;;  %v1318_v9 = vadd.f32 %v3236_v31, %v1278_v63  ;;  %v1223_v43 = vmul.f32 %v1969_v41, %v3159_v33  ;;  %v1224_v48 = vmul.f32 %v1969_v41, %v3162_v4 }
 0x470   : > { %1347 = vst [vmem:[%s2701_s28 + $0xb0] sm:$0xff] %v1315_v15  ;;  %1348 = vst [vmem:[%s2701_s28 + $0xb8] sm:$0xff] %v1316_v40  ;;  %v1196_v1 = vadd.f32 1e-05, %v1180_v57 }
 0x471   : > { %1349 = vst [vmem:[%s2701_s28 + $0xc0] sm:$0xff] %v1317_v37  ;;  %1350 = vst [vmem:[%s2701_s28 + $0xc8] sm:$0xff] %v1318_v9  ;;  %v1263_v10 = vmul.f32 %v3227_v17, %v1223_v43  ;;  %v1264_v58 = vmul.f32 %v3230_v21, %v1224_v48 }
 0x472   : > { %v1971_v46 = vpop.eup %1970  ;;  %1978 = vrsqrt.f32 %v1196_v1 }
 0x473   : > { %v1303_v62 = vadd.f32 %v3233_v49, %v1263_v10  ;;  %v1304_v56 = vadd.f32 %v3236_v31, %v1264_v58  ;;  %v1225_v33 = vmul.f32 %v1971_v46, %v3177_v13  ;;  %v1226_v4 = vmul.f32 %v1971_v46, %v3180_v42 }
 0x475   : > { %1335 = vst [vmem:[%s2701_s28 + $0x50] sm:$0xff] %v1303_v62  ;;  %1336 = vst [vmem:[%s2701_s28 + $0x58] sm:$0xff] %v1304_v56  ;;  %v1265_v27 = vmul.f32 %v3227_v17, %v1225_v33  ;;  %v1266_v52 = vmul.f32 %v3230_v21, %v1226_v4 }
 0x476   : > { %v1973_v51 = vpop.eup %1972 }
 0x477   : > { %v1975_v32 = vpop.eup %1974  ;;  %v1305_v55 = vadd.f32 %v3233_v49, %v1265_v27  ;;  %v1306_v23 = vadd.f32 %v3236_v31, %v1266_v52  ;;  %v1239_v16 = vmul.f32 %v1973_v51, %v3171_v12  ;;  %v1240_v50 = vmul.f32 %v1973_v51, %v3174_v61 }
 0x478   : > { %v1977_v13 = vpop.eup %1976  ;;  %v1241_v2 = vmul.f32 %v1975_v32, %v3191_v25  ;;  %v1242_v42 = vmul.f32 %v1975_v32, %v3194_v53 }
 0x479   : > { %1337 = vst [vmem:[%s2701_s28 + $0x60] sm:$0xff] %v1305_v55  ;;  %1338 = vst [vmem:[%s2701_s28 + $0x68] sm:$0xff] %v1306_v23  ;;  %v1279_v24 = vmul.f32 %v3227_v17, %v1239_v16  ;;  %v1280_v29 = vmul.f32 %v3230_v21, %v1240_v50  ;;  %v1227_v8 = vmul.f32 %v1977_v13, %v3201_v5 }
 0x47a   : > { %v1228_v30 = vmul.f32 %v1977_v13, %v3204_v7  ;;  %v1281_v12 = vmul.f32 %v3227_v17, %v1241_v2  ;;  %v1282_v61 = vmul.f32 %v3230_v21, %v1242_v42 }
 0x47b   : > { %v1319_v25 = vadd.f32 %v3233_v49, %v1279_v24  ;;  %v1320_v53 = vadd.f32 %v3236_v31, %v1280_v29  ;;  %v1267_v18 = vmul.f32 %v3227_v17, %v1227_v8 }
 0x47c   : > { %v1268_v14 = vmul.f32 %v3230_v21, %v1228_v30  ;;  %v1979_v59 = vpop.eup %1978  ;;  %v1321_v5 = vadd.f32 %v3233_v49, %v1281_v12  ;;  %v1322_v7 = vadd.f32 %v3236_v31, %v1282_v61 }
 0x47d   : > { %1351 = vst [vmem:[%s2701_s28 + $0xd0] sm:$0xff] %v1319_v25  ;;  %1352 = vst [vmem:[%s2701_s28 + $0xd8] sm:$0xff] %v1320_v53  ;;  %v1307_v35 = vadd.f32 %v3233_v49, %v1267_v18  ;;  %v1243_v6 = vmul.f32 %v1979_v59, %v3211_v44  ;;  %v1244_v38 = vmul.f32 %v1979_v59, %v3214_v19 }
 0x47e   : > { %v1308_v11 = vadd.f32 %v3236_v31, %v1268_v14  ;;  %1353 = vst [vmem:[%s2701_s28 + $0xe0] sm:$0xff] %v1321_v5  ;;  %1354 = vst [vmem:[%s2701_s28 + $0xe8] sm:$0xff] %v1322_v7 }
 0x47f   : > { %1339 = vst [vmem:[%s2701_s28 + $0x70] sm:$0xff] %v1307_v35  ;;  %v1283_v45 = vmul.f32 %v3227_v17, %v1243_v6  ;;  %v1284_v3 = vmul.f32 %v3230_v21, %v1244_v38 }
 0x480   : > { %1340 = vst [vmem:[%s2701_s28 + $0x78] sm:$0xff] %v1308_v11 }
 0x481   : > { %v1323_v28 = vadd.f32 %v3233_v49, %v1283_v45  ;;  %v1324_v39 = vadd.f32 %v3236_v31, %v1284_v3 }
 0x483   : > { %1355 = vst [vmem:[%s2701_s28 + $0xf0] sm:$0xff] %v1323_v28  ;;  %1356 = vst [vmem:[%s2701_s28 + $0xf8] sm:$0xff] %v1324_v39 }
 0x484 PF: > { %s3540_s19 = sld [smem:[#allocation30_spill]]  ;;  %s3542_s25 = sld [smem:[#allocation34_spill]] }
 0x485   : > { %s3543_s13 = sld [smem:[#allocation42_spill]]  ;;  %s1372_s2 = sshll.u32 %s2701_s28, 4  ;;  %s3373_s2 = int_to_ptr.vmem [resolvable:$true] %s1372_s2 }
 0x486   : > { %s3377_s16 = scalar_lea.sflag [#allocation8], %s335_s24  ;;  %s2090_s6 = scalar_lea.vmem %s3373_s2, 4096 }
 0x487   : > { %p2091_p3 = scmp.ne.s32.totalorder %s3373_s2, %s2090_s6  ;;  %s2259_s4 = smov [#allocation12]  }
 0x488   : > { %s2094_s26 = sshll.u32 %s2259_s4, 4  ;;  %s2095_s26 = int_to_ptr.vmem [resolvable:$false] %s2094_s26 }
 0x489   : > { %s2096_s27 = scalar_lea.vmem %s2095_s26, 8192  ;;  %p2097_p13 = scmp.lt.s32.totalorder %s3373_s2, %s2095_s26 }
 0x48a   : > { %s1531_s12 = sshll.u32 %s3540_s19, 12  ;;  %p3545_p2 = scmp.ne.s32.totalorder %s3542_s25, 0 }
 0x48b   : > { %s3544_s29 = smov %s3543_s13  ;;  %s3370_s1 = scalar_lea.hbm %s3543_s13, %s1531_s12 }
 0x48c   : > { %p2092_p1 = pnand %p2091_p3, %p3545_p2  ;;  %p2098_p9 = scmp.lt.s32.totalorder %s2096_s27, %s2090_s6 }
 0x48e   : > { %p2093_p11 = pneg %p2092_p1  ;;  %p2099_p7 = por %p2098_p9, %p2097_p13 }
 0x490   : > { %p2100_p10 = pnand %p2099_p7, %p2093_p11 }
 0x492   : > { %2103 = shalt.err (!%p2100_p10)
}
 0x493   : > { %s2104_s24 = scalar_lea.hbm %s3370_s1, 4096  ;;  %s2108_s5 = scalar_lea.hbm %s3544_s29, 8192 }
 0x494   : > { %p2105_p6 = scmp.ne.s32.totalorder %s3370_s1, %s2104_s24  ;;  %p2109_p0 = scmp.lt.u32.totalorder %s3370_s1, %s3544_s29 }
 0x495   : > { %p2110_p8 = scmp.lt.u32.totalorder %s2108_s5, %s2104_s24  ;;  %p2112_p3 = scmp.lt.u32.totalorder %s2104_s24, %s3370_s1 }
 0x496   : > { %p2106_p4 = pnand %p2105_p6, %p3545_p2 }
 0x497   : > { %p2111_p12 = por %p2110_p8, %p2109_p0 }
 0x498   : > { %p2107_p5 = pneg %p2106_p4 }
 0x499   : > { %p2113_p1 = por %p2112_p3, %p2111_p12 }
 0x49b   : > { %p2114_p11 = pnand %p2113_p1, %p2107_p5 }
 0x49d   : > { %2117 = shalt.err (!%p2114_p11)
}
 0x49e   : > { %s2260_s19 = smov 256   ;;  %s2261_s0 = smov 16  }
 0x49f   : > { %1732 = dma.vmem_to_hbm [thread:$0]  (%p3545_p2), %s3373_s2, 4096, %s3370_s1, %s3377_s16, %s2260_s19, %s2260_s19, %s2261_s0  }
 0x4a0 PF: > { %s3546_s12 = sld [smem:[#allocation26_spill]]  ;;  %s3547_s8 = sld [smem:[#allocation35_spill]] }
 0x4a1   : > { %p1760_p13 = scmp.ge.s32.totalorder %s2246_s23, 2 }
 0x4a6   : > { %s1387_s20 = sand.u32 1, %s3546_s12   ;;  %p3548_p9 = scmp.ne.s32.totalorder %s3547_s8, 0 }
 0x4a7   : > { %s1388_s13 = scalar_lea.sflag [#allocation8], %s1387_s20 }
 0x4a8   : > { %p1754_p7 = pnand %p1760_p13, %p3548_p9 }
 0x4aa   : > { %2189 = dma.done.wait (!%p1754_p7), %s1388_s13, 4096  }
 0x4ab   : > { %2191 = vsyncadd (!%p1754_p7), %s1388_s13, 4294963200  ;;  %s33_s23 = sadd.s32 1, %s2246_s23   ;;  %s3550_s0 = sld [smem:[#allocation27_spill]] }
 0x4ac   : > { %p3406_p10 = scmp.ge.s32.totalorder %s33_s23, 6   ;;  %s3551_s1 = sld [smem:[#allocation28_spill]] }
 0x4ad   : > { %s3552_s12 = sld [smem:[#allocation36_spill]]  ;;  %s3553_s25 = sld [smem:[#allocation38_spill]] }
 0x4ae   : > { %s3554_s2 = sld [smem:[#allocation37_spill]]  ;;  %s3555_s4 = sld [smem:[#allocation33_spill]] }
 0x4af   : > { %s3556_s13 = smov %s2210_s14  ;;  %s3557_s14 = smov %s2214_s15 }
 0x4b0   : > { %s3558_s15 = smov %s2623_s7  ;;  %s3559_s16 = smov %s2222_s17 }
 0x4b1   : > { %s3560_s17 = smov %s2226_s18  ;;  %s3562_s19 = smov %s2238_s21 }
 0x4b2   : > { %s3563_s20 = smov %s2242_s22  ;;  %32 = sbr.rel (!%p3406_p10) target bundleno = 35 (0x23), region = 110 }
 0x4b3   : > { %s3561_s18 = smov %s3553_s25 }
 0x4b4   : > { %s3564_s21 = smov %s3554_s2  ;;  %s3565_s22 = smov %s3555_s4 }
 0x4b9   :  { %1393 = vsyncpa [#allocation7], 1 }
 0x4ba   :  { %1395 = vsyncpa [#allocation7 + $0x1], 1 }
 0x4bb   :  { %1396 = vsyncpa [#allocation10], 1 }
 0x4bc   :  { %1398 = vsyncpa [#allocation10 + $0x1], 1 }
 0x4bd   :  { %1399 = vsyncpa [#allocation8], 1 }
 0x4be   :  { %1401 = vsyncpa [#allocation8 + $0x1], 1 }

</bundles_post_ra>
